<compile_context>
chip_gen: v6e
topology: v6e:2x2x1
jax: 0.10.0
libtpu: 0.0.40
codegen_flags: <defaults>
</compile_context>

<pallas_src>
import functools

import jax
import jax.numpy as jnp
from jax.experimental import pallas as pl
from jax.experimental.pallas import tpu as pltpu


# --------------------------- Kernel 1: fused GCN stack -----------------------

def gcn_stack_kernel(a_ref, x_ref, wg1_ref, bg1_ref, w2_ref, b2_ref,
                     w3_ref, b3_ref, ws3_ref, bs3_ref, o_ref, *, d2, d3):
    """G graphs per grid step (block-diagonal adjacency, G*n rows).

      h1        = relu(A @ (X  @ Wg1)          + bg1)
      [h2 | s1] =      A @ (h1 @ [Wg2 | Ws1])  + [bg2 | bs1]   (relu / sigmoid)
      [h3 | s2] =      A @ (h2 @ [Wg3 | Ws2])  + [bg3 | bs2]   (relu / sigmoid)
      s3        = sigmoid(A @ (h3 * Ws3)       + bs3)
      out       = concat([s1*h1, s2*h2, s3*h3]), lane-padded to o_ref width.
    """
    f32 = jnp.float32
    bf16 = jnp.bfloat16
    a = a_ref[0]                                 # [gn, gn] bf16 block-diagonal
    x = x_ref[...].astype(bf16)                  # [gn, fin]
    d1 = wg1_ref.shape[1]
    gn = a.shape[0]
    d_pad = o_ref.shape[1]

    # layer 1
    t1 = jnp.dot(x, wg1_ref[...].astype(bf16), preferred_element_type=f32)
    h1 = jnp.dot(a, t1.astype(bf16), preferred_element_type=f32) + bg1_ref[...]
    h1 = jnp.maximum(h1, 0.0)

    # layer 2 + score1 share one A-aggregation (score column rides along;
    # weight is zero-padded to a full 128-lane tile).
    t2 = jnp.dot(h1.astype(bf16), w2_ref[...].astype(bf16),
                 preferred_element_type=f32)
    y2 = jnp.dot(a, t2.astype(bf16), preferred_element_type=f32) + b2_ref[...]
    h2 = jnp.maximum(y2[:, :d2], 0.0)
    x1 = jax.nn.sigmoid(y2[:, d2:d2 + 1]) * h1

    # layer 3 + score2 share one A-aggregation
    t3 = jnp.dot(h2.astype(bf16), w3_ref[...].astype(bf16),
                 preferred_element_type=f32)
    y3 = jnp.dot(a, t3.astype(bf16), preferred_element_type=f32) + b3_ref[...]
    h3 = jnp.maximum(y3[:, :d3], 0.0)
    x2 = jax.nn.sigmoid(y3[:, d3:d3 + 1]) * h2

    # score3 (latent_dim[2] == 1, so Ws3 is a [1,1] scale)
    z3 = jnp.dot(a, (h3 * ws3_ref[...]).astype(bf16),
                 preferred_element_type=f32) + bs3_ref[...]
    x3 = jax.nn.sigmoid(z3) * h3

    # Lane-dense store: channels [d1+d2 .. d_pad) all hold x3; the matching
    # rows of the zero-padded conv1d weight are zero, so this equals zero-
    # padding the 129-wide concat to 256 lanes.  Real last channel = d1+d2.
    tail = jnp.broadcast_to(x3, (gn, d_pad - d1 - d2))
    o_ref[...] = jnp.concatenate([x1, x2, tail], axis=1)


# ------------------------- Kernel 2: conv head (batched) ---------------------

def head_conv_kernel(evod_ref, wc1_ref, bc1_ref, wc2f_ref, bc2_ref, o_ref,
                     *, taps):
    """Conv1d(1,c1,D,D)+ReLU -> MaxPool1d(2,2) -> Conv1d(c1,c2,5,1)+ReLU.

    evod_ref rows: first G*kh rows = even ranks of G graphs (graph-major),
    next G*kh rows = odd ranks.  One matmul per stage for all G graphs.
    """
    f32 = jnp.float32
    bf16 = jnp.bfloat16
    rows = evod_ref.shape[0]
    half = rows // 2                                   # G*kh
    c1 = wc1_ref.shape[1]

    # Conv1d(1, c1, D, stride=D): one matmul over all even + odd rank rows.
    h = jnp.dot(evod_ref[...].astype(bf16), wc1_ref[...].astype(bf16),
                preferred_element_type=f32) + bc1_ref[...]
    h = jnp.maximum(h, 0.0)                            # [2*G*kh, c1]
    # MaxPool1d(2, 2): max of the even-rank half vs. the odd-rank half.
    h1p = jnp.maximum(h[:half, :], h[half:, :])        # [G*kh, c1]

    # Conv1d(c1, c2, taps, 1) as a single im2col matmul.  Rows whose window
    # straddles a graph boundary (rank >= l2) are garbage; the lin1 weight
    # rows for those ranks are zero, so they never contribute downstream.
    h1p_pad = jnp.concatenate(
        [h1p, jnp.zeros((taps - 1, c1), f32)], axis=0)  # [G*kh + taps-1, c1]
    cols = jnp.concatenate(
        [h1p_pad[dt:dt + half, :] for dt in range(taps)], axis=1)  # [G*kh, 5*c1]
    h2 = jnp.dot(cols.astype(bf16), wc2f_ref[...].astype(bf16),
                 preferred_element_type=f32) + bc2_ref[...]
    o_ref[...] = jnp.maximum(h2, 0.0)                  # [G*kh, c2]


# --------------------------- Kernel 3: dense head -----------------------------

def dense_head_kernel(x_ref, wl1_ref, bl1_ref, wl2_ref, bl2_ref, o_ref):
    """Linear(kh*c2 -> H)+ReLU -> Linear(H -> 1), all graphs in one step.
    wl1 is pre-permuted (channel-major torch flatten absorbed) and zero-padded
    for the invalid conv2 rows, so one matmul covers lin1 exactly."""
    f32 = jnp.float32
    bf16 = jnp.bfloat16
    h = jnp.dot(x_ref[...].astype(bf16), wl1_ref[...].astype(bf16),
                preferred_element_type=f32) + bl1_ref[...]
    h = jnp.maximum(h, 0.0)                            # [B, H]
    # Linear(H -> 1) on the VPU (avoid a 1-lane MXU matmul).
    o_ref[...] = jnp.sum(h * wl2_ref[...], axis=1, keepdims=True) + bl2_ref[...]


# ------------------------------- PSGCN forward -------------------------------

def psgcn_forward(x, a_blocks, params, *, batch_size, n_per_graph, k):
    """x: [B*n, F_in] node features; a_blocks: [B, n, n] per-graph GCN-normalized
    adjacency (block-diagonal batch structure is exploited directly)."""
    p = params
    f32 = jnp.float32
    b = batch_size
    n = n_per_graph
    fin = x.shape[-1]
    d1 = p["w_g1"].shape[1]
    d2 = p["w_g2"].shape[1]
    d3 = p["w_g3"].shape[1]
    assert d3 == 1, "tail-broadcast / score3 fusion assumes latent_dim[2] == 1"
    d_total = d1 + d2 + d3                         # 129
    d_pad = ((d_total + 127) // 128) * 128         # lane-dense concat width
    pad2 = ((d2 + 1 + 127) // 128) * 128           # padded [Wg2|Ws1] width
    pad3 = ((d3 + 1 + 127) // 128) * 128           # padded [Wg3|Ws2] width

    c1 = p["w_c1"].shape[1]                        # 16
    taps = p["w_c2"].shape[0]                      # 5
    c2 = p["w_c2"].shape[2]                        # 32
    hidden = p["w_l1"].shape[1]                    # 128
    kh = (k - 2) // 2 + 1                          # width after MaxPool1d(2,2)
    l2 = kh - taps + 1                             # width after Conv1d(c1,c2,5,1)

    # Graphs per grid step: fill ~256 MXU rows (v6e/v7x; 128//n would suit
    # v5e's 128-wide MXU).  b is zero-padded to a multiple of G; with the
    # default test config grid length is even so both v7x TensorCores get work.
    G = max(1, min(b, max(1, 256 // n)))
    nb = -(-b // G)
    b_pad = nb * G
    gn = G * n

    x_b = x.reshape(b, n, fin)
    a_b = a_blocks
    if b_pad != b:
        x_b = jnp.pad(x_b, ((0, b_pad - b), (0, 0), (0, 0)))
        a_b = jnp.pad(a_b, ((0, b_pad - b), (0, 0), (0, 0)))
    x_flat = x_b.reshape(b_pad * n, fin)

    # Dense block-diagonal per-step adjacency (bf16 MXU operand, half the DMA).
    eye_g = jnp.eye(G, dtype=f32)
    a_bd = (a_b.reshape(nb, G, n, 1, n) * eye_g[None, :, None, :, None])
    a_bd = a_bd.reshape(nb, gn, gn).astype(jnp.bfloat16)

    # ---- trace-time weight re-layout (tiny; folded by XLA) ----
    w2cat = (jnp.zeros((d1, pad2), f32)
             .at[:, :d2].set(p["w_g2"]).at[:, d2].set(p["w_s1"][:, 0]))
    b2cat = (jnp.zeros((1, pad2), f32)
             .at[0, :d2].set(p["b_g2"]).at[0, d2].set(p["b_s1"][0]))
    w3cat = (jnp.zeros((d2, pad3), f32)
             .at[:, :d3].set(p["w_g3"]).at[:, d3].set(p["w_s2"][:, 0]))
    b3cat = (jnp.zeros((1, pad3), f32)
             .at[0, :d3].set(p["b_g3"]).at[0, d3].set(p["b_s2"][0]))

    concat = pl.pallas_call(
        functools.partial(gcn_stack_kernel, d2=d2, d3=d3),
        grid=(nb,),
        out_shape=jax.ShapeDtypeStruct((b_pad * n, d_pad), f32),
        in_specs=[
            pl.BlockSpec((1, gn, gn), lambda i: (i, 0, 0)),
            pl.BlockSpec((gn, fin), lambda i: (i, 0)),
            pl.BlockSpec((fin, d1), lambda i: (0, 0)),
            pl.BlockSpec((1, d1), lambda i: (0, 0)),
            pl.BlockSpec((d1, pad2), lambda i: (0, 0)),
            pl.BlockSpec((1, pad2), lambda i: (0, 0)),
            pl.BlockSpec((d2, pad3), lambda i: (0, 0)),
            pl.BlockSpec((1, pad3), lambda i: (0, 0)),
            pl.BlockSpec((d3, 1), lambda i: (0, 0)),
            pl.BlockSpec((1, 1), lambda i: (0, 0)),
        ],
        out_specs=pl.BlockSpec((gn, d_pad), lambda i: (i, 0)),
        compiler_params=pltpu.CompilerParams(dimension_semantics=("parallel",)),
    )(a_bd, x_flat, p["w_g1"], p["b_g1"][None, :], w2cat, b2cat, w3cat, b3cat,
      p["w_s3"], p["b_s3"][None, :])

    # ---- global_sort_pool glue (plain XLA: data-dependent top-k + gather) ----
    dense = concat.reshape(b_pad, n, d_pad)
    sort_key = dense[:, :, d_total - 1]            # last real channel (= x3)
    if n < k:                                      # pad as in torch_geometric
        dense = jnp.pad(dense, ((0, 0), (0, k - n), (0, 0)))
        sort_key = jnp.pad(sort_key, ((0, 0), (0, k - n)),
                           constant_values=-jnp.inf)
    _, idx = jax.lax.top_k(sort_key, k)            # descending, keep top-k
    idx = idx[:, :2 * kh]
    # Fold the MaxPool1d(2,2) even/odd split into the gather order so the head
    # kernel can run conv1 as a single matmul and max the two halves in-kernel.
    ev = jnp.take_along_axis(dense, idx[:, 0::2, None], axis=1)  # [b,kh,d_pad]
    od = jnp.take_along_axis(dense, idx[:, 1::2, None], axis=1)
    head_in = jnp.concatenate(
        [ev.reshape(nb, G * kh, d_pad), od.reshape(nb, G * kh, d_pad)], axis=1)
    head_in = head_in.reshape(nb * 2 * G * kh, d_pad)

    # ---- head weight re-layout ----
    # Conv1d(1,c1,D,D) weight, zero-padded along the lane-padded concat dim.
    w_c1p = jnp.zeros((d_pad, c1), f32).at[:d_total, :].set(p["w_c1"])
    # Conv1d(c1,c2,5,1) weight flattened for the im2col matmul (row = dt*c1+cin).
    w_c2f = p["w_c2"].reshape(taps * c1, c2)

    conv_out = pl.pallas_call(
        functools.partial(head_conv_kernel, taps=taps),
        grid=(nb,),
        out_shape=jax.ShapeDtypeStruct((b_pad * kh, c2), f32),
        in_specs=[
            pl.BlockSpec((2 * G * kh, d_pad), lambda i: (i, 0)),
            pl.BlockSpec((d_pad, c1), lambda i: (0, 0)),
            pl.BlockSpec((1, c1), lambda i: (0, 0)),
            pl.BlockSpec((taps * c1, c2), lambda i: (0, 0)),
            pl.BlockSpec((1, c2), lambda i: (0, 0)),
        ],
        out_specs=pl.BlockSpec((G * kh, c2), lambda i: (i, 0)),
        compiler_params=pltpu.CompilerParams(dimension_semantics=("parallel",)),
    )(head_in, w_c1p, p["b_c1"][None, :], w_c2f, p["b_c2"][None, :])

    # lin1: absorb PyTorch's channel-major flatten AND the conv2 garbage-rank
    # masking into a pre-permuted, zero-padded weight: row index = t*c2 + c,
    # zero for t >= l2.  The [b_pad*kh, c2] -> [b_pad, kh*c2] reshape is a free
    # row-major XLA reshape.
    w_l1r = p["w_l1"].reshape(c2, l2, hidden).transpose(1, 0, 2)   # [l2,c2,H]
    w_l1e = (jnp.zeros((kh, c2, hidden), f32).at[:l2].set(w_l1r)
             .reshape(kh * c2, hidden))
    h2_flat = conv_out.reshape(b_pad, kh * c2)

    out = pl.pallas_call(
        dense_head_kernel,
        grid=(1,),
        out_shape=jax.ShapeDtypeStruct((b_pad, 1), f32),
        in_specs=[
            pl.BlockSpec((b_pad, kh * c2), lambda i: (0, 0)),
            pl.BlockSpec((kh * c2, hidden), lambda i: (0, 0)),
            pl.BlockSpec((1, hidden), lambda i: (0, 0)),
            pl.BlockSpec((1, hidden), lambda i: (0, 0)),
            pl.BlockSpec((1, 1), lambda i: (0, 0)),
        ],
        out_specs=pl.BlockSpec((b_pad, 1), lambda i: (0, 0)),
        compiler_params=pltpu.CompilerParams(dimension_semantics=("arbitrary",)),
    )(h2_flat, p["b_l1"][None, :] * 0 + p["b_l1"][None, :]
      if False else h2_flat, w_l1e, p["b_l1"][None, :],
      p["w_l2"].T, p["b_l2"][None, :])[0] if False else pl.pallas_call(
        dense_head_kernel,
        grid=(1,),
        out_shape=jax.ShapeDtypeStruct((b_pad, 1), f32),
        in_specs=[
            pl.BlockSpec((b_pad, kh * c2), lambda i: (0, 0)),
            pl.BlockSpec((kh * c2, hidden), lambda i: (0, 0)),
            pl.BlockSpec((1, hidden), lambda i: (0, 0)),
            pl.BlockSpec((1, hidden), lambda i: (0, 0)),
            pl.BlockSpec((1, 1), lambda i: (0, 0)),
        ],
        out_specs=pl.BlockSpec((b_pad, 1), lambda i: (0, 0)),
        compiler_params=pltpu.CompilerParams(dimension_semantics=("arbitrary",)),
    )(h2_flat, w_l1e, p["b_l1"][None, :], p["w_l2"].T, p["b_l2"][None, :])

    return out[:b, 0]


# ----------------------------------- main ------------------------------------

if __name__ == "__main__":
    B = 16             # number of graphs (2 grid steps of 8 graphs each)
    N_PER = 32         # nodes per graph (equal-sized graphs)
    F_IN = 32          # dataset.num_features
    LATENT = [64, 64, 1]
    K_POOL = 30        # sort-pool k (module default)
    D_TOTAL = sum(LATENT)                 # 129
    KH = (K_POOL - 2) // 2 + 1            # 15
    L2 = KH - 5 + 1                       # 11
    DENSE_DIM = 32 * L2                   # 352

    key = jax.random.PRNGKey(0)
    keys = jax.random.split(key, 20)

    # node features
    x = jax.random.normal(keys[0], (B * N_PER, F_IN), dtype=jnp.float32)

    # per-graph random undirected adjacency (block-diagonal batch graph),
    # self-loops + symmetric GCN normalization: A_norm = D^-1/2 (A+I) D^-1/2
    rand = jax.random.uniform(keys[1], (B, N_PER, N_PER))
    adj = (rand < 0.15).astype(jnp.float32)
    adj = jnp.maximum(adj, adj.transpose(0, 2, 1))
    eye = jnp.eye(N_PER, dtype=jnp.float32)[None]
    adj = adj * (1.0 - eye)
    a_hat = adj + eye
    d_inv_sqrt = 1.0 / jnp.sqrt(a_hat.sum(axis=2))
    a_blocks = a_hat * d_inv_sqrt[:, :, None] * d_inv_sqrt[:, None, :]

    def init(k_, shape, scale=0.1):
        return (scale * jax.random.normal(k_, shape)).astype(jnp.float32)

    # PyTorch-equivalent parameter layouts:
    #   GCNConv / Linear weights stored transposed as [in, out]
    #   conv1d_params1 torch weight [16,1,129] -> w_c1 [129, 16]
    #   conv1d_params2 torch weight [32,16,5]  -> w_c2 [dt, c_in, c_out] = [5,16,32]
    #   lin1 torch weight [128,352]            -> w_l1 [352,128] (rows = c*L2+t)
    params = {
        "w_g1": init(keys[2], (F_IN, LATENT[0])), "b_g1": init(keys[3], (LATENT[0],)),
        "w_g2": init(keys[4], (LATENT[0], LATENT[1])), "b_g2": init(keys[5], (LATENT[1],)),
        "w_g3": init(keys[6], (LATENT[1], LATENT[2])), "b_g3": init(keys[7], (LATENT[2],)),
        "w_s1": init(keys[8], (LATENT[0], 1)), "b_s1": init(keys[9], (1,)),
        "w_s2": init(keys[10], (LATENT[1], 1)), "b_s2": init(keys[11], (1,)),
        "w_s3": init(keys[12], (LATENT[2], 1)), "b_s3": init(keys[13], (1,)),
        "w_c1": init(keys[14], (D_TOTAL, 16)), "b_c1": init(keys[15], (16,)),
        "w_c2": init(keys[16], (5, 16, 32)), "b_c2": init(keys[17], (32,)),
        "w_l1": init(keys[18], (DENSE_DIM, 128)), "b_l1": jnp.zeros((128,), jnp.float32),
        "w_l2": init(keys[19], (128, 1)), "b_l2": jnp.zeros((1,), jnp.float32),
    }

    fwd = jax.jit(functools.partial(psgcn_forward, batch_size=B,
                                    n_per_graph=N_PER, k=K_POOL))
    out = jax.block_until_ready(fwd(x, a_blocks, params))
    assert out.shape == (B,) and out.dtype == jnp.float32
    assert bool(jnp.all(jnp.isfinite(out)))
    print("KERNEL_OK")
</pallas_src>

<mosaic_0001>
module attributes {stable_mosaic.version = 11 : i64} {
  func.func @gcn_stack_kernel(%arg0: i32, %arg1: memref<1x256x256xbf16, #tpu.memory_space<vmem>>, %arg2: memref<256x32xf32, #tpu.memory_space<vmem>>, %arg3: memref<32x64xf32, #tpu.memory_space<vmem>>, %arg4: memref<1x64xf32, #tpu.memory_space<vmem>>, %arg5: memref<64x128xf32, #tpu.memory_space<vmem>>, %arg6: memref<1x128xf32, #tpu.memory_space<vmem>>, %arg7: memref<64x128xf32, #tpu.memory_space<vmem>>, %arg8: memref<1x128xf32, #tpu.memory_space<vmem>>, %arg9: memref<1x1xf32, #tpu.memory_space<vmem>>, %arg10: memref<1x1xf32, #tpu.memory_space<vmem>>, %arg11: memref<256x256xf32, #tpu.memory_space<vmem>>) attributes {dimension_semantics = [#tpu.dimension_semantics<parallel>], iteration_bounds = array<i64: 2>, scalar_prefetch = 0 : i64, scratch_operands = 0 : i64, tpu.core_type = #tpu.core_type<tc>, window_params = [{transform_indices = @transform_0, window_bounds = array<i64: 1, 256, 256>}, {transform_indices = @transform_1, window_bounds = array<i64: 256, 32>}, {pipeline_mode = #tpu.pipeline_mode<synchronous>, transform_indices = @transform_2, window_bounds = array<i64: 32, 64>}, {pipeline_mode = #tpu.pipeline_mode<synchronous>, transform_indices = @transform_3, window_bounds = array<i64: 1, 64>}, {pipeline_mode = #tpu.pipeline_mode<synchronous>, transform_indices = @transform_4, window_bounds = array<i64: 64, 128>}, {pipeline_mode = #tpu.pipeline_mode<synchronous>, transform_indices = @transform_5, window_bounds = array<i64: 1, 128>}, {pipeline_mode = #tpu.pipeline_mode<synchronous>, transform_indices = @transform_6, window_bounds = array<i64: 64, 128>}, {pipeline_mode = #tpu.pipeline_mode<synchronous>, transform_indices = @transform_7, window_bounds = array<i64: 1, 128>}, {pipeline_mode = #tpu.pipeline_mode<synchronous>, transform_indices = @transform_8, window_bounds = array<i64: 1, 1>}, {pipeline_mode = #tpu.pipeline_mode<synchronous>, transform_indices = @transform_9, window_bounds = array<i64: 1, 1>}, {transform_indices = @transform_10, window_bounds = array<i64: 256, 256>}]} {
    %c0 = arith.constant 0 : index
    %c0_0 = arith.constant 0 : index
    %c0_1 = arith.constant 0 : index
    %0 = vector.load %arg1[%c0, %c0_0, %c0_1] : memref<1x256x256xbf16, #tpu.memory_space<vmem>>, vector<1x256x256xbf16>
    %1 = vector.shape_cast %0 : vector<1x256x256xbf16> to vector<256x256xbf16>
    %c0_2 = arith.constant 0 : index
    %c0_3 = arith.constant 0 : index
    %2 = vector.load %arg2[%c0_2, %c0_3] : memref<256x32xf32, #tpu.memory_space<vmem>>, vector<256x32xf32>
    %3 = arith.truncf %2 : vector<256x32xf32> to vector<256x32xbf16>
    %c0_4 = arith.constant 0 : index
    %c0_5 = arith.constant 0 : index
    %4 = vector.load %arg3[%c0_4, %c0_5] : memref<32x64xf32, #tpu.memory_space<vmem>>, vector<32x64xf32>
    %5 = arith.truncf %4 : vector<32x64xf32> to vector<32x64xbf16>
    %cst = arith.constant dense<0.000000e+00> : vector<256x64xf32>
    %6 = tpu.matmul %3, %5, %cst {dimension_numbers = #tpu.dot_dimension_numbers<[1], [0], [0], [1], [0, 0, 1, 1], [], []>} : vector<256x32xbf16>, vector<32x64xbf16>, vector<256x64xf32> -> vector<256x64xf32>
    %7 = arith.truncf %6 : vector<256x64xf32> to vector<256x64xbf16>
    %cst_6 = arith.constant dense<0.000000e+00> : vector<256x64xf32>
    %8 = tpu.matmul %1, %7, %cst_6 {dimension_numbers = #tpu.dot_dimension_numbers<[1], [0], [0], [1], [0, 0, 1, 1], [], []>} : vector<256x256xbf16>, vector<256x64xbf16>, vector<256x64xf32> -> vector<256x64xf32>
    %c0_7 = arith.constant 0 : index
    %c0_8 = arith.constant 0 : index
    %9 = vector.load %arg4[%c0_7, %c0_8] : memref<1x64xf32, #tpu.memory_space<vmem>>, vector<1x64xf32>
    %10 = vector.broadcast %9 : vector<1x64xf32> to vector<256x64xf32>
    %11 = arith.addf %8, %10 : vector<256x64xf32>
    %cst_9 = arith.constant 0.000000e+00 : f32
    %12 = vector.broadcast %cst_9 : f32 to vector<256x64xf32>
    %13 = arith.maximumf %11, %12 : vector<256x64xf32>
    %14 = arith.truncf %13 : vector<256x64xf32> to vector<256x64xbf16>
    %c0_10 = arith.constant 0 : index
    %c0_11 = arith.constant 0 : index
    %15 = vector.load %arg5[%c0_10, %c0_11] : memref<64x128xf32, #tpu.memory_space<vmem>>, vector<64x128xf32>
    %16 = arith.truncf %15 : vector<64x128xf32> to vector<64x128xbf16>
    %cst_12 = arith.constant dense<0.000000e+00> : vector<256x128xf32>
    %17 = tpu.matmul %14, %16, %cst_12 {dimension_numbers = #tpu.dot_dimension_numbers<[1], [0], [0], [1], [0, 0, 1, 1], [], []>} : vector<256x64xbf16>, vector<64x128xbf16>, vector<256x128xf32> -> vector<256x128xf32>
    %18 = arith.truncf %17 : vector<256x128xf32> to vector<256x128xbf16>
    %cst_13 = arith.constant dense<0.000000e+00> : vector<256x128xf32>
    %19 = tpu.matmul %1, %18, %cst_13 {dimension_numbers = #tpu.dot_dimension_numbers<[1], [0], [0], [1], [0, 0, 1, 1], [], []>} : vector<256x256xbf16>, vector<256x128xbf16>, vector<256x128xf32> -> vector<256x128xf32>
    %c0_14 = arith.constant 0 : index
    %c0_15 = arith.constant 0 : index
    %20 = vector.load %arg6[%c0_14, %c0_15] : memref<1x128xf32, #tpu.memory_space<vmem>>, vector<1x128xf32>
    %21 = vector.broadcast %20 : vector<1x128xf32> to vector<256x128xf32>
    %22 = arith.addf %19, %21 : vector<256x128xf32>
    %23 = vector.extract_strided_slice %22 {offsets = [0, 0], sizes = [256, 64], strides = [1, 1]} : vector<256x128xf32> to vector<256x64xf32>
    %cst_16 = arith.constant 0.000000e+00 : f32
    %24 = vector.broadcast %cst_16 : f32 to vector<256x64xf32>
    %25 = arith.maximumf %23, %24 : vector<256x64xf32>
    %26 = vector.extract_strided_slice %22 {offsets = [0, 64], sizes = [256, 1], strides = [1, 1]} : vector<256x128xf32> to vector<256x1xf32>
    %27 = arith.negf %26 : vector<256x1xf32>
    %28 = math.exp %27 : vector<256x1xf32>
    %cst_17 = arith.constant 1.000000e+00 : f32
    %29 = vector.broadcast %cst_17 : f32 to vector<256x1xf32>
    %30 = arith.addf %29, %28 : vector<256x1xf32>
    %31 = arith.divf %29, %30 : vector<256x1xf32>
    %32 = vector.broadcast %31 : vector<256x1xf32> to vector<256x64xf32>
    %33 = arith.mulf %32, %13 : vector<256x64xf32>
    %34 = arith.truncf %25 : vector<256x64xf32> to vector<256x64xbf16>
    %c0_18 = arith.constant 0 : index
    %c0_19 = arith.constant 0 : index
    %35 = vector.load %arg7[%c0_18, %c0_19] : memref<64x128xf32, #tpu.memory_space<vmem>>, vector<64x128xf32>
    %36 = arith.truncf %35 : vector<64x128xf32> to vector<64x128xbf16>
    %cst_20 = arith.constant dense<0.000000e+00> : vector<256x128xf32>
    %37 = tpu.matmul %34, %36, %cst_20 {dimension_numbers = #tpu.dot_dimension_numbers<[1], [0], [0], [1], [0, 0, 1, 1], [], []>} : vector<256x64xbf16>, vector<64x128xbf16>, vector<256x128xf32> -> vector<256x128xf32>
    %38 = arith.truncf %37 : vector<256x128xf32> to vector<256x128xbf16>
    %cst_21 = arith.constant dense<0.000000e+00> : vector<256x128xf32>
    %39 = tpu.matmul %1, %38, %cst_21 {dimension_numbers = #tpu.dot_dimension_numbers<[1], [0], [0], [1], [0, 0, 1, 1], [], []>} : vector<256x256xbf16>, vector<256x128xbf16>, vector<256x128xf32> -> vector<256x128xf32>
    %c0_22 = arith.constant 0 : index
    %c0_23 = arith.constant 0 : index
    %40 = vector.load %arg8[%c0_22, %c0_23] : memref<1x128xf32, #tpu.memory_space<vmem>>, vector<1x128xf32>
    %41 = vector.broadcast %40 : vector<1x128xf32> to vector<256x128xf32>
    %42 = arith.addf %39, %41 : vector<256x128xf32>
    %43 = vector.extract_strided_slice %42 {offsets = [0, 0], sizes = [256, 1], strides = [1, 1]} : vector<256x128xf32> to vector<256x1xf32>
    %cst_24 = arith.constant 0.000000e+00 : f32
    %44 = vector.broadcast %cst_24 : f32 to vector<256x1xf32>
    %45 = arith.maximumf %43, %44 : vector<256x1xf32>
    %46 = vector.extract_strided_slice %42 {offsets = [0, 1], sizes = [256, 1], strides = [1, 1]} : vector<256x128xf32> to vector<256x1xf32>
    %47 = arith.negf %46 : vector<256x1xf32>
    %48 = math.exp %47 : vector<256x1xf32>
    %cst_25 = arith.constant 1.000000e+00 : f32
    %49 = vector.broadcast %cst_25 : f32 to vector<256x1xf32>
    %50 = arith.addf %49, %48 : vector<256x1xf32>
    %51 = arith.divf %49, %50 : vector<256x1xf32>
    %52 = vector.broadcast %51 : vector<256x1xf32> to vector<256x64xf32>
    %53 = arith.mulf %52, %25 : vector<256x64xf32>
    %c0_26 = arith.constant 0 : index
    %c0_27 = arith.constant 0 : index
    %54 = vector.load %arg9[%c0_26, %c0_27] : memref<1x1xf32, #tpu.memory_space<vmem>>, vector<1x1xf32>
    %55 = vector.broadcast %54 : vector<1x1xf32> to vector<256x1xf32>
    %56 = arith.mulf %45, %55 : vector<256x1xf32>
    %57 = arith.truncf %56 : vector<256x1xf32> to vector<256x1xbf16>
    %cst_28 = arith.constant dense<0.000000e+00> : vector<256x1xf32>
    %58 = tpu.matmul %1, %57, %cst_28 {dimension_numbers = #tpu.dot_dimension_numbers<[1], [0], [0], [1], [0, 0, 1, 1], [], []>} : vector<256x256xbf16>, vector<256x1xbf16>, vector<256x1xf32> -> vector<256x1xf32>
    %c0_29 = arith.constant 0 : index
    %c0_30 = arith.constant 0 : index
    %59 = vector.load %arg10[%c0_29, %c0_30] : memref<1x1xf32, #tpu.memory_space<vmem>>, vector<1x1xf32>
    %60 = vector.broadcast %59 : vector<1x1xf32> to vector<256x1xf32>
    %61 = arith.addf %58, %60 : vector<256x1xf32>
    %62 = arith.negf %61 : vector<256x1xf32>
    %63 = math.exp %62 : vector<256x1xf32>
    %cst_31 = arith.constant 1.000000e+00 : f32
    %64 = vector.broadcast %cst_31 : f32 to vector<256x1xf32>
    %65 = arith.addf %64, %63 : vector<256x1xf32>
    %66 = arith.divf %64, %65 : vector<256x1xf32>
    %67 = arith.mulf %66, %45 : vector<256x1xf32>
    %68 = vector.shape_cast %67 : vector<256x1xf32> to vector<256x1xf32>
    %69 = vector.broadcast %68 : vector<256x1xf32> to vector<256x128xf32>
    %70 = tpu.concatenate %33, %53, %69 in 1 : vector<256x64xf32>, vector<256x64xf32>, vector<256x128xf32> -> vector<256x256xf32>
    %c0_32 = arith.constant 0 : index
    %c0_33 = arith.constant 0 : index
    %71 = vector.load %arg11[%c0_32, %c0_33] : memref<256x256xf32, #tpu.memory_space<vmem>>, vector<256x256xf32>
    tpu.vector_store %arg11[%c0_32, %c0_33], %70 {strides = array<i32>} : memref<256x256xf32, #tpu.memory_space<vmem>>, vector<256x256xf32>,
    return
  }
  func.func @transform_0(%arg0: i32) -> (i32, i32, i32) {
    %c0_i32 = arith.constant 0 : i32
    %c0_i32_0 = arith.constant 0 : i32
    %c0_i32_1 = arith.constant 0 : i32
    return %arg0, %c0_i32, %c0_i32_0 : i32, i32, i32
  }
  func.func @transform_1(%arg0: i32) -> (i32, i32) {
    %c0_i32 = arith.constant 0 : i32
    %c0_i32_0 = arith.constant 0 : i32
    return %arg0, %c0_i32 : i32, i32
  }
  func.func @transform_2(%arg0: i32) -> (i32, i32) {
    %c0_i32 = arith.constant 0 : i32
    %c0_i32_0 = arith.constant 0 : i32
    %c0_i32_1 = arith.constant 0 : i32
    return %c0_i32, %c0_i32_0 : i32, i32
  }
  func.func @transform_3(%arg0: i32) -> (i32, i32) {
    %c0_i32 = arith.constant 0 : i32
    %c0_i32_0 = arith.constant 0 : i32
    %c0_i32_1 = arith.constant 0 : i32
    return %c0_i32, %c0_i32_0 : i32, i32
  }
  func.func @transform_4(%arg0: i32) -> (i32, i32) {
    %c0_i32 = arith.constant 0 : i32
    %c0_i32_0 = arith.constant 0 : i32
    %c0_i32_1 = arith.constant 0 : i32
    return %c0_i32, %c0_i32_0 : i32, i32
  }
  func.func @transform_5(%arg0: i32) -> (i32, i32) {
    %c0_i32 = arith.constant 0 : i32
    %c0_i32_0 = arith.constant 0 : i32
    %c0_i32_1 = arith.constant 0 : i32
    return %c0_i32, %c0_i32_0 : i32, i32
  }
  func.func @transform_6(%arg0: i32) -> (i32, i32) {
    %c0_i32 = arith.constant 0 : i32
    %c0_i32_0 = arith.constant 0 : i32
    %c0_i32_1 = arith.constant 0 : i32
    return %c0_i32, %c0_i32_0 : i32, i32
  }
  func.func @transform_7(%arg0: i32) -> (i32, i32) {
    %c0_i32 = arith.constant 0 : i32
    %c0_i32_0 = arith.constant 0 : i32
    %c0_i32_1 = arith.constant 0 : i32
    return %c0_i32, %c0_i32_0 : i32, i32
  }
  func.func @transform_8(%arg0: i32) -> (i32, i32) {
    %c0_i32 = arith.constant 0 : i32
    %c0_i32_0 = arith.constant 0 : i32
    %c0_i32_1 = arith.constant 0 : i32
    return %c0_i32, %c0_i32_0 : i32, i32
  }
  func.func @transform_9(%arg0: i32) -> (i32, i32) {
    %c0_i32 = arith.constant 0 : i32
    %c0_i32_0 = arith.constant 0 : i32
    %c0_i32_1 = arith.constant 0 : i32
    return %c0_i32, %c0_i32_0 : i32, i32
  }
  func.func @transform_10(%arg0: i32) -> (i32, i32) {
    %c0_i32 = arith.constant 0 : i32
    %c0_i32_0 = arith.constant 0 : i32
    return %arg0, %c0_i32 : i32, i32
  }
}

module attributes {stable_mosaic.version = 11 : i64} {
  func.func @head_conv_kernel(%arg0: i32, %arg1: memref<240x256xf32, #tpu.memory_space<vmem>>, %arg2: memref<256x16xf32, #tpu.memory_space<vmem>>, %arg3: memref<1x16xf32, #tpu.memory_space<vmem>>, %arg4: memref<80x32xf32, #tpu.memory_space<vmem>>, %arg5: memref<1x32xf32, #tpu.memory_space<vmem>>, %arg6: memref<120x32xf32, #tpu.memory_space<vmem>>) attributes {dimension_semantics = [#tpu.dimension_semantics<parallel>], iteration_bounds = array<i64: 2>, scalar_prefetch = 0 : i64, scratch_operands = 0 : i64, tpu.core_type = #tpu.core_type<tc>, window_params = [{transform_indices = @transform_0, window_bounds = array<i64: 240, 256>}, {pipeline_mode = #tpu.pipeline_mode<synchronous>, transform_indices = @transform_1, window_bounds = array<i64: 256, 16>}, {pipeline_mode = #tpu.pipeline_mode<synchronous>, transform_indices = @transform_2, window_bounds = array<i64: 1, 16>}, {pipeline_mode = #tpu.pipeline_mode<synchronous>, transform_indices = @transform_3, window_bounds = array<i64: 80, 32>}, {pipeline_mode = #tpu.pipeline_mode<synchronous>, transform_indices = @transform_4, window_bounds = array<i64: 1, 32>}, {transform_indices = @transform_5, window_bounds = array<i64: 120, 32>}]} {
    %c0 = arith.constant 0 : index
    %c0_0 = arith.constant 0 : index
    %0 = vector.load %arg1[%c0, %c0_0] : memref<240x256xf32, #tpu.memory_space<vmem>>, vector<240x256xf32>
    %1 = arith.truncf %0 : vector<240x256xf32> to vector<240x256xbf16>
    %c0_1 = arith.constant 0 : index
    %c0_2 = arith.constant 0 : index
    %2 = vector.load %arg2[%c0_1, %c0_2] : memref<256x16xf32, #tpu.memory_space<vmem>>, vector<256x16xf32>
    %3 = arith.truncf %2 : vector<256x16xf32> to vector<256x16xbf16>
    %cst = arith.constant dense<0.000000e+00> : vector<240x16xf32>
    %4 = tpu.matmul %1, %3, %cst {dimension_numbers = #tpu.dot_dimension_numbers<[1], [0], [0], [1], [0, 0, 1, 1], [], []>} : vector<240x256xbf16>, vector<256x16xbf16>, vector<240x16xf32> -> vector<240x16xf32>
    %c0_3 = arith.constant 0 : index
    %c0_4 = arith.constant 0 : index
    %5 = vector.load %arg3[%c0_3, %c0_4] : memref<1x16xf32, #tpu.memory_space<vmem>>, vector<1x16xf32>
    %6 = vector.broadcast %5 : vector<1x16xf32> to vector<240x16xf32>
    %7 = arith.addf %4, %6 : vector<240x16xf32>
    %cst_5 = arith.constant 0.000000e+00 : f32
    %8 = vector.broadcast %cst_5 : f32 to vector<240x16xf32>
    %9 = arith.maximumf %7, %8 : vector<240x16xf32>
    %10 = vector.extract_strided_slice %9 {offsets = [0, 0], sizes = [120, 16], strides = [1, 1]} : vector<240x16xf32> to vector<120x16xf32>
    %11 = vector.extract_strided_slice %9 {offsets = [120, 0], sizes = [120, 16], strides = [1, 1]} : vector<240x16xf32> to vector<120x16xf32>
    %12 = arith.maximumf %10, %11 : vector<120x16xf32>
    %cst_6 = arith.constant 0.000000e+00 : f32
    %13 = vector.broadcast %cst_6 : f32 to vector<4x16xf32>
    %14 = tpu.concatenate %12, %13 in 0 : vector<120x16xf32>, vector<4x16xf32> -> vector<124x16xf32>
    %15 = vector.extract_strided_slice %14 {offsets = [0, 0], sizes = [120, 16], strides = [1, 1]} : vector<124x16xf32> to vector<120x16xf32>
    %16 = vector.extract_strided_slice %14 {offsets = [1, 0], sizes = [120, 16], strides = [1, 1]} : vector<124x16xf32> to vector<120x16xf32>
    %17 = vector.extract_strided_slice %14 {offsets = [2, 0], sizes = [120, 16], strides = [1, 1]} : vector<124x16xf32> to vector<120x16xf32>
    %18 = vector.extract_strided_slice %14 {offsets = [3, 0], sizes = [120, 16], strides = [1, 1]} : vector<124x16xf32> to vector<120x16xf32>
    %19 = vector.extract_strided_slice %14 {offsets = [4, 0], sizes = [120, 16], strides = [1, 1]} : vector<124x16xf32> to vector<120x16xf32>
    %20 = tpu.concatenate %15, %16, %17, %18, %19 in 1 : vector<120x16xf32>, vector<120x16xf32>, vector<120x16xf32>, vector<120x16xf32>, vector<120x16xf32> -> vector<120x80xf32>
    %21 = arith.truncf %20 : vector<120x80xf32> to vector<120x80xbf16>
    %c0_7 = arith.constant 0 : index
    %c0_8 = arith.constant 0 : index
    %22 = vector.load %arg4[%c0_7, %c0_8] : memref<80x32xf32, #tpu.memory_space<vmem>>, vector<80x32xf32>
    %23 = arith.truncf %22 : vector<80x32xf32> to vector<80x32xbf16>
    %cst_9 = arith.constant dense<0.000000e+00> : vector<120x32xf32>
    %24 = tpu.matmul %21, %23, %cst_9 {dimension_numbers = #tpu.dot_dimension_numbers<[1], [0], [0], [1], [0, 0, 1, 1], [], []>} : vector<120x80xbf16>, vector<80x32xbf16>, vector<120x32xf32> -> vector<120x32xf32>
    %c0_10 = arith.constant 0 : index
    %c0_11 = arith.constant 0 : index
    %25 = vector.load %arg5[%c0_10, %c0_11] : memref<1x32xf32, #tpu.memory_space<vmem>>, vector<1x32xf32>
    %26 = vector.broadcast %25 : vector<1x32xf32> to vector<120x32xf32>
    %27 = arith.addf %24, %26 : vector<120x32xf32>
    %cst_12 = arith.constant 0.000000e+00 : f32
    %28 = vector.broadcast %cst_12 : f32 to vector<120x32xf32>
    %29 = arith.maximumf %27, %28 : vector<120x32xf32>
    %c0_13 = arith.constant 0 : index
    %c0_14 = arith.constant 0 : index
    %30 = vector.load %arg6[%c0_13, %c0_14] : memref<120x32xf32, #tpu.memory_space<vmem>>, vector<120x32xf32>
    tpu.vector_store %arg6[%c0_13, %c0_14], %29 {strides = array<i32>} : memref<120x32xf32, #tpu.memory_space<vmem>>, vector<120x32xf32>,
    return
  }
  func.func @transform_0(%arg0: i32) -> (i32, i32) {
    %c0_i32 = arith.constant 0 : i32
    %c0_i32_0 = arith.constant 0 : i32
    return %arg0, %c0_i32 : i32, i32
  }
  func.func @transform_1(%arg0: i32) -> (i32, i32) {
    %c0_i32 = arith.constant 0 : i32
    %c0_i32_0 = arith.constant 0 : i32
    %c0_i32_1 = arith.constant 0 : i32
    return %c0_i32, %c0_i32_0 : i32, i32
  }
  func.func @transform_2(%arg0: i32) -> (i32, i32) {
    %c0_i32 = arith.constant 0 : i32
    %c0_i32_0 = arith.constant 0 : i32
    %c0_i32_1 = arith.constant 0 : i32
    return %c0_i32, %c0_i32_0 : i32, i32
  }
  func.func @transform_3(%arg0: i32) -> (i32, i32) {
    %c0_i32 = arith.constant 0 : i32
    %c0_i32_0 = arith.constant 0 : i32
    %c0_i32_1 = arith.constant 0 : i32
    return %c0_i32, %c0_i32_0 : i32, i32
  }
  func.func @transform_4(%arg0: i32) -> (i32, i32) {
    %c0_i32 = arith.constant 0 : i32
    %c0_i32_0 = arith.constant 0 : i32
    %c0_i32_1 = arith.constant 0 : i32
    return %c0_i32, %c0_i32_0 : i32, i32
  }
  func.func @transform_5(%arg0: i32) -> (i32, i32) {
    %c0_i32 = arith.constant 0 : i32
    %c0_i32_0 = arith.constant 0 : i32
    return %arg0, %c0_i32 : i32, i32
  }
}

module attributes {stable_mosaic.version = 11 : i64} {
  func.func @dense_head_kernel(%arg0: i32, %arg1: memref<16x480xf32, #tpu.memory_space<vmem>>, %arg2: memref<480x128xf32, #tpu.memory_space<vmem>>, %arg3: memref<1x128xf32, #tpu.memory_space<vmem>>, %arg4: memref<1x128xf32, #tpu.memory_space<vmem>>, %arg5: memref<1x1xf32, #tpu.memory_space<vmem>>, %arg6: memref<16x1xf32, #tpu.memory_space<vmem>>) attributes {dimension_semantics = [#tpu.dimension_semantics<arbitrary>], iteration_bounds = array<i64: 1>, scalar_prefetch = 0 : i64, scratch_operands = 0 : i64, tpu.core_type = #tpu.core_type<tc>, window_params = [{pipeline_mode = #tpu.pipeline_mode<synchronous>, transform_indices = @transform_0, window_bounds = array<i64: 16, 480>}, {pipeline_mode = #tpu.pipeline_mode<synchronous>, transform_indices = @transform_1, window_bounds = array<i64: 480, 128>}, {pipeline_mode = #tpu.pipeline_mode<synchronous>, transform_indices = @transform_2, window_bounds = array<i64: 1, 128>}, {pipeline_mode = #tpu.pipeline_mode<synchronous>, transform_indices = @transform_3, window_bounds = array<i64: 1, 128>}, {pipeline_mode = #tpu.pipeline_mode<synchronous>, transform_indices = @transform_4, window_bounds = array<i64: 1, 1>}, {pipeline_mode = #tpu.pipeline_mode<synchronous>, transform_indices = @transform_5, window_bounds = array<i64: 16, 1>}]} {
    %c0 = arith.constant 0 : index
    %c0_0 = arith.constant 0 : index
    %0 = vector.load %arg1[%c0, %c0_0] : memref<16x480xf32, #tpu.memory_space<vmem>>, vector<16x480xf32>
    %1 = arith.truncf %0 : vector<16x480xf32> to vector<16x480xbf16>
    %c0_1 = arith.constant 0 : index
    %c0_2 = arith.constant 0 : index
    %2 = vector.load %arg2[%c0_1, %c0_2] : memref<480x128xf32, #tpu.memory_space<vmem>>, vector<480x128xf32>
    %3 = arith.truncf %2 : vector<480x128xf32> to vector<480x128xbf16>
    %cst = arith.constant dense<0.000000e+00> : vector<16x128xf32>
    %4 = tpu.matmul %1, %3, %cst {dimension_numbers = #tpu.dot_dimension_numbers<[1], [0], [0], [1], [0, 0, 1, 1], [], []>} : vector<16x480xbf16>, vector<480x128xbf16>, vector<16x128xf32> -> vector<16x128xf32>
    %c0_3 = arith.constant 0 : index
    %c0_4 = arith.constant 0 : index
    %5 = vector.load %arg3[%c0_3, %c0_4] : memref<1x128xf32, #tpu.memory_space<vmem>>, vector<1x128xf32>
    %6 = vector.broadcast %5 : vector<1x128xf32> to vector<16x128xf32>
    %7 = arith.addf %4, %6 : vector<16x128xf32>
    %cst_5 = arith.constant 0.000000e+00 : f32
    %8 = vector.broadcast %cst_5 : f32 to vector<16x128xf32>
    %9 = arith.maximumf %7, %8 : vector<16x128xf32>
    %c0_6 = arith.constant 0 : index
    %c0_7 = arith.constant 0 : index
    %10 = vector.load %arg4[%c0_6, %c0_7] : memref<1x128xf32, #tpu.memory_space<vmem>>, vector<1x128xf32>
    %11 = vector.broadcast %10 : vector<1x128xf32> to vector<16x128xf32>
    %12 = arith.mulf %9, %11 : vector<16x128xf32>
    %cst_8 = arith.constant dense<0.000000e+00> : vector<16xf32>
    %13 = vector.multi_reduction <add>, %12, %cst_8 [1] : vector<16x128xf32> to vector<16xf32>
    %14 = vector.shape_cast %13 : vector<16xf32> to vector<16x1xf32>
    %c0_9 = arith.constant 0 : index
    %c0_10 = arith.constant 0 : index
    %15 = vector.load %arg5[%c0_9, %c0_10] : memref<1x1xf32, #tpu.memory_space<vmem>>, vector<1x1xf32>
    %16 = vector.broadcast %15 : vector<1x1xf32> to vector<16x1xf32>
    %17 = arith.addf %14, %16 : vector<16x1xf32>
    %c0_11 = arith.constant 0 : index
    %c0_12 = arith.constant 0 : index
    %18 = vector.load %arg6[%c0_11, %c0_12] : memref<16x1xf32, #tpu.memory_space<vmem>>, vector<16x1xf32>
    tpu.vector_store %arg6[%c0_11, %c0_12], %17 {strides = array<i32>} : memref<16x1xf32, #tpu.memory_space<vmem>>, vector<16x1xf32>,
    return
  }
  func.func @transform_0(%arg0: i32) -> (i32, i32) {
    %c0_i32 = arith.constant 0 : i32
    %c0_i32_0 = arith.constant 0 : i32
    %c0_i32_1 = arith.constant 0 : i32
    return %c0_i32, %c0_i32_0 : i32, i32
  }
  func.func @transform_1(%arg0: i32) -> (i32, i32) {
    %c0_i32 = arith.constant 0 : i32
    %c0_i32_0 = arith.constant 0 : i32
    %c0_i32_1 = arith.constant 0 : i32
    return %c0_i32, %c0_i32_0 : i32, i32
  }
  func.func @transform_2(%arg0: i32) -> (i32, i32) {
    %c0_i32 = arith.constant 0 : i32
    %c0_i32_0 = arith.constant 0 : i32
    %c0_i32_1 = arith.constant 0 : i32
    return %c0_i32, %c0_i32_0 : i32, i32
  }
  func.func @transform_3(%arg0: i32) -> (i32, i32) {
    %c0_i32 = arith.constant 0 : i32
    %c0_i32_0 = arith.constant 0 : i32
    %c0_i32_1 = arith.constant 0 : i32
    return %c0_i32, %c0_i32_0 : i32, i32
  }
  func.func @transform_4(%arg0: i32) -> (i32, i32) {
    %c0_i32 = arith.constant 0 : i32
    %c0_i32_0 = arith.constant 0 : i32
    %c0_i32_1 = arith.constant 0 : i32
    return %c0_i32, %c0_i32_0 : i32, i32
  }
  func.func @transform_5(%arg0: i32) -> (i32, i32) {
    %c0_i32 = arith.constant 0 : i32
    %c0_i32_0 = arith.constant 0 : i32
    %c0_i32_1 = arith.constant 0 : i32
    return %c0_i32, %c0_i32_0 : i32, i32
  }
}

</mosaic_0001>

<bundles_post_ra>
// kernel: psgcn_forward.3
= control target key start
LH: loop header
LB: loop body
LE: loop exit
PB: predicated region body
PF: predicated region fallthrough
CT: control target
= control target key end

     0   :  { %s5047_s17 = smov 0   ;;  %s6591_s0 = inlined_call_operand.vmem [shape: bf16[2,256,256], index: 0, kind: input, shape index: {}]   ;;  %s6592_s1 = inlined_call_operand.vmem [shape: f32[512,32], index: 1, kind: input, shape index: {}]   ;;  %s6593_s2 = inlined_call_operand.vmem [shape: f32[32,64], index: 2, kind: input, shape index: {}]   ;;  %s6594_s3 = inlined_call_operand.vmem [shape: f32[1,64], index: 3, kind: input, shape index: {}]   ;;  %s6595_s4 = inlined_call_operand.vmem [shape: f32[64,128], index: 4, kind: input, shape index: {}]   ;;  %s6596_s5 = inlined_call_operand.vmem [shape: f32[1,128], index: 5, kind: input, shape index: {}]   ;;  %s6597_s6 = inlined_call_operand.vmem [shape: f32[64,128], index: 6, kind: input, shape index: {}]   ;;  %s6598_s7 = inlined_call_operand.vmem [shape: f32[1,128], index: 7, kind: input, shape index: {}]   ;;  %s6599_s8 = inlined_call_operand.<no memory space> [shape: f32[1,1], index: 8, kind: input, shape index: {}]   ;;  %s6600_s10 = inlined_call_operand.vmem [shape: f32[512,256], index: 10, kind: output, shape index: {}]   ;;  %s6601_s9 = inlined_call_operand.<no memory space> [shape: f32[1,1], index: 9, kind: input, shape index: {}]  }
   0x1   :  { %v15_v0 = vstv %s6599_s8  ;;  %v17_v1 = vstv %s6601_s9 }
   0x2   :  { %16 = vst [vmem:[#allocation2] sm:$0x1] %v15_v0  ;;  %18 = vst [vmem:[#allocation3] sm:$0x1] %v17_v1 }
   0x3 LB: > { %s5053_s18 = sadd.s32 4294967295, %s4980_s17   ;;  %p3642_p0 = scmp.ge.s32.totalorder %s4980_s17, 1  ;;  %s4980_s17 = sphi %s5047_s17, %s24_s17  }
   0x4   : > { %p327_p1 = scmp.lt.s32.totalorder %s4980_s17, 3 }
   0x6   : > { %p328_p2 = pnand %p3642_p0, %p327_p1 }
   0x8   : > { %331 = sbr.rel (%p328_p2) target bundleno = 2245 (0x8c5), region = 60 }
   0xd   : > { %v472_v2 = vld [vmem:[%s6593_s2 + $0x10] sm:$0xff]  ;;  %v473_v3 = vld [vmem:[%s6593_s2 + $0x18] sm:$0xff]  ;;  %v470_v4 = vld [vmem:[%s6593_s2] sm:$0xff]  ;;  %s3645_s23 = sshll.u32 %s5053_s18, 5  ;;  %vm476_vm0 = vcmask 261120   ;;  %p371_p4 = scmp.lt.s32.totalorder %s5053_s18, 1 }
   0xe   : > { %v475_v5 = vpack.c.bf16 %v473_v3, %v472_v2  ;;  %v471_v6 = vld [vmem:[%s6593_s2 + $0x8] sm:$0xff]  ;;  %p377_p3 = scmp.lt.s32.totalorder %s3645_s23, 63  ;;  %vm1090_vm1 = vcmask 523264   ;;  %s4984_s14 = smov 64  }
   0xf   : > { %v474_v7 = vpack.c.bf16 %v471_v6, %v470_v4  ;;  %s7040_s18 = smov (!%p371_p4, %s5053_s18), 1 }
  0x10   : > { %4341 = vmatprep.subr.bf16.mxu0 %v475_v5  ;;  %4457 = vmatprep.subr.bf16.mxu1 %v475_v5  ;;  %s7038_s23 = smov (!%p377_p3, %s3645_s23), 63  ;;  %s3833_s30 = sshll.u32 %s7040_s18, 8 }
  0x11   : > { %4342 = vmatpush3.bf16.msra.mxu0 %v475_v5  ;;  %4459 = vmatpush3.bf16.msra.mxu1 %v475_v5  ;;  %s3646_s26 = sshll.u32 %s7038_s23, 3  ;;  %s5131_s13 = scalar_lea.vmem %s6591_s0, %s3833_s30 }
  0x12   : > { %4343 = vmatprep.subr.bf16.mxu0 %v474_v7  ;;  %4458 = vmatprep.subr.bf16.mxu1 %v474_v7  ;;  %s5076_s29 = scalar_lea.vmem %s6592_s1, %s3646_s26  ;;  %v5134_v56 = vld [vmem:[%s5131_s13 + $0x4] ss:$8 sps:$4 sm:$0xff]   ;;  %s3834_s15 = sshll.u32 %s7038_s23, 4 }
  0x13   : > { %v422_v8 = vld [vmem:[%s5076_s29] sm:$0xff]  ;;  %v423_v9 = vld [vmem:[%s5076_s29 + $0x8] sm:$0xff]  ;;  %v424_v13 = vld [vmem:[%s5076_s29 + $0x10] sm:$0xff]  ;;  %6740 = vst [vmem:[#allocation4_spill] sm:$0xff] %v5134_v56  ;;  %s6288_s8 = scalar_lea.vmem %s6600_s10, %s3834_s15 }
  0x14   : > { %v438_v10 = vld [vmem:[%s5076_s29 + $0x80] sm:$0xff]  ;;  %v454_v11 = vpack.c.bf16 %v423_v9, %v422_v8  ;;  %v439_v12 = vld [vmem:[%s5076_s29 + $0x88] sm:$0xff]  ;;  %v425_v14 = vld [vmem:[%s5076_s29 + $0x18] sm:$0xff] }
  0x15   : > { %4344 = vmatpush3.bf16.msra.mxu0 %v474_v7  ;;  %4460 = vmatpush3.bf16.msra.mxu1 %v474_v7  ;;  %v462_v15 = vpack.c.bf16 %v439_v12, %v438_v10  ;;  %v455_v16 = vpack.c.bf16 %v425_v14, %v424_v13  ;;  %v440_v17 = vld [vmem:[%s5076_s29 + $0x90] sm:$0xff]  ;;  %v441_v18 = vld [vmem:[%s5076_s29 + $0x98] sm:$0xff]  ;;  %v426_v19 = vld [vmem:[%s5076_s29 + $0x20] sm:$0xff] }
  0x16   : > { %4345 = vmatprep.mubr.msk.bf16.mxu0 %vm476_vm0, %v454_v11  ;;  %v463_v20 = vpack.c.bf16 %v441_v18, %v440_v17  ;;  %v427_v21 = vld [vmem:[%s5076_s29 + $0x28] sm:$0xff]  ;;  %v442_v22 = vld [vmem:[%s5076_s29 + $0xa0] sm:$0xff]  ;;  %v428_v26 = vld [vmem:[%s5076_s29 + $0x30] sm:$0xff] }
  0x17   : > { %v443_v23 = vld [vmem:[%s5076_s29 + $0xa8] sm:$0xff]  ;;  %4361 = vmatprep.mubr.msk.bf16.mxu1 %vm476_vm0, %v462_v15  ;;  %v456_v24 = vpack.c.bf16 %v427_v21, %v426_v19  ;;  %v429_v27 = vld [vmem:[%s5076_s29 + $0x38] sm:$0xff]  ;;  %v444_v28 = vld [vmem:[%s5076_s29 + $0xb0] sm:$0xff] }
  0x18   : > { %4346 = vmatmul.mubr.msk.bf16.vlgmr.msra.gmra.mxu0 %vm476_vm0, %v455_v16  ;;  %v464_v25 = vpack.c.bf16 %v443_v23, %v442_v22  ;;  %4362 = vmatmul.mubr.msk.bf16.vlgmr.msra.gmra.mxu1 %vm476_vm0, %v463_v20  ;;  %v445_v29 = vld [vmem:[%s5076_s29 + $0xb8] sm:$0xff]  ;;  %v430_v30 = vld [vmem:[%s5076_s29 + $0x40] sm:$0xff]  ;;  %v431_v31 = vld [vmem:[%s5076_s29 + $0x48] sm:$0xff]  ;;  %v457_v34 = vpack.c.bf16 %v429_v27, %v428_v26 }
  0x19   : > { %4349 = vmatprep.mubr.msk.bf16.mxu0 %vm476_vm0, %v456_v24  ;;  %v446_v32 = vld [vmem:[%s5076_s29 + $0xc0] sm:$0xff]  ;;  %v447_v33 = vld [vmem:[%s5076_s29 + $0xc8] sm:$0xff]  ;;  %v465_v35 = vpack.c.bf16 %v445_v29, %v444_v28  ;;  %v458_v36 = vpack.c.bf16 %v431_v31, %v430_v30  ;;  %v432_v38 = vld [vmem:[%s5076_s29 + $0x50] sm:$0xff] }
  0x1a   : > { %4365 = vmatprep.mubr.msk.bf16.mxu1 %vm476_vm0, %v464_v25  ;;  %v466_v37 = vpack.c.bf16 %v447_v33, %v446_v32  ;;  %v433_v39 = vld [vmem:[%s5076_s29 + $0x58] sm:$0xff]  ;;  %v448_v40 = vld [vmem:[%s5076_s29 + $0xd0] sm:$0xff]  ;;  %v434_v42 = vld [vmem:[%s5076_s29 + $0x60] sm:$0xff] }
  0x1b   : > { %v449_v41 = vld [vmem:[%s5076_s29 + $0xd8] sm:$0xff]  ;;  %v435_v43 = vld [vmem:[%s5076_s29 + $0x68] sm:$0xff]  ;;  %v450_v44 = vld [vmem:[%s5076_s29 + $0xe0] sm:$0xff]  ;;  %v459_v46 = vpack.c.bf16 %v433_v39, %v432_v38 }
  0x1c   : > { %v451_v45 = vld [vmem:[%s5076_s29 + $0xe8] sm:$0xff]  ;;  %v467_v47 = vpack.c.bf16 %v449_v41, %v448_v40  ;;  %v460_v48 = vpack.c.bf16 %v435_v43, %v434_v42  ;;  %v436_v50 = vld [vmem:[%s5076_s29 + $0x70] sm:$0xff]  ;;  %v437_v51 = vld [vmem:[%s5076_s29 + $0x78] sm:$0xff] }
  0x1d   : > { %v468_v49 = vpack.c.bf16 %v451_v45, %v450_v44  ;;  %v452_v52 = vld [vmem:[%s5076_s29 + $0xf0] sm:$0xff]  ;;  %v453_v53 = vld [vmem:[%s5076_s29 + $0xf8] sm:$0xff]  ;;  %v461_v54 = vpack.c.bf16 %v437_v51, %v436_v50  ;;  %v5138_v41 = vld [vmem:[%s5131_s13] ss:$8 sps:$4 sm:$0xff]  }
  0x1e   : > { %v469_v55 = vpack.c.bf16 %v453_v53, %v452_v52  ;;  %v5141_v42 = vld [vmem:[%s5131_s13 + $0x14] ss:$8 sps:$4 sm:$0xff]   ;;  %v5146_v43 = vld [vmem:[%s5131_s13 + $0x10] ss:$8 sps:$4 sm:$0xff]   ;;  %v5149_v44 = vld [vmem:[%s5131_s13 + $0x24] ss:$8 sps:$4 sm:$0xff]  }
  0x1f   : > { %v5154_v45 = vld [vmem:[%s5131_s13 + $0x20] ss:$8 sps:$4 sm:$0xff]   ;;  %v5173_v50 = vld [vmem:[%s5131_s13 + $0x54] ss:$8 sps:$4 sm:$0xff]   ;;  %v5178_v51 = vld [vmem:[%s5131_s13 + $0x50] ss:$8 sps:$4 sm:$0xff]  }
  0x20   : > { %4350 = vmatmul.mubr.msk.bf16.gmra.mxu0 %vm476_vm0, %v457_v34  ;;  %4366 = vmatmul.mubr.msk.bf16.gmra.mxu1 %vm476_vm0, %v465_v35  ;;  %v5181_v52 = vld [vmem:[%s5131_s13 + $0x64] ss:$8 sps:$4 sm:$0xff]   ;;  %v5186_v53 = vld [vmem:[%s5131_s13 + $0x60] ss:$8 sps:$4 sm:$0xff]  }
  0x21   : > { %4353 = vmatprep.mubr.msk.bf16.mxu0 %vm476_vm0, %v458_v36  ;;  %4369 = vmatprep.mubr.msk.bf16.mxu1 %vm476_vm0, %v466_v37 }
  0x28   : > { %4354 = vmatmul.mubr.msk.bf16.gmra.mxu0 %vm476_vm0, %v459_v46  ;;  %4370 = vmatmul.mubr.msk.bf16.gmra.mxu1 %vm476_vm0, %v467_v47  ;;  %v5157_v46 = vld [vmem:[%s5131_s13 + $0x34] ss:$8 sps:$4 sm:$0xff]   ;;  %v5162_v47 = vld [vmem:[%s5131_s13 + $0x30] ss:$8 sps:$4 sm:$0xff]  }
  0x29   : > { %4357 = vmatprep.mubr.msk.bf16.mxu0 %vm476_vm0, %v460_v48  ;;  %4373 = vmatprep.mubr.msk.bf16.mxu1 %vm476_vm0, %v468_v49  ;;  %v5165_v48 = vld [vmem:[%s5131_s13 + $0x44] ss:$8 sps:$4 sm:$0xff]   ;;  %v5170_v49 = vld [vmem:[%s5131_s13 + $0x40] ss:$8 sps:$4 sm:$0xff]  }
  0x30   : > { %4358 = vmatmul.mubr.msk.bf16.gmra.mxu0 %vm476_vm0, %v461_v54  ;;  %4374 = vmatmul.mubr.msk.bf16.gmra.mxu1 %vm476_vm0, %v469_v55  ;;  %v5189_v54 = vld [vmem:[%s5131_s13 + $0x74] ss:$8 sps:$4 sm:$0xff]   ;;  %v5194_v55 = vld [vmem:[%s5131_s13 + $0x70] ss:$8 sps:$4 sm:$0xff]  }
  0x31   : > { %901 = vmatprep.mubr.bf16.mxu1 %v5134_v56 }
  0xd8   : > { %v4347_v57 = vpop.f32.mrf.mxu0  ;;  %v4363_v58 = vpop.f32.mrf.mxu1 }
  0xda   : > { %v559_v59 = vpop.f32.mrf.mxu0  ;;  %v623_v60 = vpop.f32.mrf.mxu1 }
  0xdc   : > { %v4348_v61 = vpop.f32.mrf.mxu0  ;;  %v4364_v62 = vpop.f32.mrf.mxu1 }
  0xdd   : > { %v695_v37 = vpack.c.bf16 %v4364_v62, %v4363_v58  ;;  %v687_v38 = vpack.c.bf16 %v4348_v61, %v4347_v57  ;;  %v5197_v57 = vld [vmem:[%s5131_s13 + $0x84] ss:$8 sps:$4 sm:$0xff]   ;;  %v5202_v58 = vld [vmem:[%s5131_s13 + $0x80] ss:$8 sps:$4 sm:$0xff]   ;;  %v1084_v61 = vld [vmem:[%s6595_s4 + $0x30] sm:$0xff] }
  0xde   : > { %v562_v63 = vpop.f32.mrf.mxu0  ;;  %v626_v0 = vpop.f32.mrf.mxu1  ;;  %v1085_v62 = vld [vmem:[%s6595_s4 + $0x38] sm:$0xff] }
  0xdf   : > { %v694_v39 = vpack.c.bf16 %v626_v0, %v623_v60  ;;  %v686_v40 = vpack.c.bf16 %v562_v63, %v559_v59  ;;  %v5205_v59 = vld [vmem:[%s5131_s13 + $0x94] ss:$8 sps:$4 sm:$0xff]   ;;  %v5210_v60 = vld [vmem:[%s5131_s13 + $0x90] ss:$8 sps:$4 sm:$0xff]   ;;  %v5219_v63 = vld [vmem:[%s5131_s13 + $0xa4] ss:$8 sps:$4 sm:$0xff]   ;;  %v1089_v0 = vpack.c.bf16 %v1085_v62, %v1084_v61 }
  0xe0   : > { %v4351_v1 = vpop.f32.mrf.mxu0  ;;  %v4367_v2 = vpop.f32.mrf.mxu1 }
  0xe1   : > { %4377 = vmatprep.subr.bf16.mxu0 %v1089_v0 }
  0xe2   : > { %v575_v3 = vpop.f32.mrf.mxu0  ;;  %v639_v4 = vpop.f32.mrf.mxu1  ;;  %4378 = vmatpush3.bf16.msra.mxu0 %v1089_v0 }
  0xe4   : > { %v4352_v5 = vpop.f32.mrf.mxu0  ;;  %v4368_v6 = vpop.f32.mrf.mxu1 }
  0xe5   : > { %v697_v33 = vpack.c.bf16 %v4368_v6, %v4367_v2  ;;  %v689_v34 = vpack.c.bf16 %v4352_v5, %v4351_v1  ;;  %v1082_v1 = vld [vmem:[%s6595_s4 + $0x20] sm:$0xff]  ;;  %v1083_v2 = vld [vmem:[%s6595_s4 + $0x28] sm:$0xff]  ;;  %v1080_v5 = vld [vmem:[%s6595_s4 + $0x10] sm:$0xff] }
  0xe6   : > { %v578_v7 = vpop.f32.mrf.mxu0  ;;  %v642_v8 = vpop.f32.mrf.mxu1  ;;  %v1081_v6 = vld [vmem:[%s6595_s4 + $0x18] sm:$0xff] }
  0xe7   : > { %v696_v35 = vpack.c.bf16 %v642_v8, %v639_v4  ;;  %v688_v36 = vpack.c.bf16 %v578_v7, %v575_v3  ;;  %v1088_v3 = vpack.c.bf16 %v1083_v2, %v1082_v1  ;;  %v5230_v4 = vld [vmem:[%s5131_s13 + $0xa0] ss:$8 sps:$4 sm:$0xff]   ;;  %v5239_v7 = vld [vmem:[%s5131_s13 + $0xb4] ss:$8 sps:$4 sm:$0xff]   ;;  %v1087_v8 = vpack.c.bf16 %v1081_v6, %v1080_v5 }
  0xe8   : > { %v4355_v9 = vpop.f32.mrf.mxu0  ;;  %v4371_v10 = vpop.f32.mrf.mxu1 }
  0xe9   : > { %4379 = vmatprep.subr.bf16.mxu0 %v1088_v3 }
  0xea   : > { %v591_v11 = vpop.f32.mrf.mxu0  ;;  %v655_v12 = vpop.f32.mrf.mxu1  ;;  %4380 = vmatpush3.bf16.msra.mxu0 %v1088_v3 }
  0xeb   : > { %4381 = vmatprep.subr.bf16.mxu0 %v1087_v8 }
  0xec   : > { %v4356_v13 = vpop.f32.mrf.mxu0  ;;  %v4372_v14 = vpop.f32.mrf.mxu1 }
  0xed   : > { %v699_v29 = vpack.c.bf16 %v4372_v14, %v4371_v10  ;;  %v691_v30 = vpack.c.bf16 %v4356_v13, %v4355_v9  ;;  %v1078_v9 = vld [vmem:[%s6595_s4] sm:$0xff]  ;;  %v1079_v10 = vld [vmem:[%s6595_s4 + $0x8] sm:$0xff] }
  0xee   : > { %v594_v15 = vpop.f32.mrf.mxu0  ;;  %v658_v16 = vpop.f32.mrf.mxu1  ;;  %4382 = vmatpush3.bf16.msra.mxu0 %v1087_v8  ;;  %v5253_v13 = vld [vmem:[%s5131_s13 + $0xc4] ss:$8 sps:$4 sm:$0xff]   ;;  %v5258_v14 = vld [vmem:[%s5131_s13 + $0xc0] ss:$8 sps:$4 sm:$0xff]  }
  0xef   : > { %v698_v31 = vpack.c.bf16 %v658_v16, %v655_v12  ;;  %v690_v32 = vpack.c.bf16 %v594_v15, %v591_v11  ;;  %v1086_v11 = vpack.c.bf16 %v1079_v10, %v1078_v9  ;;  %v5250_v12 = vld [vmem:[%s5131_s13 + $0xb0] ss:$8 sps:$4 sm:$0xff]   ;;  %6741 = vst [vmem:[#allocation5_spill] sm:$0xff] %v5258_v14  ;;  %v5261_v15 = vld [vmem:[%s5131_s13 + $0xd4] ss:$8 sps:$4 sm:$0xff]  }
  0xf0   : > { %v4359_v17 = vpop.f32.mrf.mxu0  ;;  %v4375_v18 = vpop.f32.mrf.mxu1  ;;  %6742 = vst [vmem:[#allocation6_spill] sm:$0xff] %v5261_v15  ;;  %v5266_v16 = vld [vmem:[%s5131_s13 + $0xd0] ss:$8 sps:$4 sm:$0xff]  }
  0xf1   : > { %4383 = vmatprep.subr.bf16.mxu0 %v1086_v11  ;;  %6743 = vst [vmem:[#allocation7_spill] sm:$0xff] %v5266_v16 }
  0xf2   : > { %v607_v19 = vpop.f32.mrf.mxu0  ;;  %v671_v20 = vpop.f32.mrf.mxu1  ;;  %4384 = vmatpush3.bf16.msra.mxu0 %v1086_v11 }
  0xf4   : > { %v4360_v21 = vpop.f32.mrf.mxu0  ;;  %v4376_v23 = vpop.f32.mrf.mxu1 }
  0xf5   : > { %v693_v22 = vpack.c.bf16 %v4360_v21, %v4359_v17  ;;  %v701_v24 = vpack.c.bf16 %v4376_v23, %v4375_v18  ;;  %v5269_v17 = vld [vmem:[%s5131_s13 + $0xe4] ss:$8 sps:$4 sm:$0xff]   ;;  %v5274_v18 = vld [vmem:[%s5131_s13 + $0xe0] ss:$8 sps:$4 sm:$0xff]  }
  0xf6   : > { %v674_v25 = vpop.f32.mrf.mxu1  ;;  %v610_v26 = vpop.f32.mrf.mxu0  ;;  %6744 = vst [vmem:[#allocation8_spill] sm:$0xff] %v5269_v17  ;;  %6745 = vst [vmem:[#allocation9_spill] sm:$0xff] %v5274_v18 }
  0xf7   : > { %v700_v27 = vpack.c.bf16 %v674_v25, %v671_v20  ;;  %3853 = vmatprep.subr.bf16.mxu1 %v701_v24  ;;  %v692_v28 = vpack.c.bf16 %v610_v26, %v607_v19  ;;  %v5277_v19 = vld [vmem:[%s5131_s13 + $0xf4] ss:$8 sps:$4 sm:$0xff]   ;;  %v5282_v20 = vld [vmem:[%s5131_s13 + $0xf0] ss:$8 sps:$4 sm:$0xff]   ;;  %v5288_v24 = vld [vmem:[%s6594_s3] ss:$0 sm:$0xff] }
  0xf8   : > { %3854 = vmatpush3.bf16.msra.mxu1 %v693_v22  ;;  %6746 = vst [vmem:[#allocation10_spill] sm:$0xff] %v5277_v19  ;;  %6747 = vst [vmem:[#allocation11_spill] sm:$0xff] %v5282_v20 }
  0xf9   : > { %3855 = vmatprep.subr.bf16.mxu1 %v700_v27 }
  0xfc   : > { %3856 = vmatpush3.bf16.msra.mxu1 %v692_v28 }
  0xfd   : > { %3857 = vmatprep.subr.bf16.mxu1 %v699_v29 }
 0x100   : > { %3858 = vmatpush3.bf16.msra.mxu1 %v691_v30 }
 0x101   : > { %3859 = vmatprep.subr.bf16.mxu1 %v698_v31 }
 0x104   : > { %3860 = vmatpush3.bf16.msra.mxu1 %v690_v32 }
 0x105   : > { %3861 = vmatprep.subr.bf16.mxu1 %v697_v33 }
 0x108   : > { %3862 = vmatpush3.bf16.msra.mxu1 %v689_v34 }
 0x109   : > { %3863 = vmatprep.subr.bf16.mxu1 %v696_v35 }
 0x10c   : > { %3864 = vmatpush3.bf16.msra.mxu1 %v688_v36 }
 0x10d   : > { %3865 = vmatprep.subr.bf16.mxu1 %v695_v37 }
 0x110   : > { %3866 = vmatpush3.bf16.msra.mxu1 %v687_v38 }
 0x111   : > { %3867 = vmatprep.subr.bf16.mxu1 %v694_v39 }
 0x114   : > { %3868 = vmatpush3.bf16.msra.mxu1 %v686_v40 }
 0x117   : > { %902 = vmatmul.mubr.bf16.vlgmr.msra.gmra.mxu1 %v5138_v41 }
 0x118   : > { %909 = vmatprep.mubr.bf16.mxu1 %v5141_v42 }
 0x11f   : > { %910 = vmatmul.mubr.bf16.gmra.mxu1 %v5146_v43 }
 0x120   : > { %917 = vmatprep.mubr.bf16.mxu1 %v5149_v44 }
 0x127   : > { %918 = vmatmul.mubr.bf16.gmra.mxu1 %v5154_v45 }
 0x128   : > { %925 = vmatprep.mubr.bf16.mxu1 %v5157_v46 }
 0x12f   : > { %926 = vmatmul.mubr.bf16.gmra.mxu1 %v5162_v47 }
 0x130   : > { %933 = vmatprep.mubr.bf16.mxu1 %v5165_v48 }
 0x137   : > { %934 = vmatmul.mubr.bf16.gmra.mxu1 %v5170_v49 }
 0x138   : > { %941 = vmatprep.mubr.bf16.mxu1 %v5173_v50 }
 0x13f   : > { %942 = vmatmul.mubr.bf16.gmra.mxu1 %v5178_v51 }
 0x140   : > { %949 = vmatprep.mubr.bf16.mxu1 %v5181_v52 }
 0x147   : > { %950 = vmatmul.mubr.bf16.gmra.mxu1 %v5186_v53 }
 0x148   : > { %957 = vmatprep.mubr.bf16.mxu1 %v5189_v54 }
 0x14f   : > { %958 = vmatmul.mubr.bf16.gmra.mxu1 %v5194_v55 }
 0x150   : > { %965 = vmatprep.mubr.bf16.mxu1 %v5197_v57 }
 0x157   : > { %966 = vmatmul.mubr.bf16.gmra.mxu1 %v5202_v58 }
 0x158   : > { %973 = vmatprep.mubr.bf16.mxu1 %v5205_v59 }
 0x15f   : > { %974 = vmatmul.mubr.bf16.gmra.mxu1 %v5210_v60 }
 0x160   : > { %981 = vmatprep.mubr.bf16.mxu1 %v5219_v63 }
 0x167   : > { %982 = vmatmul.mubr.bf16.gmra.mxu1 %v5230_v4 }
 0x168   : > { %989 = vmatprep.mubr.bf16.mxu1 %v5239_v7 }
 0x16f   : > { %990 = vmatmul.mubr.bf16.gmra.mxu1 %v5250_v12 }
 0x170   : > { %997 = vmatprep.mubr.bf16.mxu1 %v5253_v13 }
 0x177   : > { %998 = vmatmul.mubr.bf16.gmra.mxu1 %v5258_v14 }
 0x178   : > { %1005 = vmatprep.mubr.bf16.mxu1 %v5261_v15 }
 0x17f   : > { %1006 = vmatmul.mubr.bf16.gmra.mxu1 %v5266_v16 }
 0x180   : > { %1013 = vmatprep.mubr.bf16.mxu1 %v5269_v17 }
 0x187   : > { %1014 = vmatmul.mubr.bf16.gmra.mxu1 %v5274_v18 }
 0x188   : > { %1021 = vmatprep.mubr.bf16.mxu1 %v5277_v19 }
 0x18f   : > { %1022 = vmatmul.mubr.bf16.gmra.mxu1 %v5282_v20 }
 0x1d7   : > { %v3869_v21 = vpop.f32.mrf.mxu1 }
 0x1d9   : > { %v3870_v22 = vpop.f32.mrf.mxu1 }
 0x1da   : > { %v3871_v23 = vadd.f32 %v3870_v22, %v3869_v21 }
 0x1db   : > { %v3872_v25 = vpop.f32.mrf.mxu1 }
 0x1dc   : > { %v5291_v27 = vadd.f32 %v3871_v23, %v5288_v24 }
 0x1dd   : > { %v3873_v26 = vpop.f32.mrf.mxu1 }
 0x1de   : > { %6748 = vst [vmem:[#allocation12_spill] sm:$0xff] %v5291_v27  ;;  %v3874_v28 = vadd.f32 %v3873_v26, %v3872_v25  ;;  %v6614_v32 = vmax.f32 %v5291_v27, 0.0 }
 0x1df   : > { %v3875_v29 = vpop.f32.mrf.mxu1 }
 0x1e0   : > { %v5294_v30 = vadd.f32 %v3874_v28, %v5288_v24 }
 0x1e1   : > { %v3876_v31 = vpop.f32.mrf.mxu1 }
 0x1e2   : > { %6749 = vst [vmem:[#allocation13_spill] sm:$0xff] %v5294_v30  ;;  %v6615_v33 = vmax.f32 %v5294_v30, 0.0  ;;  %v3877_v34 = vadd.f32 %v3876_v31, %v3875_v29 }
 0x1e3   : > { %v3878_v35 = vpop.f32.mrf.mxu1 }
 0x1e4   : > { %v1062_v36 = vpack.c.bf16 %v6615_v33, %v6614_v32  ;;  %v5303_v38 = vadd.f32 %v3877_v34, %v5288_v24 }
 0x1e5   : > { %v3879_v37 = vpop.f32.mrf.mxu1 }
 0x1e6   : > { %6750 = vst [vmem:[#allocation14_spill] sm:$0xff] %v5303_v38  ;;  %v3880_v39 = vadd.f32 %v3879_v37, %v3878_v35  ;;  %4385 = vmatprep.mubr.msk.bf16.mxu0 %vm1090_vm1, %v1062_v36  ;;  %v6610_v0 = vmax.f32 %v5303_v38, 0.0 }
 0x1e7   : > { %v3881_v40 = vpop.f32.mrf.mxu1 }
 0x1e8   : > { %v5307_v61 = vadd.f32 %v3880_v39, %v5288_v24 }
 0x1e9   : > { %v3882_v62 = vpop.f32.mrf.mxu1 }
 0x1ea   : > { %6751 = vst [vmem:[#allocation15_spill] sm:$0xff] %v5307_v61  ;;  %v6611_v1 = vmax.f32 %v5307_v61, 0.0  ;;  %v3883_v2 = vadd.f32 %v3882_v62, %v3881_v40 }
 0x1eb   : > { %v3884_v3 = vpop.f32.mrf.mxu1 }
 0x1ec   : > { %v1063_v5 = vpack.c.bf16 %v6611_v1, %v6610_v0  ;;  %v5316_v8 = vadd.f32 %v3883_v2, %v5288_v24 }
 0x1ed   : > { %v3885_v6 = vpop.f32.mrf.mxu1 }
 0x1ee   : > { %6752 = vst [vmem:[#allocation16_spill] sm:$0xff] %v5316_v8  ;;  %v3886_v9 = vadd.f32 %v3885_v6, %v3884_v3  ;;  %4386 = vmatmul.mubr.msk.bf16.vlgmr.msra.gmra.mxu0 %vm1090_vm1, %v1063_v5  ;;  %v6607_v22 = vmax.f32 %v5316_v8, 0.0 }
 0x1ef   : > { %v3887_v10 = vpop.f32.mrf.mxu1 }
 0x1f0   : > { %v5320_v11 = vadd.f32 %v3886_v9, %v5288_v24 }
 0x1f1   : > { %v3888_v21 = vpop.f32.mrf.mxu1 }
 0x1f2   : > { %6753 = vst [vmem:[#allocation17_spill] sm:$0xff] %v5320_v11  ;;  %v6606_v23 = vmax.f32 %v5320_v11, 0.0  ;;  %v3889_v25 = vadd.f32 %v3888_v21, %v3887_v10 }
 0x1f3   : > { %v3890_v26 = vpop.f32.mrf.mxu1 }
 0x1f4   : > { %v1064_v28 = vpack.c.bf16 %v6606_v23, %v6607_v22  ;;  %v5329_v31 = vadd.f32 %v3889_v25, %v5288_v24 }
 0x1f5   : > { %v3891_v29 = vpop.f32.mrf.mxu1 }
 0x1f6   : > { %6754 = vst [vmem:[#allocation18_spill] sm:$0xff] %v5329_v31  ;;  %v3892_v34 = vadd.f32 %v3891_v29, %v3890_v26  ;;  %4389 = vmatprep.mubr.msk.bf16.mxu0 %vm1090_vm1, %v1064_v28  ;;  %v6603_v39 = vmax.f32 %v5329_v31, 0.0 }
 0x1f7   : > { %v3893_v35 = vpop.f32.mrf.mxu1 }
 0x1f8   : > { %v5333_v36 = vadd.f32 %v3892_v34, %v5288_v24 }
 0x1f9   : > { %v3894_v37 = vpop.f32.mrf.mxu1 }
 0x1fa   : > { %6755 = vst [vmem:[#allocation19_spill] sm:$0xff] %v5333_v36  ;;  %v6602_v40 = vmax.f32 %v5333_v36, 0.0  ;;  %v3895_v62 = vadd.f32 %v3894_v37, %v3893_v35 }
 0x1fb   : > { %v3896_v2 = vpop.f32.mrf.mxu1 }
 0x1fc   : > { %v1065_v3 = vpack.c.bf16 %v6602_v40, %v6603_v39  ;;  %v5342_v6 = vadd.f32 %v3895_v62, %v5288_v24 }
 0x1fd   : > { %v3897_v5 = vpop.f32.mrf.mxu1 }
 0x1fe   : > { %6756 = vst [vmem:[#allocation20_spill] sm:$0xff] %v5342_v6  ;;  %v3898_v9 = vadd.f32 %v3897_v5, %v3896_v2  ;;  %4390 = vmatmul.mubr.msk.bf16.gmra.mxu0 %vm1090_vm1, %v1065_v3  ;;  %v6605_v26 = vmax.f32 %v5342_v6, 0.0 }
 0x1ff   : > { %v3899_v10 = vpop.f32.mrf.mxu1 }
 0x200   : > { %v5346_v21 = vadd.f32 %v3898_v9, %v5288_v24 }
 0x201   : > { %v3900_v25 = vpop.f32.mrf.mxu1 }
 0x202   : > { %6757 = vst [vmem:[#allocation21_spill] sm:$0xff] %v5346_v21  ;;  %v6604_v28 = vmax.f32 %v5346_v21, 0.0  ;;  %v3901_v29 = vadd.f32 %v3900_v25, %v3899_v10 }
 0x203   : > { %v3902_v34 = vpop.f32.mrf.mxu1 }
 0x204   : > { %v1066_v35 = vpack.c.bf16 %v6604_v28, %v6605_v26  ;;  %v5355_v62 = vadd.f32 %v3901_v29, %v5288_v24 }
 0x205   : > { %v3903_v37 = vpop.f32.mrf.mxu1 }
 0x206   : > { %6758 = vst [vmem:[#allocation22_spill] sm:$0xff] %v5355_v62  ;;  %v3904_v2 = vadd.f32 %v3903_v37, %v3902_v34  ;;  %4393 = vmatprep.mubr.msk.bf16.mxu0 %vm1090_vm1, %v1066_v35  ;;  %v6609_v10 = vmax.f32 %v5355_v62, 0.0 }
 0x207   : > { %v3905_v3 = vpop.f32.mrf.mxu1 }
 0x208   : > { %v5359_v5 = vadd.f32 %v3904_v2, %v5288_v24 }
 0x209   : > { %v3906_v9 = vpop.f32.mrf.mxu1 }
 0x20a   : > { %6759 = vst [vmem:[#allocation23_spill] sm:$0xff] %v5359_v5  ;;  %v6608_v25 = vmax.f32 %v5359_v5, 0.0  ;;  %v3907_v40 = vadd.f32 %v3906_v9, %v3905_v3 }
 0x20b   : > { %v3908_v39 = vpop.f32.mrf.mxu1 }
 0x20c   : > { %v1067_v29 = vpack.c.bf16 %v6608_v25, %v6609_v10  ;;  %v5368_v34 = vadd.f32 %v3907_v40, %v5288_v24 }
 0x20d   : > { %v3909_v28 = vpop.f32.mrf.mxu1 }
 0x20e   : > { %6760 = vst [vmem:[#allocation24_spill] sm:$0xff] %v5368_v34  ;;  %v3910_v35 = vadd.f32 %v3909_v28, %v3908_v39  ;;  %4394 = vmatmul.mubr.msk.bf16.gmra.mxu0 %vm1090_vm1, %v1067_v29  ;;  %v6613_v3 = vmax.f32 %v5368_v34, 0.0 }
 0x20f   : > { %v3911_v37 = vpop.f32.mrf.mxu1 }
 0x210   : > { %v5372_v2 = vadd.f32 %v3910_v35, %v5288_v24 }
 0x211   : > { %v3912_v26 = vpop.f32.mrf.mxu1 }
 0x212   : > { %6761 = vst [vmem:[#allocation25_spill] sm:$0xff] %v5372_v2  ;;  %v6612_v9 = vmax.f32 %v5372_v2, 0.0  ;;  %v3913_v23 = vadd.f32 %v3912_v26, %v3911_v37 }
 0x213   : > { %v3914_v22 = vpop.f32.mrf.mxu1 }
 0x214   : > { %v1068_v40 = vpack.c.bf16 %v6612_v9, %v6613_v3  ;;  %v5381_v39 = vadd.f32 %v3913_v23, %v5288_v24 }
 0x215   : > { %v3915_v25 = vpop.f32.mrf.mxu1 }
 0x216   : > { %6762 = vst [vmem:[#allocation26_spill] sm:$0xff] %v5381_v39  ;;  %v3916_v28 = vadd.f32 %v3915_v25, %v3914_v22  ;;  %4397 = vmatprep.mubr.msk.bf16.mxu0 %vm1090_vm1, %v1068_v40  ;;  %v6617_v26 = vmax.f32 %v5381_v39, 0.0 }
 0x217   : > { %v3917_v29 = vpop.f32.mrf.mxu1 }
 0x218   : > { %v5385_v35 = vadd.f32 %v3916_v28, %v5288_v24 }
 0x219   : > { %v3918_v10 = vpop.f32.mrf.mxu1 }
 0x21a   : > { %6763 = vst [vmem:[#allocation27_spill] sm:$0xff] %v5385_v35  ;;  %v6616_v37 = vmax.f32 %v5385_v35, 0.0  ;;  %v3919_v0 = vadd.f32 %v3918_v10, %v3917_v29 }
 0x21b   : > { %v3920_v1 = vpop.f32.mrf.mxu1 }
 0x21c   : > { %v1069_v23 = vpack.c.bf16 %v6616_v37, %v6617_v26  ;;  %v5394_v22 = vadd.f32 %v3919_v0, %v5288_v24 }
 0x21d   : > { %v3921_v9 = vpop.f32.mrf.mxu1 }
 0x21e   : > { %6764 = vst [vmem:[#allocation28_spill] sm:$0xff] %v5394_v22  ;;  %v3922_v25 = vadd.f32 %v3921_v9, %v3920_v1  ;;  %4398 = vmatmul.mubr.msk.bf16.gmra.mxu0 %vm1090_vm1, %v1069_v23  ;;  %v6621_v10 = vmax.f32 %v5394_v22, 0.0 }
 0x21f   : > { %v3923_v40 = vpop.f32.mrf.mxu1 }
 0x220   : > { %v5398_v28 = vadd.f32 %v3922_v25, %v5288_v24 }
 0x221   : > { %v3924_v3 = vpop.f32.mrf.mxu1 }
 0x222   : > { %6765 = vst [vmem:[#allocation29_spill] sm:$0xff] %v5398_v28  ;;  %v6620_v29 = vmax.f32 %v5398_v28, 0.0  ;;  %v3925_v32 = vadd.f32 %v3924_v3, %v3923_v40 }
 0x223   : > { %v3926_v33 = vpop.f32.mrf.mxu1 }
 0x224   : > { %v1070_v0 = vpack.c.bf16 %v6620_v29, %v6621_v10  ;;  %v5407_v1 = vadd.f32 %v3925_v32, %v5288_v24 }
 0x225   : > { %v3927_v37 = vpop.f32.mrf.mxu1 }
 0x226   : > { %6766 = vst [vmem:[#allocation30_spill] sm:$0xff] %v5407_v1  ;;  %v3928_v9 = vadd.f32 %v3927_v37, %v3926_v33  ;;  %4401 = vmatprep.mubr.msk.bf16.mxu0 %vm1090_vm1, %v1070_v0  ;;  %v6625_v3 = vmax.f32 %v5407_v1, 0.0 }
 0x227   : > { %v3929_v23 = vpop.f32.mrf.mxu1 }
 0x228   : > { %v5411_v25 = vadd.f32 %v3928_v9, %v5288_v24 }
 0x229   : > { %v3930_v26 = vpop.f32.mrf.mxu1 }
 0x22a   : > { %6767 = vst [vmem:[#allocation31_spill] sm:$0xff] %v5411_v25  ;;  %v6624_v40 = vmax.f32 %v5411_v25, 0.0  ;;  %v3931_v22 = vadd.f32 %v3930_v26, %v3929_v23 }
 0x22b   : > { %v3932_v35 = vpop.f32.mrf.mxu1 }
 0x22c   : > { %v1071_v32 = vpack.c.bf16 %v6624_v40, %v6625_v3  ;;  %v5420_v33 = vadd.f32 %v3931_v22, %v5288_v24 }
 0x22d   : > { %v3933_v29 = vpop.f32.mrf.mxu1 }
 0x22e   : > { %6768 = vst [vmem:[#allocation32_spill] sm:$0xff] %v5420_v33  ;;  %v3934_v37 = vadd.f32 %v3933_v29, %v3932_v35  ;;  %4402 = vmatmul.mubr.msk.bf16.gmra.mxu0 %vm1090_vm1, %v1071_v32  ;;  %v6629_v26 = vmax.f32 %v5420_v33, 0.0 }
 0x22f   : > { %v3935_v0 = vpop.f32.mrf.mxu1 }
 0x230   : > { %v5424_v9 = vadd.f32 %v3934_v37, %v5288_v24 }
 0x231   : > { %v3936_v10 = vpop.f32.mrf.mxu1 }
 0x232   : > { %6769 = vst [vmem:[#allocation33_spill] sm:$0xff] %v5424_v9  ;;  %v6628_v23 = vmax.f32 %v5424_v9, 0.0  ;;  %v3937_v1 = vadd.f32 %v3936_v10, %v3935_v0 }
 0x233   : > { %v3938_v28 = vpop.f32.mrf.mxu1 }
 0x234   : > { %v1072_v22 = vpack.c.bf16 %v6628_v23, %v6629_v26  ;;  %v5433_v35 = vadd.f32 %v3937_v1, %v5288_v24 }
 0x235   : > { %v3939_v40 = vpop.f32.mrf.mxu1 }
 0x236   : > { %6770 = vst [vmem:[#allocation34_spill] sm:$0xff] %v5433_v35  ;;  %v3940_v29 = vadd.f32 %v3939_v40, %v3938_v28  ;;  %4405 = vmatprep.mubr.msk.bf16.mxu0 %vm1090_vm1, %v1072_v22  ;;  %v6633_v10 = vmax.f32 %v5433_v35, 0.0 }
 0x237   : > { %v3941_v32 = vpop.f32.mrf.mxu1 }
 0x238   : > { %v5437_v37 = vadd.f32 %v3940_v29, %v5288_v24 }
 0x239   : > { %v3942_v3 = vpop.f32.mrf.mxu1 }
 0x23a   : > { %6771 = vst [vmem:[#allocation35_spill] sm:$0xff] %v5437_v37  ;;  %v6632_v0 = vmax.f32 %v5437_v37, 0.0  ;;  %v3943_v33 = vadd.f32 %v3942_v3, %v3941_v32 }
 0x23b   : > { %v3944_v25 = vpop.f32.mrf.mxu1 }
 0x23c   : > { %v1073_v1 = vpack.c.bf16 %v6632_v0, %v6633_v10  ;;  %v5446_v28 = vadd.f32 %v3943_v33, %v5288_v24 }
 0x23d   : > { %v3945_v23 = vpop.f32.mrf.mxu1 }
 0x23e   : > { %6772 = vst [vmem:[#allocation36_spill] sm:$0xff] %v5446_v28  ;;  %v3946_v40 = vadd.f32 %v3945_v23, %v3944_v25  ;;  %4406 = vmatmul.mubr.msk.bf16.gmra.mxu0 %vm1090_vm1, %v1073_v1  ;;  %v6637_v3 = vmax.f32 %v5446_v28, 0.0 }
 0x23f   : > { %v3947_v22 = vpop.f32.mrf.mxu1 }
 0x240   : > { %v5450_v29 = vadd.f32 %v3946_v40, %v5288_v24 }
 0x241   : > { %v3948_v26 = vpop.f32.mrf.mxu1 }
 0x242   : > { %6773 = vst [vmem:[#allocation37_spill] sm:$0xff] %v5450_v29  ;;  %v6636_v32 = vmax.f32 %v5450_v29, 0.0  ;;  %v3949_v35 = vadd.f32 %v3948_v26, %v3947_v22 }
 0x243   : > { %v3950_v9 = vpop.f32.mrf.mxu1 }
 0x244   : > { %v1074_v33 = vpack.c.bf16 %v6636_v32, %v6637_v3  ;;  %v5459_v25 = vadd.f32 %v3949_v35, %v5288_v24 }
 0x245   : > { %v3951_v0 = vpop.f32.mrf.mxu1 }
 0x246   : > { %6774 = vst [vmem:[#allocation38_spill] sm:$0xff] %v5459_v25  ;;  %v3952_v23 = vadd.f32 %v3951_v0, %v3950_v9  ;;  %4409 = vmatprep.mubr.msk.bf16.mxu0 %vm1090_vm1, %v1074_v33  ;;  %v6643_v26 = vmax.f32 %v5459_v25, 0.0 }
 0x247   : > { %v3953_v1 = vpop.f32.mrf.mxu1 }
 0x248   : > { %v5463_v40 = vadd.f32 %v3952_v23, %v5288_v24 }
 0x249   : > { %v3954_v10 = vpop.f32.mrf.mxu1 }
 0x24a   : > { %6775 = vst [vmem:[#allocation39_spill] sm:$0xff] %v5463_v40  ;;  %v6640_v22 = vmax.f32 %v5463_v40, 0.0  ;;  %v3955_v28 = vadd.f32 %v3954_v10, %v3953_v1 }
 0x24b   : > { %v3956_v37 = vpop.f32.mrf.mxu1 }
 0x24c   : > { %v1075_v35 = vpack.c.bf16 %v6640_v22, %v6643_v26  ;;  %v5472_v9 = vadd.f32 %v3955_v28, %v5288_v24 }
 0x24d   : > { %v3957_v32 = vpop.f32.mrf.mxu1 }
 0x24e   : > { %6776 = vst [vmem:[#allocation40_spill] sm:$0xff] %v5472_v9  ;;  %v3958_v0 = vadd.f32 %v3957_v32, %v3956_v37  ;;  %4410 = vmatmul.mubr.msk.bf16.gmra.mxu0 %vm1090_vm1, %v1075_v35  ;;  %v6642_v10 = vmax.f32 %v5472_v9, 0.0 }
 0x24f   : > { %v3959_v33 = vpop.f32.mrf.mxu1 }
 0x250   : > { %v5476_v23 = vadd.f32 %v3958_v0, %v5288_v24 }
 0x251   : > { %v3960_v3 = vpop.f32.mrf.mxu1 }
 0x252   : > { %6777 = vst [vmem:[#allocation41_spill] sm:$0xff] %v5476_v23  ;;  %v6641_v1 = vmax.f32 %v5476_v23, 0.0  ;;  %v3961_v25 = vadd.f32 %v3960_v3, %v3959_v33 }
 0x253   : > { %v3962_v29 = vpop.f32.mrf.mxu1 }
 0x254   : > { %v1076_v28 = vpack.c.bf16 %v6641_v1, %v6642_v10  ;;  %v5485_v37 = vadd.f32 %v3961_v25, %v5288_v24 }
 0x255   : > { %v3963_v22 = vpop.f32.mrf.mxu1 }
 0x256   : > { %6778 = vst [vmem:[#allocation42_spill] sm:$0xff] %v5485_v37  ;;  %v3964_v32 = vadd.f32 %v3963_v22, %v3962_v29  ;;  %4413 = vmatprep.mubr.msk.bf16.mxu0 %vm1090_vm1, %v1076_v28  ;;  %v6651_v0 = vmax.f32 %v5485_v37, 0.0 }
 0x258   : > { %v5489_v35 = vadd.f32 %v3964_v32, %v5288_v24 }
 0x25a   : > { %6779 = vst [vmem:[#allocation43_spill] sm:$0xff] %v5489_v35  ;;  %v6650_v3 = vmax.f32 %v5489_v35, 0.0 }
 0x25c   : > { %v1077_v33 = vpack.c.bf16 %v6650_v3, %v6651_v0 }
 0x25e   : > { %4414 = vmatmul.mubr.msk.bf16.gmra.mxu0 %vm1090_vm1, %v1077_v33 }
 0x25f   : > { %1355 = vmatprep.mubr.bf16.mxu0 %v5134_v56 }
 0x2ae   : > { %v4387_v25 = vpop.f32.mrf.mxu0 }
 0x2b0   : > { %v1173_v29 = vpop.f32.mrf.mxu0 }
 0x2b2   : > { %v4388_v22 = vpop.f32.mrf.mxu0 }
 0x2b3   : > { %v1301_v28 = vpack.c.bf16 %v4388_v22, %v4387_v25 }
 0x2b4   : > { %v1176_v1 = vpop.f32.mrf.mxu0 }
 0x2be   : > { %v4391_v24 = vpop.f32.mrf.mxu0 }
 0x2c0   : > { %v1189_v32 = vpop.f32.mrf.mxu0 }
 0x2c2   : > { %v4392_v10 = vpop.f32.mrf.mxu0 }
 0x2c3   : > { %v1303_v26 = vpack.c.bf16 %v4392_v10, %v4391_v24 }
 0x2c4   : > { %v1192_v23 = vpop.f32.mrf.mxu0 }
 0x2ce   : > { %v4395_v9 = vpop.f32.mrf.mxu0 }
 0x2d0   : > { %v1205_v40 = vpop.f32.mrf.mxu0 }
 0x2d2   : > { %v4396_v37 = vpop.f32.mrf.mxu0 }
 0x2d3   : > { %v1305_v18 = vpack.c.bf16 %v4396_v37, %v4395_v9 }
 0x2d4   : > { %v1208_v39 = vpop.f32.mrf.mxu0 }
 0x2d5   : > { %v1304_v16 = vpack.c.bf16 %v1208_v39, %v1205_v40 }
 0x2de   : > { %v4399_v35 = vpop.f32.mrf.mxu0 }
 0x2e0   : > { %v1221_v3 = vpop.f32.mrf.mxu0 }
 0x2e2   : > { %v4400_v0 = vpop.f32.mrf.mxu0 }
 0x2e3   : > { %v1307_v27 = vpack.c.bf16 %v4400_v0, %v4399_v35 }
 0x2e4   : > { %v1224_v33 = vpop.f32.mrf.mxu0 }
 0x2e5   : > { %v1306_v20 = vpack.c.bf16 %v1224_v33, %v1221_v3 }
 0x2ee   : > { %v4403_v2 = vpop.f32.mrf.mxu0 }
 0x2f0   : > { %v1237_v34 = vpop.f32.mrf.mxu0 }
 0x2f2   : > { %v4404_v5 = vpop.f32.mrf.mxu0 }
 0x2f4   : > { %v1240_v62 = vpop.f32.mrf.mxu0 }
 0x2fe   : > { %v4407_v21 = vpop.f32.mrf.mxu0 }
 0x300   : > { %v1253_v25 = vpop.f32.mrf.mxu0 }
 0x302   : > { %v4408_v22 = vpop.f32.mrf.mxu0 }
 0x303   : > { %v1311_v15 = vpack.c.bf16 %v4408_v22, %v4407_v21 }
 0x304   : > { %v1256_v6 = vpop.f32.mrf.mxu0 }
 0x305   : > { %v1310_v14 = vpack.c.bf16 %v1256_v6, %v1253_v25 }
 0x30e   : > { %v4411_v36 = vpop.f32.mrf.mxu0 }
 0x310   : > { %v1269_v31 = vpop.f32.mrf.mxu0 }
 0x312   : > { %v4412_v10 = vpop.f32.mrf.mxu0 }
 0x313   : > { %v1313_v19 = vpack.c.bf16 %v4412_v10, %v4411_v36 }
 0x314   : > { %v1272_v24 = vpop.f32.mrf.mxu0 }
 0x315   : > { %v1312_v17 = vpack.c.bf16 %v1272_v24, %v1269_v31 }
 0x31e   : > { %v4415_v11 = vpop.f32.mrf.mxu0 }
 0x320   : > { %v1285_v8 = vpop.f32.mrf.mxu0 }
 0x322   : > { %v4416_v38 = vpop.f32.mrf.mxu0 }
 0x323   : > { %v1315_v61 = vpack.c.bf16 %v4416_v38, %v4415_v11  ;;  %v1302_v38 = vpack.c.bf16 %v1192_v23, %v1189_v32 }
 0x324   : > { %v1288_v30 = vpop.f32.mrf.mxu0 }
 0x325   : > { %v1314_v56 = vpack.c.bf16 %v1288_v30, %v1285_v8  ;;  %3985 = vmatprep.subr.bf16.mxu0 %v1315_v61  ;;  %v1309_v30 = vpack.c.bf16 %v4404_v5, %v4403_v2 }
 0x326   : > { %3986 = vmatpush3.bf16.msra.mxu0 %v1307_v27 }
 0x327   : > { %3987 = vmatprep.subr.bf16.mxu0 %v1314_v56  ;;  %v1308_v56 = vpack.c.bf16 %v1240_v62, %v1237_v34 }
 0x32a   : > { %3988 = vmatpush3.bf16.msra.mxu0 %v1306_v20  ;;  %v1300_v20 = vpack.c.bf16 %v1176_v1, %v1173_v29 }
 0x32b   : > { %3989 = vmatprep.subr.bf16.mxu0 %v1313_v19 }
 0x32e   : > { %3990 = vmatpush3.bf16.msra.mxu0 %v1305_v18 }
 0x32f   : > { %3991 = vmatprep.subr.bf16.mxu0 %v1312_v17 }
 0x332   : > { %3992 = vmatpush3.bf16.msra.mxu0 %v1304_v16 }
 0x333   : > { %3993 = vmatprep.subr.bf16.mxu0 %v1311_v15 }
 0x336   : > { %3994 = vmatpush3.bf16.msra.mxu0 %v1303_v26 }
 0x337   : > { %3995 = vmatprep.subr.bf16.mxu0 %v1310_v14 }
 0x33a   : > { %3996 = vmatpush3.bf16.msra.mxu0 %v1302_v38 }
 0x33b   : > { %3997 = vmatprep.subr.bf16.mxu0 %v1309_v30 }
 0x33e   : > { %3998 = vmatpush3.bf16.msra.mxu0 %v1301_v28 }
 0x33f   : > { %3999 = vmatprep.subr.bf16.mxu0 %v1308_v56 }
 0x342   : > { %4000 = vmatpush3.bf16.msra.mxu0 %v1300_v20 }
 0x345   : > { %1356 = vmatmul.mubr.bf16.vlgmr.msra.gmra.mxu0 %v5138_v41  ;;  %v1922_v41 = vld [vmem:[%s6597_s6 + $0x30] sm:$0xff] }
 0x346   : > { %1363 = vmatprep.mubr.bf16.mxu0 %v5141_v42  ;;  %v1923_v42 = vld [vmem:[%s6597_s6 + $0x38] sm:$0xff] }
 0x34d   : > { %1364 = vmatmul.mubr.bf16.gmra.mxu0 %v5146_v43  ;;  %v1927_v43 = vpack.c.bf16 %v1923_v42, %v1922_v41 }
 0x34e   : > { %1371 = vmatprep.mubr.bf16.mxu0 %v5149_v44  ;;  %v1920_v44 = vld [vmem:[%s6597_s6 + $0x20] sm:$0xff] }
 0x34f   : > { %4417 = vmatprep.subr.bf16.mxu1 %v1927_v43 }
 0x350   : > { %4418 = vmatpush3.bf16.msra.mxu1 %v1927_v43 }
 0x355   : > { %1372 = vmatmul.mubr.bf16.gmra.mxu0 %v5154_v45  ;;  %v1921_v45 = vld [vmem:[%s6597_s6 + $0x28] sm:$0xff] }
 0x356   : > { %1379 = vmatprep.mubr.bf16.mxu0 %v5157_v46  ;;  %v1926_v46 = vpack.c.bf16 %v1921_v45, %v1920_v44 }
 0x358   : > { %4419 = vmatprep.subr.bf16.mxu1 %v1926_v46 }
 0x359   : > { %4420 = vmatpush3.bf16.msra.mxu1 %v1926_v46 }
 0x35d   : > { %1380 = vmatmul.mubr.bf16.gmra.mxu0 %v5162_v47  ;;  %v1918_v47 = vld [vmem:[%s6597_s6 + $0x10] sm:$0xff] }
 0x35e   : > { %1387 = vmatprep.mubr.bf16.mxu0 %v5165_v48  ;;  %v1919_v48 = vld [vmem:[%s6597_s6 + $0x18] sm:$0xff] }
 0x365   : > { %1388 = vmatmul.mubr.bf16.gmra.mxu0 %v5170_v49  ;;  %v1925_v49 = vpack.c.bf16 %v1919_v48, %v1918_v47 }
 0x366   : > { %1395 = vmatprep.mubr.bf16.mxu0 %v5173_v50  ;;  %v1916_v50 = vld [vmem:[%s6597_s6] sm:$0xff] }
 0x367   : > { %4421 = vmatprep.subr.bf16.mxu1 %v1925_v49 }
 0x368   : > { %4422 = vmatpush3.bf16.msra.mxu1 %v1925_v49 }
 0x36d   : > { %1396 = vmatmul.mubr.bf16.gmra.mxu0 %v5178_v51  ;;  %v1917_v51 = vld [vmem:[%s6597_s6 + $0x8] sm:$0xff] }
 0x36e   : > { %1403 = vmatprep.mubr.bf16.mxu0 %v5181_v52  ;;  %v1924_v52 = vpack.c.bf16 %v1917_v51, %v1916_v50 }
 0x370   : > { %4423 = vmatprep.subr.bf16.mxu1 %v1924_v52 }
 0x371   : > { %4424 = vmatpush3.bf16.msra.mxu1 %v1924_v52 }
 0x375   : > { %1404 = vmatmul.mubr.bf16.gmra.mxu0 %v5186_v53  ;;  %v6780_v53 = vld [vmem:[#allocation5_spill] sm:$0xff] }
 0x376   : > { %1411 = vmatprep.mubr.bf16.mxu0 %v5189_v54  ;;  %v6781_v54 = vld [vmem:[#allocation6_spill] sm:$0xff] }
 0x37d   : > { %1412 = vmatmul.mubr.bf16.gmra.mxu0 %v5194_v55  ;;  %v4982_v55 = vmov 64  }
 0x37e   : > { %1419 = vmatprep.mubr.bf16.mxu0 %v5197_v57  ;;  %4473 = vset.pattern.permute.xlu0 %v4982_v55  ;;  %v6782_v57 = vld [vmem:[#allocation7_spill] sm:$0xff] }
 0x37f   : > { %4474 = vset.pattern.permute.xlu1 %v4982_v55 }
 0x385   : > { %1420 = vmatmul.mubr.bf16.gmra.mxu0 %v5202_v58  ;;  %v6783_v58 = vld [vmem:[#allocation8_spill] sm:$0xff] }
 0x386   : > { %1427 = vmatprep.mubr.bf16.mxu0 %v5205_v59  ;;  %v6784_v59 = vld [vmem:[#allocation9_spill] sm:$0xff] }
 0x38d   : > { %1428 = vmatmul.mubr.bf16.gmra.mxu0 %v5210_v60  ;;  %v6785_v60 = vld [vmem:[#allocation10_spill] sm:$0xff] }
 0x38e   : > { %1435 = vmatprep.mubr.bf16.mxu0 %v5219_v63  ;;  %v6786_v63 = vld [vmem:[#allocation11_spill] sm:$0xff] }
 0x395   : > { %1436 = vmatmul.mubr.bf16.gmra.mxu0 %v5230_v4  ;;  %v6787_v4 = vld [vmem:[#allocation4_spill] sm:$0xff] }
 0x396   : > { %1443 = vmatprep.mubr.bf16.mxu0 %v5239_v7 }
 0x39d   : > { %1444 = vmatmul.mubr.bf16.gmra.mxu0 %v5250_v12  ;;  %v5558_v12 = vld [vmem:[%s6596_s5] ss:$0 sm:$0xff] }
 0x39e   : > { %1451 = vmatprep.mubr.bf16.mxu0 %v5253_v13 }
 0x3a5   : > { %1452 = vmatmul.mubr.bf16.gmra.mxu0 %v6780_v53 }
 0x3a6   : > { %1459 = vmatprep.mubr.bf16.mxu0 %v6781_v54 }
 0x3ad   : > { %1460 = vmatmul.mubr.bf16.gmra.mxu0 %v6782_v57 }
 0x3ae   : > { %1467 = vmatprep.mubr.bf16.mxu0 %v6783_v58 }
 0x3b5   : > { %1468 = vmatmul.mubr.bf16.gmra.mxu0 %v6784_v59 }
 0x3b6   : > { %1475 = vmatprep.mubr.bf16.mxu0 %v6785_v60 }
 0x3bd   : > { %1476 = vmatmul.mubr.bf16.gmra.mxu0 %v6786_v63 }
 0x3be   : > { %2831 = vmatprep.mubr.bf16.mxu0 %v6787_v4 }
 0x405   : > { %v4001_v7 = vpop.f32.mrf.mxu0 }
 0x407   : > { %v4002_v13 = vpop.f32.mrf.mxu0 }
 0x408   : > { %v4003_v14 = vadd.f32 %v4002_v13, %v4001_v7 }
 0x409   : > { %v4004_v15 = vpop.f32.mrf.mxu0 }
 0x40a   : > { %v5561_v16 = vadd.f32 %v4003_v14, %v5558_v12 }
 0x40b   : > { %v4005_v17 = vpop.f32.mrf.mxu0 }
 0x40c   : > { %v3716_v18 = vmul.f32 -1.442695, %v5561_v16  ;;  %v4006_v19 = vadd.f32 %v4005_v17, %v4004_v15  ;;  %v6705_v11 = vmax.f32 %v5561_v16, 0.0 }
 0x40d   : > { %v4007_v27 = vpop.f32.mrf.mxu0 }
 0x40e   : > { %4527 = vpow2.f32 %v3716_v18  ;;  %v5565_v61 = vadd.f32 %v4006_v19, %v5558_v12 }
 0x40f   : > { %v4008_v8 = vpop.f32.mrf.mxu0 }
 0x410   : > { %v6704_v31 = vmax.f32 %v5565_v61, 0.0  ;;  %v3717_v36 = vmul.f32 -1.442695, %v5565_v61  ;;  %v4009_v6 = vadd.f32 %v4008_v8, %v4007_v27 }
 0x411   : > { %v4010_v21 = vpop.f32.mrf.mxu0 }
 0x412   : > { %4529 = vpow2.f32 %v3717_v36  ;;  %v5571_v62 = vadd.f32 %v4009_v6, %v5558_v12  ;;  %v1900_v5 = vpack.c.bf16 %v6704_v31, %v6705_v11 }
 0x413   : > { %v4011_v34 = vpop.f32.mrf.mxu0 }
 0x414   : > { %v3718_v2 = vmul.f32 -1.442695, %v5571_v62  ;;  %v4012_v39 = vadd.f32 %v4011_v34, %v4010_v21  ;;  %4425 = vmatprep.mubr.msk.bf16.mxu1 %vm1090_vm1, %v1900_v5  ;;  %v6703_v23 = vmax.f32 %v5571_v62, 0.0 }
 0x415   : > { %v4013_v40 = vpop.f32.mrf.mxu0 }
 0x416   : > { %4531 = vpow2.f32 %v3718_v2  ;;  %v5580_v26 = vadd.f32 %v4012_v39, %v5558_v12 }
 0x417   : > { %v4014_v9 = vpop.f32.mrf.mxu0 }
 0x418   : > { %v6702_v1 = vmax.f32 %v5580_v26, 0.0  ;;  %v3719_v37 = vmul.f32 -1.442695, %v5580_v26  ;;  %v4015_v35 = vadd.f32 %v4014_v9, %v4013_v40 }
 0x419   : > { %v4016_v0 = vpop.f32.mrf.mxu0 }
 0x41a   : > { %4533 = vpow2.f32 %v3719_v37  ;;  %v1901_v3 = vpack.c.bf16 %v6702_v1, %v6703_v23  ;;  %v5590_v29 = vadd.f32 %v4015_v35, %v5558_v12 }
 0x41b   : > { %v4528_v28 = vpop.eup %4527  ;;  %v4017_v32 = vpop.f32.mrf.mxu0 }
 0x41c   : > { %v1612_v33 = vadd.f32 1.0, %v4528_v28  ;;  %v3720_v25 = vmul.f32 -1.442695, %v5590_v29  ;;  %v4018_v22 = vadd.f32 %v4017_v32, %v4016_v0  ;;  %4426 = vmatmul.mubr.msk.bf16.vlgmr.msra.gmra.mxu1 %vm1090_vm1, %v1901_v3  ;;  %v6701_v30 = vmax.f32 %v5590_v29, 0.0 }
 0x41d   : > { %v4019_v10 = vpop.f32.mrf.mxu0 }
 0x41e   : > { %4535 = vrcp.f32 %v1612_v33  ;;  %v5595_v24 = vadd.f32 %v4018_v22, %v5558_v12 }
 0x41f   : > { %v4530_v38 = vpop.eup %4529  ;;  %4537 = vpow2.f32 %v3720_v25  ;;  %v4020_v56 = vpop.f32.mrf.mxu0 }
 0x420   : > { %v1613_v20 = vadd.f32 1.0, %v4530_v38  ;;  %v6700_v41 = vmax.f32 %v5595_v24, 0.0  ;;  %v3721_v42 = vmul.f32 -1.442695, %v5595_v24  ;;  %v4021_v43 = vadd.f32 %v4020_v56, %v4019_v10 }
 0x421   : > { %v4022_v44 = vpop.f32.mrf.mxu0 }
 0x422   : > { %4539 = vrcp.f32 %v1613_v20  ;;  %v5601_v45 = vadd.f32 %v4021_v43, %v5558_v12  ;;  %v1902_v46 = vpack.c.bf16 %v6700_v41, %v6701_v30 }
 0x423   : > { %v4532_v47 = vpop.eup %4531  ;;  %4541 = vpow2.f32 %v3721_v42  ;;  %v4023_v48 = vpop.f32.mrf.mxu0 }
 0x424   : > { %v1614_v49 = vadd.f32 1.0, %v4532_v47  ;;  %v3722_v50 = vmul.f32 -1.442695, %v5601_v45  ;;  %v4024_v51 = vadd.f32 %v4023_v48, %v4022_v44  ;;  %4429 = vmatprep.mubr.msk.bf16.mxu1 %vm1090_vm1, %v1902_v46  ;;  %v6699_v55 = vmax.f32 %v5601_v45, 0.0 }
 0x425   : > { %v4025_v52 = vpop.f32.mrf.mxu0 }
 0x426   : > { %4543 = vrcp.f32 %v1614_v49  ;;  %v5610_v53 = vadd.f32 %v4024_v51, %v5558_v12 }
 0x427   : > { %v4534_v54 = vpop.eup %4533  ;;  %4545 = vpow2.f32 %v3722_v50  ;;  %v4026_v57 = vpop.f32.mrf.mxu0 }
 0x428   : > { %v1615_v58 = vadd.f32 1.0, %v4534_v54  ;;  %v6698_v59 = vmax.f32 %v5610_v53, 0.0  ;;  %v3723_v60 = vmul.f32 -1.442695, %v5610_v53  ;;  %v4027_v63 = vadd.f32 %v4026_v57, %v4025_v52 }
 0x429   : > { %v4028_v4 = vpop.f32.mrf.mxu0 }
 0x42a   : > { %4547 = vrcp.f32 %v1615_v58  ;;  %v5616_v7 = vadd.f32 %v4027_v63, %v5558_v12  ;;  %v1903_v13 = vpack.c.bf16 %v6698_v59, %v6699_v55 }
 0x42b   : > { %v4536_v14 = vpop.eup %4535  ;;  %4549 = vpow2.f32 %v3723_v60  ;;  %v4029_v15 = vpop.f32.mrf.mxu0 }
 0x42c   : > { %v4538_v17 = vpop.eup %4537  ;;  %v3724_v18 = vmul.f32 -1.442695, %v5616_v7  ;;  %v4030_v19 = vadd.f32 %v4029_v15, %v4028_v4  ;;  %1710 = vperm.xlu0 %4473, %v4536_v14   ;;  %4430 = vmatmul.mubr.msk.bf16.gmra.mxu1 %vm1090_vm1, %v1903_v13  ;;  %v6697_v34 = vmax.f32 %v5616_v7, 0.0 }
 0x42d   : > { %v1616_v27 = vadd.f32 1.0, %v4538_v17  ;;  %v4031_v8 = vpop.f32.mrf.mxu0 }
 0x42e   : > { %4551 = vpow2.f32 %v3724_v18  ;;  %v5625_v36 = vadd.f32 %v4030_v19, %v5558_v12 }
 0x42f   : > { %v4540_v6 = vpop.eup %4539  ;;  %4553 = vrcp.f32 %v1616_v27  ;;  %v4032_v21 = vpop.f32.mrf.mxu0 }
 0x430   : > { %v4542_v5 = vpop.eup %4541  ;;  %v6696_v2 = vmax.f32 %v5625_v36, 0.0  ;;  %v3725_v39 = vmul.f32 -1.442695, %v5625_v36  ;;  %v4033_v40 = vadd.f32 %v4032_v21, %v4031_v8  ;;  %1715 = vperm.xlu0 %4473, %v4540_v6  }
 0x431   : > { %v1617_v9 = vadd.f32 1.0, %v4542_v5  ;;  %v4034_v37 = vpop.f32.mrf.mxu0 }
 0x432   : > { %4555 = vpow2.f32 %v3725_v39  ;;  %v1904_v35 = vpack.c.bf16 %v6696_v2, %v6697_v34  ;;  %v5635_v0 = vadd.f32 %v4033_v40, %v5558_v12 }
 0x433   : > { %v4544_v3 = vpop.eup %4543  ;;  %4557 = vrcp.f32 %v1617_v9  ;;  %v4035_v28 = vpop.f32.mrf.mxu0 }
 0x434   : > { %v4546_v32 = vpop.eup %4545  ;;  %v3726_v33 = vmul.f32 -1.442695, %v5635_v0  ;;  %v4036_v25 = vadd.f32 %v4035_v28, %v4034_v37  ;;  %1720 = vperm.xlu1 %4474, %v4544_v3   ;;  %4433 = vmatprep.mubr.msk.bf16.mxu1 %vm1090_vm1, %v1904_v35  ;;  %v6695_v43 = vmax.f32 %v5635_v0, 0.0 }
 0x435   : > { %v1618_v22 = vadd.f32 1.0, %v4546_v32  ;;  %v4037_v10 = vpop.f32.mrf.mxu0 }
 0x436   : > { %4559 = vpow2.f32 %v3726_v33  ;;  %v5640_v38 = vadd.f32 %v4036_v25, %v5558_v12 }
 0x437   : > { %v4548_v56 = vpop.eup %4547  ;;  %4561 = vrcp.f32 %v1618_v22  ;;  %v4038_v20 = vpop.f32.mrf.mxu0 }
 0x438   : > { %v4550_v42 = vpop.eup %4549  ;;  %v6694_v44 = vmax.f32 %v5640_v38, 0.0  ;;  %v3727_v46 = vmul.f32 -1.442695, %v5640_v38  ;;  %v4039_v47 = vadd.f32 %v4038_v20, %v4037_v10  ;;  %1725 = vperm.xlu1 %4474, %v4548_v56  }
 0x439   : > { %v1619_v48 = vadd.f32 1.0, %v4550_v42  ;;  %v4040_v49 = vpop.f32.mrf.mxu0 }
 0x43a   : > { %4563 = vpow2.f32 %v3727_v46  ;;  %v1905_v50 = vpack.c.bf16 %v6694_v44, %v6695_v43  ;;  %v5650_v51 = vadd.f32 %v4039_v47, %v5558_v12 }
 0x43b   : > { %v4552_v52 = vpop.eup %4551  ;;  %4565 = vrcp.f32 %v1619_v48  ;;  %v4041_v54 = vpop.f32.mrf.mxu0 }
 0x43c   : > { %v4554_v57 = vpop.eup %4553  ;;  %v1620_v58 = vadd.f32 1.0, %v4552_v52  ;;  %v3728_v60 = vmul.f32 -1.442695, %v5650_v51  ;;  %v4042_v63 = vadd.f32 %v4041_v54, %v4040_v49  ;;  %4434 = vmatmul.mubr.msk.bf16.gmra.mxu1 %vm1090_vm1, %v1905_v50  ;;  %v6693_v15 = vmax.f32 %v5650_v51, 0.0 }
 0x43d   : > { %1730 = vperm.xlu0 %4473, %v4554_v57   ;;  %v4043_v4 = vpop.f32.mrf.mxu0 }
 0x43e   : > { %4567 = vrcp.f32 %v1620_v58  ;;  %v5655_v13 = vadd.f32 %v4042_v63, %v5558_v12 }
 0x43f   : > { %v4556_v14 = vpop.eup %4555  ;;  %4569 = vpow2.f32 %v3728_v60  ;;  %v4044_v17 = vpop.f32.mrf.mxu0 }
 0x440   : > { %v4558_v18 = vpop.eup %4557  ;;  %v1621_v19 = vadd.f32 1.0, %v4556_v14  ;;  %v6692_v27 = vmax.f32 %v5655_v13, 0.0  ;;  %v3729_v8 = vmul.f32 -1.442695, %v5655_v13  ;;  %v4045_v6 = vadd.f32 %v4044_v17, %v4043_v4 }
 0x441   : > { %1735 = vperm.xlu1 %4474, %v4558_v18   ;;  %v4046_v21 = vpop.f32.mrf.mxu0 }
 0x442   : > { %4571 = vrcp.f32 %v1621_v19  ;;  %v1906_v5 = vpack.c.bf16 %v6692_v27, %v6693_v15  ;;  %v5665_v39 = vadd.f32 %v4045_v6, %v5558_v12 }
 0x443   : > { %v4560_v40 = vpop.eup %4559  ;;  %4573 = vpow2.f32 %v3729_v8  ;;  %v4047_v9 = vpop.f32.mrf.mxu0 }
 0x444   : > { %v4562_v37 = vpop.eup %4561  ;;  %v1622_v35 = vadd.f32 1.0, %v4560_v40  ;;  %v3730_v3 = vmul.f32 -1.442695, %v5665_v39  ;;  %v4048_v28 = vadd.f32 %v4047_v9, %v4046_v21  ;;  %4437 = vmatprep.mubr.msk.bf16.mxu1 %vm1090_vm1, %v1906_v5  ;;  %v6691_v22 = vmax.f32 %v5665_v39, 0.0 }
 0x445   : > { %1740 = vperm.xlu0 %4473, %v4562_v37   ;;  %v4049_v32 = vpop.f32.mrf.mxu0 }
 0x446   : > { %4575 = vrcp.f32 %v1622_v35  ;;  %v5670_v33 = vadd.f32 %v4048_v28, %v5558_v12 }
 0x447   : > { %v4564_v25 = vpop.eup %4563  ;;  %4577 = vpow2.f32 %v3730_v3  ;;  %v4050_v10 = vpop.f32.mrf.mxu0 }
 0x448   : > { %v4566_v56 = vpop.eup %4565  ;;  %v1623_v20 = vadd.f32 1.0, %v4564_v25  ;;  %v6690_v42 = vmax.f32 %v5670_v33, 0.0  ;;  %v3731_v46 = vmul.f32 -1.442695, %v5670_v33  ;;  %v4051_v47 = vadd.f32 %v4050_v10, %v4049_v32 }
 0x449   : > { %1745 = vperm.xlu1 %4474, %v4566_v56   ;;  %v4052_v48 = vpop.f32.mrf.mxu0 }
 0x44a   : > { %4579 = vrcp.f32 %v1623_v20  ;;  %v1907_v49 = vpack.c.bf16 %v6690_v42, %v6691_v22  ;;  %v5680_v50 = vadd.f32 %v4051_v47, %v5558_v12 }
 0x44b   : > { %v4568_v52 = vpop.eup %4567  ;;  %4581 = vpow2.f32 %v3731_v46  ;;  %v4053_v54 = vpop.f32.mrf.mxu0 }
 0x44c   : > { %v4570_v57 = vpop.eup %4569  ;;  %v3732_v58 = vmul.f32 -1.442695, %v5680_v50  ;;  %v4054_v60 = vadd.f32 %v4053_v54, %v4052_v48  ;;  %1750 = vperm.xlu0 %4473, %v4568_v52   ;;  %4438 = vmatmul.mubr.msk.bf16.gmra.mxu1 %vm1090_vm1, %v1907_v49  ;;  %v6685_v8 = vmax.f32 %v5680_v50, 0.0 }
 0x44d   : > { %v1624_v63 = vadd.f32 1.0, %v4570_v57  ;;  %v4055_v4 = vpop.f32.mrf.mxu0 }
 0x44e   : > { %4583 = vpow2.f32 %v3732_v58  ;;  %v5685_v14 = vadd.f32 %v4054_v60, %v5558_v12 }
 0x44f   : > { %v4572_v17 = vpop.eup %4571  ;;  %4585 = vrcp.f32 %v1624_v63  ;;  %v4056_v18 = vpop.f32.mrf.mxu0 }
 0x450   : > { %6788 = vst [vmem:[#allocation5_spill] sm:$0xff] %v5685_v14  ;;  %v4574_v19 = vpop.eup %4573  ;;  %v6684_v6 = vmax.f32 %v5685_v14, 0.0  ;;  %v3733_v21 = vmul.f32 -1.442695, %v5685_v14  ;;  %v4057_v5 = vadd.f32 %v4056_v18, %v4055_v4  ;;  %1755 = vperm.xlu1 %4474, %v4572_v17  }
 0x451   : > { %v1625_v40 = vadd.f32 1.0, %v4574_v19  ;;  %v4058_v9 = vpop.f32.mrf.mxu0 }
 0x452   : > { %4587 = vpow2.f32 %v3733_v21  ;;  %v1908_v37 = vpack.c.bf16 %v6684_v6, %v6685_v8  ;;  %v5695_v35 = vadd.f32 %v4057_v5, %v5558_v12 }
 0x453   : > { %v4576_v3 = vpop.eup %4575  ;;  %4589 = vrcp.f32 %v1625_v40  ;;  %v4059_v28 = vpop.f32.mrf.mxu0 }
 0x454   : > { %6789 = vst [vmem:[#allocation6_spill] sm:$0xff] %v5695_v35  ;;  %v4578_v32 = vpop.eup %4577  ;;  %v3734_v25 = vmul.f32 -1.442695, %v5695_v35  ;;  %v4060_v10 = vadd.f32 %v4059_v28, %v4058_v9  ;;  %1760 = vperm.xlu0 %4473, %v4576_v3   ;;  %4441 = vmatprep.mubr.msk.bf16.mxu1 %vm1090_vm1, %v1908_v37  ;;  %v6681_v52 = vmax.f32 %v5695_v35, 0.0 }
 0x455   : > { %v1626_v56 = vadd.f32 1.0, %v4578_v32  ;;  %v4061_v20 = vpop.f32.mrf.mxu0 }
 0x456   : > { %4591 = vpow2.f32 %v3734_v25  ;;  %v5700_v46 = vadd.f32 %v4060_v10, %v5558_v12 }
 0x457   : > { %v4580_v47 = vpop.eup %4579  ;;  %4593 = vrcp.f32 %v1626_v56  ;;  %v4062_v48 = vpop.f32.mrf.mxu0 }
 0x458   : > { %6790 = vst [vmem:[#allocation7_spill] sm:$0xff] %v5700_v46  ;;  %v4582_v49 = vpop.eup %4581  ;;  %v6680_v54 = vmax.f32 %v5700_v46, 0.0  ;;  %v3735_v57 = vmul.f32 -1.442695, %v5700_v46  ;;  %v4063_v58 = vadd.f32 %v4062_v48, %v4061_v20  ;;  %1765 = vperm.xlu1 %4474, %v4580_v47  }
 0x459   : > { %v1627_v60 = vadd.f32 1.0, %v4582_v49  ;;  %v4064_v63 = vpop.f32.mrf.mxu0 }
 0x45a   : > { %4595 = vpow2.f32 %v3735_v57  ;;  %v1909_v4 = vpack.c.bf16 %v6680_v54, %v6681_v52  ;;  %v5710_v17 = vadd.f32 %v4063_v58, %v5558_v12 }
 0x45b   : > { %v4584_v18 = vpop.eup %4583  ;;  %4597 = vrcp.f32 %v1627_v60  ;;  %v4065_v19 = vpop.f32.mrf.mxu0 }
 0x45c   : > { %6791 = vst [vmem:[#allocation8_spill] sm:$0xff] %v5710_v17  ;;  %v4586_v21 = vpop.eup %4585  ;;  %v1628_v5 = vadd.f32 1.0, %v4584_v18  ;;  %v3736_v40 = vmul.f32 -1.442695, %v5710_v17  ;;  %v4066_v9 = vadd.f32 %v4065_v19, %v4064_v63  ;;  %4442 = vmatmul.mubr.msk.bf16.gmra.mxu1 %vm1090_vm1, %v1909_v4  ;;  %v6677_v32 = vmax.f32 %v5710_v17, 0.0 }
 0x45d   : > { %1770 = vperm.xlu0 %4473, %v4586_v21   ;;  %v4067_v37 = vpop.f32.mrf.mxu0 }
 0x45e   : > { %4599 = vrcp.f32 %v1628_v5  ;;  %v5715_v3 = vadd.f32 %v4066_v9, %v5558_v12 }
 0x45f   : > { %v4588_v28 = vpop.eup %4587  ;;  %4601 = vpow2.f32 %v3736_v40  ;;  %v4068_v25 = vpop.f32.mrf.mxu0 }
 0x460   : > { %6792 = vst [vmem:[#allocation9_spill] sm:$0xff] %v5715_v3  ;;  %v4590_v10 = vpop.eup %4589  ;;  %v1629_v56 = vadd.f32 1.0, %v4588_v28  ;;  %v6676_v20 = vmax.f32 %v5715_v3, 0.0  ;;  %v3737_v47 = vmul.f32 -1.442695, %v5715_v3  ;;  %v4069_v48 = vadd.f32 %v4068_v25, %v4067_v37 }
 0x461   : > { %1775 = vperm.xlu1 %4474, %v4590_v10   ;;  %v4070_v49 = vpop.f32.mrf.mxu0 }
 0x462   : > { %4603 = vrcp.f32 %v1629_v56  ;;  %v1910_v57 = vpack.c.bf16 %v6676_v20, %v6677_v32  ;;  %v5725_v58 = vadd.f32 %v4069_v48, %v5558_v12 }
 0x463   : > { %v4592_v60 = vpop.eup %4591  ;;  %4605 = vpow2.f32 %v3737_v47  ;;  %v4071_v63 = vpop.f32.mrf.mxu0 }
 0x464   : > { %6793 = vst [vmem:[#allocation10_spill] sm:$0xff] %v5725_v58  ;;  %v4594_v4 = vpop.eup %4593  ;;  %v1630_v18 = vadd.f32 1.0, %v4592_v60  ;;  %v3738_v19 = vmul.f32 -1.442695, %v5725_v58  ;;  %v4072_v21 = vadd.f32 %v4071_v63, %v4070_v49  ;;  %4445 = vmatprep.mubr.msk.bf16.mxu1 %vm1090_vm1, %v1910_v57  ;;  %v6675_v37 = vmax.f32 %v5725_v58, 0.0 }
 0x465   : > { %1780 = vperm.xlu0 %4473, %v4594_v4   ;;  %v4073_v5 = vpop.f32.mrf.mxu0 }
 0x466   : > { %4607 = vrcp.f32 %v1630_v18  ;;  %v5730_v40 = vadd.f32 %v4072_v21, %v5558_v12 }
 0x467   : > { %v4596_v9 = vpop.eup %4595  ;;  %4609 = vpow2.f32 %v3738_v19  ;;  %v4074_v28 = vpop.f32.mrf.mxu0 }
 0x468   : > { %6794 = vst [vmem:[#allocation11_spill] sm:$0xff] %v5730_v40  ;;  %v4598_v25 = vpop.eup %4597  ;;  %v1631_v10 = vadd.f32 1.0, %v4596_v9  ;;  %v6674_v56 = vmax.f32 %v5730_v40, 0.0  ;;  %v3739_v47 = vmul.f32 -1.442695, %v5730_v40  ;;  %v4075_v48 = vadd.f32 %v4074_v28, %v4073_v5 }
 0x469   : > { %1785 = vperm.xlu1 %4474, %v4598_v25   ;;  %v4076_v49 = vpop.f32.mrf.mxu0 }
 0x46a   : > { %4611 = vrcp.f32 %v1631_v10  ;;  %v1911_v57 = vpack.c.bf16 %v6674_v56, %v6675_v37  ;;  %v5740_v60 = vadd.f32 %v4075_v48, %v5558_v12 }
 0x46b   : > { %v4600_v63 = vpop.eup %4599  ;;  %4613 = vpow2.f32 %v3739_v47  ;;  %v4077_v4 = vpop.f32.mrf.mxu0 }
 0x46c   : > { %6795 = vst [vmem:[#allocation4_spill] sm:$0xff] %v5740_v60  ;;  %v4602_v18 = vpop.eup %4601  ;;  %v3740_v19 = vmul.f32 -1.442695, %v5740_v60  ;;  %v4078_v21 = vadd.f32 %v4077_v4, %v4076_v49  ;;  %1790 = vperm.xlu0 %4473, %v4600_v63   ;;  %4446 = vmatmul.mubr.msk.bf16.gmra.mxu1 %vm1090_vm1, %v1911_v57  ;;  %v6679_v47 = vmax.f32 %v5740_v60, 0.0 }
 0x46d   : > { %v1632_v5 = vadd.f32 1.0, %v4602_v18  ;;  %v4079_v9 = vpop.f32.mrf.mxu0 }
 0x46e   : > { %4615 = vpow2.f32 %v3740_v19  ;;  %v5745_v28 = vadd.f32 %v4078_v21, %v5558_v12 }
 0x46f   : > { %v4604_v25 = vpop.eup %4603  ;;  %4617 = vrcp.f32 %v1632_v5  ;;  %v4080_v10 = vpop.f32.mrf.mxu0 }
 0x470   : > { %6796 = vst [vmem:[#allocation44_spill] sm:$0xff] %v5745_v28  ;;  %v4606_v48 = vpop.eup %4605  ;;  %v6678_v56 = vmax.f32 %v5745_v28, 0.0  ;;  %v3741_v37 = vmul.f32 -1.442695, %v5745_v28  ;;  %v4081_v49 = vadd.f32 %v4080_v10, %v4079_v9  ;;  %1795 = vperm.xlu1 %4474, %v4604_v25  }
 0x471   : > { %v1633_v63 = vadd.f32 1.0, %v4606_v48  ;;  %v4082_v57 = vpop.f32.mrf.mxu0 }
 0x472   : > { %4619 = vpow2.f32 %v3741_v37  ;;  %v1912_v4 = vpack.c.bf16 %v6678_v56, %v6679_v47  ;;  %v5755_v18 = vadd.f32 %v4081_v49, %v5558_v12 }
 0x473   : > { %v4608_v19 = vpop.eup %4607  ;;  %4621 = vrcp.f32 %v1633_v63  ;;  %v4083_v21 = vpop.f32.mrf.mxu0 }
 0x474   : > { %6797 = vst [vmem:[#allocation45_spill] sm:$0xff] %v5755_v18  ;;  %v4610_v5 = vpop.eup %4609  ;;  %v3742_v20 = vmul.f32 -1.442695, %v5755_v18  ;;  %v4084_v32 = vadd.f32 %v4083_v21, %v4082_v57  ;;  %1800 = vperm.xlu0 %4473, %v4608_v19   ;;  %4449 = vmatprep.mubr.msk.bf16.mxu1 %vm1090_vm1, %v1912_v4  ;;  %v6683_v63 = vmax.f32 %v5755_v18, 0.0 }
 0x475   : > { %v1634_v9 = vadd.f32 1.0, %v4610_v5  ;;  %v4085_v37 = vpop.f32.mrf.mxu0 }
 0x476   : > { %4623 = vpow2.f32 %v3742_v20  ;;  %v5760_v25 = vadd.f32 %v4084_v32, %v5558_v12 }
 0x477   : > { %v4612_v10 = vpop.eup %4611  ;;  %4625 = vrcp.f32 %v1634_v9  ;;  %v4086_v48 = vpop.f32.mrf.mxu0 }
 0x478   : > { %6798 = vst [vmem:[#allocation46_spill] sm:$0xff] %v5760_v25  ;;  %v4614_v49 = vpop.eup %4613  ;;  %v6682_v56 = vmax.f32 %v5760_v25, 0.0  ;;  %v3743_v47 = vmul.f32 -1.442695, %v5760_v25  ;;  %v4087_v57 = vadd.f32 %v4086_v48, %v4085_v37  ;;  %1805 = vperm.xlu1 %4474, %v4612_v10  }
 0x479   : > { %v1635_v19 = vadd.f32 1.0, %v4614_v49  ;;  %v4088_v4 = vpop.f32.mrf.mxu0 }
 0x47a   : > { %4627 = vpow2.f32 %v3743_v47  ;;  %v1913_v32 = vpack.c.bf16 %v6682_v56, %v6683_v63  ;;  %v5770_v20 = vadd.f32 %v4087_v57, %v5558_v12 }
 0x47b   : > { %v4616_v21 = vpop.eup %4615  ;;  %4629 = vrcp.f32 %v1635_v19  ;;  %v4089_v5 = vpop.f32.mrf.mxu0 }
 0x47c   : > { %6799 = vst [vmem:[#allocation47_spill] sm:$0xff] %v5770_v20  ;;  %v4618_v9 = vpop.eup %4617  ;;  %v1636_v54 = vadd.f32 1.0, %v4616_v21  ;;  %v3744_v52 = vmul.f32 -1.442695, %v5770_v20  ;;  %v4090_v37 = vadd.f32 %v4089_v5, %v4088_v4  ;;  %4450 = vmatmul.mubr.msk.bf16.gmra.mxu1 %vm1090_vm1, %v1913_v32  ;;  %v6689_v49 = vmax.f32 %v5770_v20, 0.0 }
 0x47d   : > { %1810 = vperm.xlu0 %4473, %v4618_v9   ;;  %v4091_v47 = vpop.f32.mrf.mxu0 }
 0x47e   : > { %4631 = vrcp.f32 %v1636_v54  ;;  %v5775_v10 = vadd.f32 %v4090_v37, %v5558_v12 }
 0x47f   : > { %v4620_v48 = vpop.eup %4619  ;;  %4633 = vpow2.f32 %v3744_v52  ;;  %v4092_v57 = vpop.f32.mrf.mxu0 }
 0x480   : > { %6800 = vst [vmem:[#allocation48_spill] sm:$0xff] %v5775_v10  ;;  %v4622_v19 = vpop.eup %4621  ;;  %v1637_v56 = vadd.f32 1.0, %v4620_v48  ;;  %v6688_v21 = vmax.f32 %v5775_v10, 0.0  ;;  %v3745_v63 = vmul.f32 -1.442695, %v5775_v10  ;;  %v4093_v4 = vadd.f32 %v4092_v57, %v4091_v47 }
 0x481   : > { %1815 = vperm.xlu1 %4474, %v4622_v19   ;;  %v4094_v32 = vpop.f32.mrf.mxu0 }
 0x482   : > { %4635 = vrcp.f32 %v1637_v56  ;;  %v1914_v54 = vpack.c.bf16 %v6688_v21, %v6689_v49  ;;  %v5785_v5 = vadd.f32 %v4093_v4, %v5558_v12 }
 0x483   : > { %v4624_v52 = vpop.eup %4623  ;;  %4637 = vpow2.f32 %v3745_v63  ;;  %v4095_v9 = vpop.f32.mrf.mxu0 }
 0x484   : > { %6801 = vst [vmem:[#allocation49_spill] sm:$0xff] %v5785_v5  ;;  %v4626_v37 = vpop.eup %4625  ;;  %v1638_v48 = vadd.f32 1.0, %v4624_v52  ;;  %v3746_v6 = vmul.f32 -1.442695, %v5785_v5  ;;  %v4096_v8 = vadd.f32 %v4095_v9, %v4094_v32  ;;  %4453 = vmatprep.mubr.msk.bf16.mxu1 %vm1090_vm1, %v1914_v54  ;;  %v6687_v63 = vmax.f32 %v5785_v5, 0.0 }
 0x485   : > { %1820 = vperm.xlu0 %4473, %v4626_v37   ;;  %v4911_v54 = vld [vmem:[%s5131_s13 + $0x4] ss:$8 sps:$4 sm:$0xff]  }
 0x486   : > { %4639 = vrcp.f32 %v1638_v48  ;;  %v5790_v56 = vadd.f32 %v4096_v8, %v5558_v12 }
 0x487   : > { %v4628_v47 = vpop.eup %4627  ;;  %4641 = vpow2.f32 %v3746_v6 }
 0x488   : > { %6802 = vst [vmem:[#allocation50_spill] sm:$0xff] %v5790_v56  ;;  %v4630_v57 = vpop.eup %4629  ;;  %v1639_v19 = vadd.f32 1.0, %v4628_v47  ;;  %v6686_v4 = vmax.f32 %v5790_v56, 0.0  ;;  %v3747_v52 = vmul.f32 -1.442695, %v5790_v56 }
 0x489   : > { %1825 = vperm.xlu1 %4474, %v4630_v57  }
 0x48a   : > { %4643 = vrcp.f32 %v1639_v19  ;;  %v1915_v32 = vpack.c.bf16 %v6686_v4, %v6687_v63 }
 0x48b   : > { %v4632_v12 = vpop.eup %4631  ;;  %4645 = vpow2.f32 %v3747_v52 }
 0x48c   : > { %v4634_v8 = vpop.eup %4633  ;;  %1830 = vperm.xlu0 %4473, %v4632_v12   ;;  %4454 = vmatmul.mubr.msk.bf16.gmra.mxu1 %vm1090_vm1, %v1915_v32 }
 0x48d   : > { %v1640_v6 = vadd.f32 1.0, %v4634_v8  ;;  %2192 = vmatprep.mubr.bf16.mxu1 %v4911_v54 }
 0x48f   : > { %v4636_v9 = vpop.eup %4635  ;;  %4647 = vrcp.f32 %v1640_v6 }
 0x490   : > { %v4638_v37 = vpop.eup %4637  ;;  %1835 = vperm.xlu1 %4474, %v4636_v9  }
 0x491   : > { %v1641_v48 = vadd.f32 1.0, %v4638_v37 }
 0x493   : > { %v4640_v47 = vpop.eup %4639  ;;  %4649 = vrcp.f32 %v1641_v48 }
 0x494   : > { %v4642_v57 = vpop.eup %4641  ;;  %1840 = vperm.xlu0 %4473, %v4640_v47  }
 0x495   : > { %v1642_v19 = vadd.f32 1.0, %v4642_v57 }
 0x497   : > { %v4644_v4 = vpop.eup %4643  ;;  %4651 = vrcp.f32 %v1642_v19 }
 0x498   : > { %v4646_v52 = vpop.eup %4645  ;;  %1845 = vperm.xlu1 %4474, %v4644_v4  }
 0x499   : > { %v1643_v12 = vadd.f32 1.0, %v4646_v52 }
 0x49b   : > { %4653 = vrcp.f32 %v1643_v12 }
 0x49c   : > { %v4648_v32 = vpop.eup %4647 }
 0x49d   : > { %1850 = vperm.xlu0 %4473, %v4648_v32  }
 0x4a0   : > { %v4650_v8 = vpop.eup %4649 }
 0x4a1   : > { %1855 = vperm.xlu1 %4474, %v4650_v8  }
 0x4a4   : > { %v4652_v54 = vpop.eup %4651 }
 0x4a5   : > { %1860 = vperm.xlu0 %4473, %v4652_v54  }
 0x4a8   : > { %v4654_v6 = vpop.eup %4653 }
 0x4a9   : > { %1865 = vperm.xlu1 %4474, %v4654_v6  }
 0x4dc   : > { %v4427_v9 = vpop.f32.mrf.mxu1 }
 0x4de   : > { %v2010_v37 = vpop.f32.mrf.mxu1 }
 0x4e0   : > { %v4428_v48 = vpop.f32.mrf.mxu1 }
 0x4e1   : > { %v2138_v63 = vpack.c.bf16 %v4428_v48, %v4427_v9 }
 0x4e2   : > { %v2013_v47 = vpop.f32.mrf.mxu1 }
 0x4e3   : > { %v2137_v57 = vpack.c.bf16 %v2013_v47, %v2010_v37 }
 0x4ec   : > { %v4431_v21 = vpop.f32.mrf.mxu1 }
 0x4ee   : > { %v2026_v19 = vpop.f32.mrf.mxu1 }
 0x4f0   : > { %v4432_v49 = vpop.f32.mrf.mxu1 }
 0x4f1   : > { %v2140_v4 = vpack.c.bf16 %v4432_v49, %v4431_v21 }
 0x4f2   : > { %v2029_v52 = vpop.f32.mrf.mxu1 }
 0x4f3   : > { %v2139_v12 = vpack.c.bf16 %v2029_v52, %v2026_v19 }
 0x4fc   : > { %v4435_v42 = vpop.f32.mrf.mxu1 }
 0x4fe   : > { %v2042_v32 = vpop.f32.mrf.mxu1 }
 0x500   : > { %v4436_v22 = vpop.f32.mrf.mxu1 }
 0x501   : > { %v2142_v5 = vpack.c.bf16 %v4436_v22, %v4435_v42  ;;  %v4923_v22 = vld [vmem:[%s5131_s13 + $0x64] ss:$8 sps:$4 sm:$0xff]   ;;  %v4924_v42 = vld [vmem:[%s5131_s13 + $0x60] ss:$8 sps:$4 sm:$0xff]  }
 0x502   : > { %v2045_v8 = vpop.f32.mrf.mxu1 }
 0x503   : > { %v2141_v20 = vpack.c.bf16 %v2045_v8, %v2042_v32  ;;  %v4934_v32 = vld [vmem:[%s5131_s13 + $0xb0] ss:$8 sps:$4 sm:$0xff]   ;;  %v4935_v8 = vld [vmem:[%s5131_s13 + $0xc4] ss:$8 sps:$4 sm:$0xff]  }
 0x50c   : > { %v4439_v27 = vpop.f32.mrf.mxu1 }
 0x50e   : > { %v2058_v54 = vpop.f32.mrf.mxu1 }
 0x510   : > { %v4440_v15 = vpop.f32.mrf.mxu1 }
 0x511   : > { %v2144_v1 = vpack.c.bf16 %v4440_v15, %v4439_v27  ;;  %v4921_v15 = vld [vmem:[%s5131_s13 + $0x54] ss:$8 sps:$4 sm:$0xff]   ;;  %v4922_v27 = vld [vmem:[%s5131_s13 + $0x50] ss:$8 sps:$4 sm:$0xff]  }
 0x512   : > { %v2061_v6 = vpop.f32.mrf.mxu1 }
 0x513   : > { %v2143_v11 = vpack.c.bf16 %v2061_v6, %v2058_v54  ;;  %v4936_v54 = vld [vmem:[%s5131_s13 + $0xc0] ss:$8 sps:$4 sm:$0xff]   ;;  %v4937_v6 = vld [vmem:[%s5131_s13 + $0xd4] ss:$8 sps:$4 sm:$0xff]  }
 0x51c   : > { %v4443_v44 = vpop.f32.mrf.mxu1 }
 0x51e   : > { %v2074_v43 = vpop.f32.mrf.mxu1 }
 0x520   : > { %v4444_v2 = vpop.f32.mrf.mxu1 }
 0x522   : > { %v2077_v9 = vpop.f32.mrf.mxu1 }
 0x52c   : > { %v4447_v48 = vpop.f32.mrf.mxu1 }
 0x52e   : > { %v2090_v37 = vpop.f32.mrf.mxu1 }
 0x530   : > { %v4448_v47 = vpop.f32.mrf.mxu1 }
 0x531   : > { %v2148_v25 = vpack.c.bf16 %v4448_v47, %v4447_v48  ;;  %v4938_v48 = vld [vmem:[%s5131_s13 + $0xd0] ss:$8 sps:$4 sm:$0xff]   ;;  %v4940_v47 = vld [vmem:[%s5131_s13 + $0xe0] ss:$8 sps:$4 sm:$0xff]  }
 0x532   : > { %v2093_v34 = vpop.f32.mrf.mxu1 }
 0x53c   : > { %v4451_v59 = vpop.f32.mrf.mxu1 }
 0x53e   : > { %v2106_v49 = vpop.f32.mrf.mxu1 }
 0x540   : > { %v4452_v21 = vpop.f32.mrf.mxu1 }
 0x541   : > { %v2150_v56 = vpack.c.bf16 %v4452_v21, %v4451_v59  ;;  %v4916_v59 = vld [vmem:[%s5131_s13 + $0x20] ss:$8 sps:$4 sm:$0xff]   ;;  %v4942_v21 = vld [vmem:[%s5131_s13 + $0xf0] ss:$8 sps:$4 sm:$0xff]  }
 0x542   : > { %v2109_v19 = vpop.f32.mrf.mxu1 }
 0x543   : > { %v2149_v10 = vpack.c.bf16 %v2109_v19, %v2106_v49  ;;  %v4941_v49 = vld [vmem:[%s5131_s13 + $0xf4] ss:$8 sps:$4 sm:$0xff]  }
 0x54c   : > { %v4455_v52 = vpop.f32.mrf.mxu1 }
 0x54e   : > { %v2122_v55 = vpop.f32.mrf.mxu1 }
 0x550   : > { %v4456_v41 = vpop.f32.mrf.mxu1 }
 0x551   : > { %v2152_v30 = vpack.c.bf16 %v4456_v41, %v4455_v52  ;;  %v2147_v41 = vpack.c.bf16 %v2093_v34, %v2090_v37  ;;  %v4917_v34 = vld [vmem:[%s5131_s13 + $0x34] ss:$8 sps:$4 sm:$0xff]   ;;  %v4939_v37 = vld [vmem:[%s5131_s13 + $0xe4] ss:$8 sps:$4 sm:$0xff]   ;;  %v5835_v52 = vld [vmem:[%s6598_s7] ss:$0 sm:$0xff] }
 0x552   : > { %v2125_v23 = vpop.f32.mrf.mxu1 }
 0x553   : > { %v2151_v31 = vpack.c.bf16 %v2125_v23, %v2122_v55  ;;  %4117 = vmatprep.subr.bf16.mxu1 %v2152_v30  ;;  %v4912_v23 = vld [vmem:[%s5131_s13] ss:$8 sps:$4 sm:$0xff]   ;;  %v4914_v30 = vld [vmem:[%s5131_s13 + $0x10] ss:$8 sps:$4 sm:$0xff]   ;;  %v4915_v55 = vld [vmem:[%s5131_s13 + $0x24] ss:$8 sps:$4 sm:$0xff]  }
 0x554   : > { %4118 = vmatpush3.bf16.msra.mxu1 %v2144_v1  ;;  %v4913_v1 = vld [vmem:[%s5131_s13 + $0x14] ss:$8 sps:$4 sm:$0xff]  }
 0x555   : > { %4119 = vmatprep.subr.bf16.mxu1 %v2151_v31  ;;  %v2146_v31 = vpack.c.bf16 %v4444_v2, %v4443_v44  ;;  %v4918_v2 = vld [vmem:[%s5131_s13 + $0x30] ss:$8 sps:$4 sm:$0xff]   ;;  %v4920_v44 = vld [vmem:[%s5131_s13 + $0x40] ss:$8 sps:$4 sm:$0xff]  }
 0x558   : > { %4120 = vmatpush3.bf16.msra.mxu1 %v2143_v11  ;;  %v2145_v11 = vpack.c.bf16 %v2077_v9, %v2074_v43  ;;  %v4919_v43 = vld [vmem:[%s5131_s13 + $0x44] ss:$8 sps:$4 sm:$0xff]   ;;  %v4983_v9 = vmov 1  }
 0x559   : > { %4121 = vmatprep.subr.bf16.mxu1 %v2150_v56  ;;  %v4929_v56 = vld [vmem:[%s5131_s13 + $0x94] ss:$8 sps:$4 sm:$0xff]   ;;  %4475 = vset.pattern.permute.xlu0 %v4983_v9 }
 0x55a   : > { %4476 = vset.pattern.permute.xlu1 %v4983_v9 }
 0x55c   : > { %4122 = vmatpush3.bf16.msra.mxu1 %v2142_v5  ;;  %v4928_v5 = vld [vmem:[%s5131_s13 + $0x80] ss:$8 sps:$4 sm:$0xff]  }
 0x55d   : > { %4123 = vmatprep.subr.bf16.mxu1 %v2149_v10  ;;  %v4927_v10 = vld [vmem:[%s5131_s13 + $0x84] ss:$8 sps:$4 sm:$0xff]  }
 0x560   : > { %4124 = vmatpush3.bf16.msra.mxu1 %v2141_v20  ;;  %v4926_v20 = vld [vmem:[%s5131_s13 + $0x70] ss:$8 sps:$4 sm:$0xff]  }
 0x561   : > { %4125 = vmatprep.subr.bf16.mxu1 %v2148_v25  ;;  %v4925_v25 = vld [vmem:[%s5131_s13 + $0x74] ss:$8 sps:$4 sm:$0xff]  }
 0x564   : > { %4126 = vmatpush3.bf16.msra.mxu1 %v2140_v4  ;;  %v4932_v4 = vld [vmem:[%s5131_s13 + $0xa0] ss:$8 sps:$4 sm:$0xff]  }
 0x565   : > { %4127 = vmatprep.subr.bf16.mxu1 %v2147_v41 }
 0x568   : > { %4128 = vmatpush3.bf16.msra.mxu1 %v2139_v12  ;;  %v4933_v12 = vld [vmem:[%s5131_s13 + $0xb4] ss:$8 sps:$4 sm:$0xff]  }
 0x569   : > { %4129 = vmatprep.subr.bf16.mxu1 %v2146_v31 }
 0x56c   : > { %4130 = vmatpush3.bf16.msra.mxu1 %v2138_v63  ;;  %v4930_v63 = vld [vmem:[%s5131_s13 + $0x90] ss:$8 sps:$4 sm:$0xff]  }
 0x56d   : > { %4131 = vmatprep.subr.bf16.mxu1 %v2145_v11 }
 0x570   : > { %4132 = vmatpush3.bf16.msra.mxu1 %v2137_v57  ;;  %v4931_v57 = vld [vmem:[%s5131_s13 + $0xa4] ss:$8 sps:$4 sm:$0xff]  }
 0x573   : > { %2193 = vmatmul.mubr.bf16.vlgmr.msra.gmra.mxu1 %v4912_v23 }
 0x574   : > { %2200 = vmatprep.mubr.bf16.mxu1 %v4913_v1 }
 0x57b   : > { %2201 = vmatmul.mubr.bf16.gmra.mxu1 %v4914_v30 }
 0x57c   : > { %2208 = vmatprep.mubr.bf16.mxu1 %v4915_v55 }
 0x583   : > { %2209 = vmatmul.mubr.bf16.gmra.mxu1 %v4916_v59 }
 0x584   : > { %2216 = vmatprep.mubr.bf16.mxu1 %v4917_v34 }
 0x58b   : > { %2217 = vmatmul.mubr.bf16.gmra.mxu1 %v4918_v2 }
 0x58c   : > { %2224 = vmatprep.mubr.bf16.mxu1 %v4919_v43 }
 0x593   : > { %2225 = vmatmul.mubr.bf16.gmra.mxu1 %v4920_v44 }
 0x594   : > { %2232 = vmatprep.mubr.bf16.mxu1 %v4921_v15 }
 0x59b   : > { %2233 = vmatmul.mubr.bf16.gmra.mxu1 %v4922_v27 }
 0x59c   : > { %2240 = vmatprep.mubr.bf16.mxu1 %v4923_v22 }
 0x5a3   : > { %2241 = vmatmul.mubr.bf16.gmra.mxu1 %v4924_v42 }
 0x5a4   : > { %2248 = vmatprep.mubr.bf16.mxu1 %v4925_v25 }
 0x5ab   : > { %2249 = vmatmul.mubr.bf16.gmra.mxu1 %v4926_v20 }
 0x5ac   : > { %2256 = vmatprep.mubr.bf16.mxu1 %v4927_v10 }
 0x5b3   : > { %2257 = vmatmul.mubr.bf16.gmra.mxu1 %v4928_v5 }
 0x5b4   : > { %2264 = vmatprep.mubr.bf16.mxu1 %v4929_v56 }
 0x5bb   : > { %2265 = vmatmul.mubr.bf16.gmra.mxu1 %v4930_v63 }
 0x5bc   : > { %2272 = vmatprep.mubr.bf16.mxu1 %v4931_v57 }
 0x5c3   : > { %2273 = vmatmul.mubr.bf16.gmra.mxu1 %v4932_v4 }
 0x5c4   : > { %2280 = vmatprep.mubr.bf16.mxu1 %v4933_v12 }
 0x5cb   : > { %2281 = vmatmul.mubr.bf16.gmra.mxu1 %v4934_v32 }
 0x5cc   : > { %2288 = vmatprep.mubr.bf16.mxu1 %v4935_v8 }
 0x5d3   : > { %2289 = vmatmul.mubr.bf16.gmra.mxu1 %v4936_v54 }
 0x5d4   : > { %2296 = vmatprep.mubr.bf16.mxu1 %v4937_v6 }
 0x5db   : > { %2297 = vmatmul.mubr.bf16.gmra.mxu1 %v4938_v48 }
 0x5dc   : > { %2304 = vmatprep.mubr.bf16.mxu1 %v4939_v37 }
 0x5e3   : > { %2305 = vmatmul.mubr.bf16.gmra.mxu1 %v4940_v47 }
 0x5e4   : > { %2312 = vmatprep.mubr.bf16.mxu1 %v4941_v49 }
 0x5eb   : > { %2313 = vmatmul.mubr.bf16.gmra.mxu1 %v4942_v21 }
 0x633   : > { %v4133_v19 = vpop.f32.mrf.mxu1 }
 0x635   : > { %v4134_v41 = vpop.f32.mrf.mxu1 }
 0x636   : > { %v4135_v31 = vadd.f32 %v4134_v41, %v4133_v19 }
 0x637   : > { %v4136_v11 = vpop.f32.mrf.mxu1 }
 0x638   : > { %v5838_v23 = vadd.f32 %v4135_v31, %v5835_v52 }
 0x639   : > { %v4137_v1 = vpop.f32.mrf.mxu1 }
 0x63a   : > { %v3765_v30 = vmul.f32 -1.442695, %v5838_v23  ;;  %v4138_v55 = vadd.f32 %v4137_v1, %v4136_v11 }
 0x63b   : > { %v4139_v59 = vpop.f32.mrf.mxu1 }
 0x63c   : > { %4655 = vpow2.f32 %v3765_v30  ;;  %v5842_v34 = vadd.f32 %v4138_v55, %v5835_v52 }
 0x63d   : > { %v4140_v2 = vpop.f32.mrf.mxu1 }
 0x63e   : > { %v3766_v43 = vmul.f32 -1.442695, %v5842_v34  ;;  %v4141_v44 = vadd.f32 %v4140_v2, %v4139_v59 }
 0x63f   : > { %v4142_v15 = vpop.f32.mrf.mxu1 }
 0x640   : > { %4657 = vpow2.f32 %v3766_v43  ;;  %v5846_v27 = vadd.f32 %v4141_v44, %v5835_v52 }
 0x641   : > { %v4143_v22 = vpop.f32.mrf.mxu1 }
 0x642   : > { %v3767_v42 = vmul.f32 -1.442695, %v5846_v27  ;;  %v4144_v25 = vadd.f32 %v4143_v22, %v4142_v15 }
 0x643   : > { %v4145_v20 = vpop.f32.mrf.mxu1 }
 0x644   : > { %4659 = vpow2.f32 %v3767_v42  ;;  %v5850_v10 = vadd.f32 %v4144_v25, %v5835_v52 }
 0x645   : > { %v4146_v5 = vpop.f32.mrf.mxu1 }
 0x646   : > { %v3768_v56 = vmul.f32 -1.442695, %v5850_v10  ;;  %v4147_v63 = vadd.f32 %v4146_v5, %v4145_v20 }
 0x647   : > { %v4148_v57 = vpop.f32.mrf.mxu1 }
 0x648   : > { %4661 = vpow2.f32 %v3768_v56  ;;  %v5854_v4 = vadd.f32 %v4147_v63, %v5835_v52 }
 0x649   : > { %v4656_v12 = vpop.eup %4655  ;;  %v4149_v32 = vpop.f32.mrf.mxu1 }
 0x64a   : > { %v2449_v8 = vadd.f32 1.0, %v4656_v12  ;;  %v3769_v54 = vmul.f32 -1.442695, %v5854_v4  ;;  %v4150_v6 = vadd.f32 %v4149_v32, %v4148_v57 }
 0x64b   : > { %v4151_v9 = vpop.f32.mrf.mxu1 }
 0x64c   : > { %4663 = vrcp.f32 %v2449_v8  ;;  %v5858_v48 = vadd.f32 %v4150_v6, %v5835_v52 }
 0x64d   : > { %v4658_v37 = vpop.eup %4657  ;;  %4665 = vpow2.f32 %v3769_v54  ;;  %v4152_v47 = vpop.f32.mrf.mxu1 }
 0x64e   : > { %v2450_v49 = vadd.f32 1.0, %v4658_v37  ;;  %v3770_v21 = vmul.f32 -1.442695, %v5858_v48  ;;  %v4153_v19 = vadd.f32 %v4152_v47, %v4151_v9 }
 0x64f   : > { %v4154_v41 = vpop.f32.mrf.mxu1 }
 0x650   : > { %4667 = vrcp.f32 %v2450_v49  ;;  %v5862_v31 = vadd.f32 %v4153_v19, %v5835_v52 }
 0x651   : > { %v4660_v11 = vpop.eup %4659  ;;  %4669 = vpow2.f32 %v3770_v21  ;;  %v4155_v1 = vpop.f32.mrf.mxu1 }
 0x652   : > { %v2451_v30 = vadd.f32 1.0, %v4660_v11  ;;  %v3771_v55 = vmul.f32 -1.442695, %v5862_v31  ;;  %v4156_v59 = vadd.f32 %v4155_v1, %v4154_v41 }
 0x653   : > { %v4157_v2 = vpop.f32.mrf.mxu1 }
 0x654   : > { %4671 = vrcp.f32 %v2451_v30  ;;  %v5866_v43 = vadd.f32 %v4156_v59, %v5835_v52 }
 0x655   : > { %v4662_v44 = vpop.eup %4661  ;;  %4673 = vpow2.f32 %v3771_v55  ;;  %v4158_v15 = vpop.f32.mrf.mxu1 }
 0x656   : > { %v2452_v22 = vadd.f32 1.0, %v4662_v44  ;;  %v3772_v42 = vmul.f32 -1.442695, %v5866_v43  ;;  %v4159_v25 = vadd.f32 %v4158_v15, %v4157_v2 }
 0x657   : > { %v4160_v20 = vpop.f32.mrf.mxu1 }
 0x658   : > { %4675 = vrcp.f32 %v2452_v22  ;;  %v5870_v5 = vadd.f32 %v4159_v25, %v5835_v52 }
 0x659   : > { %v4664_v56 = vpop.eup %4663  ;;  %4677 = vpow2.f32 %v3772_v42  ;;  %v4161_v63 = vpop.f32.mrf.mxu1 }
 0x65a   : > { %v4666_v57 = vpop.eup %4665  ;;  %v3773_v12 = vmul.f32 -1.442695, %v5870_v5  ;;  %v4162_v32 = vadd.f32 %v4161_v63, %v4160_v20  ;;  %2547 = vperm.xlu0 %4475, %v4664_v56  }
 0x65b   : > { %v2453_v8 = vadd.f32 1.0, %v4666_v57  ;;  %v4163_v54 = vpop.f32.mrf.mxu1 }
 0x65c   : > { %4679 = vpow2.f32 %v3773_v12  ;;  %v5874_v6 = vadd.f32 %v4162_v32, %v5835_v52 }
 0x65d   : > { %v4668_v9 = vpop.eup %4667  ;;  %4681 = vrcp.f32 %v2453_v8  ;;  %v4164_v37 = vpop.f32.mrf.mxu1 }
 0x65e   : > { %v4670_v47 = vpop.eup %4669  ;;  %v3774_v49 = vmul.f32 -1.442695, %v5874_v6  ;;  %v4165_v21 = vadd.f32 %v4164_v37, %v4163_v54  ;;  %2552 = vperm.xlu1 %4476, %v4668_v9  }
 0x65f   : > { %v2454_v19 = vadd.f32 1.0, %v4670_v47  ;;  %v4166_v41 = vpop.f32.mrf.mxu1 }
 0x660   : > { %4683 = vpow2.f32 %v3774_v49  ;;  %v5878_v11 = vadd.f32 %v4165_v21, %v5835_v52 }
 0x661   : > { %v4672_v1 = vpop.eup %4671  ;;  %4685 = vrcp.f32 %v2454_v19  ;;  %v4167_v30 = vpop.f32.mrf.mxu1 }
 0x662   : > { %v4674_v55 = vpop.eup %4673  ;;  %v3775_v59 = vmul.f32 -1.442695, %v5878_v11  ;;  %v4168_v2 = vadd.f32 %v4167_v30, %v4166_v41  ;;  %2557 = vperm.xlu1 %4476, %v4672_v1  }
 0x663   : > { %v2455_v44 = vadd.f32 1.0, %v4674_v55  ;;  %v4169_v15 = vpop.f32.mrf.mxu1 }
 0x664   : > { %4687 = vpow2.f32 %v3775_v59  ;;  %v5882_v22 = vadd.f32 %v4168_v2, %v5835_v52 }
 0x665   : > { %v4676_v42 = vpop.eup %4675  ;;  %4689 = vrcp.f32 %v2455_v44  ;;  %v4170_v25 = vpop.f32.mrf.mxu1 }
 0x666   : > { %v4678_v20 = vpop.eup %4677  ;;  %v3776_v56 = vmul.f32 -1.442695, %v5882_v22  ;;  %v4171_v63 = vadd.f32 %v4170_v25, %v4169_v15  ;;  %2562 = vperm.xlu0 %4475, %v4676_v42  }
 0x667   : > { %v2456_v57 = vadd.f32 1.0, %v4678_v20  ;;  %v4172_v12 = vpop.f32.mrf.mxu1 }
 0x668   : > { %4691 = vpow2.f32 %v3776_v56  ;;  %v5886_v32 = vadd.f32 %v4171_v63, %v5835_v52 }
 0x669   : > { %v4680_v8 = vpop.eup %4679  ;;  %4693 = vrcp.f32 %v2456_v57  ;;  %v4173_v54 = vpop.f32.mrf.mxu1 }
 0x66a   : > { %v4682_v9 = vpop.eup %4681  ;;  %v2457_v37 = vadd.f32 1.0, %v4680_v8  ;;  %v3777_v47 = vmul.f32 -1.442695, %v5886_v32  ;;  %v4174_v49 = vadd.f32 %v4173_v54, %v4172_v12 }
 0x66b   : > { %2567 = vperm.xlu1 %4476, %v4682_v9   ;;  %v4175_v21 = vpop.f32.mrf.mxu1 }
 0x66c   : > { %4695 = vrcp.f32 %v2457_v37  ;;  %v5890_v19 = vadd.f32 %v4174_v49, %v5835_v52 }
 0x66d   : > { %v4684_v41 = vpop.eup %4683  ;;  %4697 = vpow2.f32 %v3777_v47  ;;  %v4176_v1 = vpop.f32.mrf.mxu1 }
 0x66e   : > { %v4686_v30 = vpop.eup %4685  ;;  %v2458_v55 = vadd.f32 1.0, %v4684_v41  ;;  %v3778_v59 = vmul.f32 -1.442695, %v5890_v19  ;;  %v4177_v2 = vadd.f32 %v4176_v1, %v4175_v21 }
 0x66f   : > { %2572 = vperm.xlu0 %4475, %v4686_v30   ;;  %v4178_v44 = vpop.f32.mrf.mxu1 }
 0x670   : > { %4699 = vrcp.f32 %v2458_v55  ;;  %v5894_v15 = vadd.f32 %v4177_v2, %v5835_v52 }
 0x671   : > { %v4688_v42 = vpop.eup %4687  ;;  %4701 = vpow2.f32 %v3778_v59  ;;  %v4179_v25 = vpop.f32.mrf.mxu1 }
 0x672   : > { %6803 = vst [vmem:[#allocation51_spill] sm:$0xff] %v5894_v15  ;;  %v4690_v20 = vpop.eup %4689  ;;  %v2459_v56 = vadd.f32 1.0, %v4688_v42  ;;  %v3779_v63 = vmul.f32 -1.442695, %v5894_v15  ;;  %v4180_v57 = vadd.f32 %v4179_v25, %v4178_v44 }
 0x673   : > { %2577 = vperm.xlu1 %4476, %v4690_v20   ;;  %v4181_v12 = vpop.f32.mrf.mxu1 }
 0x674   : > { %4703 = vrcp.f32 %v2459_v56  ;;  %v5898_v8 = vadd.f32 %v4180_v57, %v5835_v52 }
 0x675   : > { %v4692_v54 = vpop.eup %4691  ;;  %4705 = vpow2.f32 %v3779_v63  ;;  %v4182_v9 = vpop.f32.mrf.mxu1 }
 0x676   : > { %6804 = vst [vmem:[#allocation52_spill] sm:$0xff] %v5898_v8  ;;  %v4694_v37 = vpop.eup %4693  ;;  %v2460_v47 = vadd.f32 1.0, %v4692_v54  ;;  %v3780_v49 = vmul.f32 -1.442695, %v5898_v8  ;;  %v4183_v21 = vadd.f32 %v4182_v9, %v4181_v12 }
 0x677   : > { %2582 = vperm.xlu0 %4475, %v4694_v37   ;;  %v4184_v41 = vpop.f32.mrf.mxu1 }
 0x678   : > { %4707 = vrcp.f32 %v2460_v47  ;;  %v5902_v1 = vadd.f32 %v4183_v21, %v5835_v52 }
 0x679   : > { %v4696_v30 = vpop.eup %4695  ;;  %4709 = vpow2.f32 %v3780_v49  ;;  %v4185_v55 = vpop.f32.mrf.mxu1 }
 0x67a   : > { %v4698_v59 = vpop.eup %4697  ;;  %v3781_v2 = vmul.f32 -1.442695, %v5902_v1  ;;  %v4186_v44 = vadd.f32 %v4185_v55, %v4184_v41  ;;  %2587 = vperm.xlu1 %4476, %v4696_v30  }
 0x67b   : > { %v2461_v42 = vadd.f32 1.0, %v4698_v59  ;;  %v4187_v25 = vpop.f32.mrf.mxu1 }
 0x67c   : > { %4711 = vpow2.f32 %v3781_v2  ;;  %v5906_v20 = vadd.f32 %v4186_v44, %v5835_v52 }
 0x67d   : > { %v4700_v56 = vpop.eup %4699  ;;  %4713 = vrcp.f32 %v2461_v42  ;;  %v4188_v63 = vpop.f32.mrf.mxu1 }
 0x67e   : > { %v4702_v57 = vpop.eup %4701  ;;  %v3782_v12 = vmul.f32 -1.442695, %v5906_v20  ;;  %v4189_v54 = vadd.f32 %v4188_v63, %v4187_v25  ;;  %2592 = vperm.xlu0 %4475, %v4700_v56  }
 0x67f   : > { %v2462_v9 = vadd.f32 1.0, %v4702_v57  ;;  %v4190_v37 = vpop.f32.mrf.mxu1 }
 0x680   : > { %4715 = vpow2.f32 %v3782_v12  ;;  %v5910_v47 = vadd.f32 %v4189_v54, %v5835_v52 }
 0x681   : > { %v4704_v49 = vpop.eup %4703  ;;  %4717 = vrcp.f32 %v2462_v9  ;;  %v4191_v21 = vpop.f32.mrf.mxu1 }
 0x682   : > { %v4706_v41 = vpop.eup %4705  ;;  %v3783_v30 = vmul.f32 -1.442695, %v5910_v47  ;;  %v4192_v55 = vadd.f32 %v4191_v21, %v4190_v37  ;;  %2597 = vperm.xlu1 %4476, %v4704_v49  }
 0x683   : > { %v2463_v59 = vadd.f32 1.0, %v4706_v41  ;;  %v4193_v2 = vpop.f32.mrf.mxu1 }
 0x684   : > { %4719 = vpow2.f32 %v3783_v30  ;;  %v5914_v44 = vadd.f32 %v4192_v55, %v5835_v52 }
 0x685   : > { %v4708_v42 = vpop.eup %4707  ;;  %4721 = vrcp.f32 %v2463_v59  ;;  %v4194_v25 = vpop.f32.mrf.mxu1 }
 0x686   : > { %v4710_v56 = vpop.eup %4709  ;;  %v3784_v63 = vmul.f32 -1.442695, %v5914_v44  ;;  %v4195_v57 = vadd.f32 %v4194_v25, %v4193_v2  ;;  %2602 = vperm.xlu0 %4475, %v4708_v42  }
 0x687   : > { %v2464_v12 = vadd.f32 1.0, %v4710_v56  ;;  %v4196_v54 = vpop.f32.mrf.mxu1 }
 0x688   : > { %4723 = vpow2.f32 %v3784_v63  ;;  %v5918_v9 = vadd.f32 %v4195_v57, %v5835_v52 }
 0x689   : > { %v4712_v37 = vpop.eup %4711  ;;  %4725 = vrcp.f32 %v2464_v12  ;;  %v4197_v49 = vpop.f32.mrf.mxu1 }
 0x68a   : > { %6805 = vst [vmem:[#allocation53_spill] sm:$0xff] %v5918_v9  ;;  %v4714_v21 = vpop.eup %4713  ;;  %v2465_v41 = vadd.f32 1.0, %v4712_v37  ;;  %v3785_v30 = vmul.f32 -1.442695, %v5918_v9  ;;  %v4198_v55 = vadd.f32 %v4197_v49, %v4196_v54 }
 0x68b   : > { %2607 = vperm.xlu1 %4476, %v4714_v21   ;;  %v4199_v59 = vpop.f32.mrf.mxu1 }
 0x68c   : > { %4727 = vrcp.f32 %v2465_v41  ;;  %v5922_v2 = vadd.f32 %v4198_v55, %v5835_v52 }
 0x68d   : > { %v4716_v42 = vpop.eup %4715  ;;  %4729 = vpow2.f32 %v3785_v30  ;;  %v4200_v25 = vpop.f32.mrf.mxu1 }
 0x68e   : > { %6806 = vst [vmem:[#allocation54_spill] sm:$0xff] %v5922_v2  ;;  %v4718_v56 = vpop.eup %4717  ;;  %v2466_v63 = vadd.f32 1.0, %v4716_v42  ;;  %v3786_v57 = vmul.f32 -1.442695, %v5922_v2  ;;  %v4201_v12 = vadd.f32 %v4200_v25, %v4199_v59  ;;  %v5929_v42 = vpop.permute.xlu0 %1710 }
 0x68f   : > { %2612 = vperm.xlu0 %4475, %v4718_v56   ;;  %v4202_v18 = vpop.f32.mrf.mxu1  ;;  %6808 = vst [vmem:[#allocation56_spill] sm:$0xff] %v5929_v42 }
 0x690   : > { %4731 = vrcp.f32 %v2466_v63  ;;  %v5926_v37 = vadd.f32 %v4201_v12, %v5835_v52 }
 0x691   : > { %v4720_v54 = vpop.eup %4719  ;;  %4733 = vpow2.f32 %v3786_v57  ;;  %v4203_v49 = vpop.f32.mrf.mxu1 }
 0x692   : > { %6807 = vst [vmem:[#allocation55_spill] sm:$0xff] %v5926_v37  ;;  %v4722_v21 = vpop.eup %4721  ;;  %v2467_v41 = vadd.f32 1.0, %v4720_v54  ;;  %v3787_v55 = vmul.f32 -1.442695, %v5926_v37  ;;  %v4204_v30 = vadd.f32 %v4203_v49, %v4202_v18  ;;  %v5935_v54 = vpop.permute.xlu1 %1720 }
 0x693   : > { %2617 = vperm.xlu1 %4476, %v4722_v21   ;;  %v4205_v28 = vpop.f32.mrf.mxu1  ;;  %6810 = vst [vmem:[#allocation58_spill] sm:$0xff] %v5935_v54  ;;  %v5940_v42 = vpop.permute.xlu0 %1715 }
 0x694   : > { %4735 = vrcp.f32 %v2467_v41  ;;  %v5932_v59 = vadd.f32 %v4204_v30, %v5835_v52  ;;  %6812 = vst [vmem:[#allocation60_spill] sm:$0xff] %v5940_v42 }
 0x695   : > { %v4724_v25 = vpop.eup %4723  ;;  %4737 = vpow2.f32 %v3787_v55  ;;  %v4206_v56 = vpop.f32.mrf.mxu1 }
 0x696   : > { %6809 = vst [vmem:[#allocation57_spill] sm:$0xff] %v5932_v59  ;;  %v4726_v63 = vpop.eup %4725  ;;  %v2468_v12 = vadd.f32 1.0, %v4724_v25  ;;  %v3788_v57 = vmul.f32 -1.442695, %v5932_v59  ;;  %v4207_v60 = vadd.f32 %v4206_v56, %v4205_v28 }
 0x697   : > { %2622 = vperm.xlu0 %4475, %v4726_v63   ;;  %v4208_v18 = vpop.f32.mrf.mxu1  ;;  %v5948_v54 = vpop.permute.xlu0 %1730 }
 0x698   : > { %4739 = vrcp.f32 %v2468_v12  ;;  %v5938_v49 = vadd.f32 %v4207_v60, %v5835_v52  ;;  %v5946_v12 = vpop.permute.xlu1 %1725  ;;  %6815 = vst [vmem:[#allocation63_spill] sm:$0xff] %v5948_v54 }
 0x699   : > { %v4728_v21 = vpop.eup %4727  ;;  %4741 = vpow2.f32 %v3788_v57  ;;  %v4209_v41 = vpop.f32.mrf.mxu1  ;;  %6814 = vst [vmem:[#allocation62_spill] sm:$0xff] %v5946_v12 }
 0x69a   : > { %6811 = vst [vmem:[#allocation59_spill] sm:$0xff] %v5938_v49  ;;  %v4730_v30 = vpop.eup %4729  ;;  %v3789_v55 = vmul.f32 -1.442695, %v5938_v49  ;;  %v4210_v25 = vadd.f32 %v4209_v41, %v4208_v18  ;;  %2627 = vperm.xlu1 %4476, %v4728_v21  }
 0x69b   : > { %v2469_v40 = vadd.f32 1.0, %v4730_v30  ;;  %v4211_v28 = vpop.f32.mrf.mxu1  ;;  %v5956_v12 = vpop.permute.xlu0 %1740 }
 0x69c   : > { %4743 = vpow2.f32 %v3789_v55  ;;  %v5944_v56 = vadd.f32 %v4210_v25, %v5835_v52  ;;  %v5954_v55 = vpop.permute.xlu1 %1735  ;;  %6818 = vst [vmem:[#allocation66_spill] sm:$0xff] %v5956_v12 }
 0x69d   : > { %v4732_v63 = vpop.eup %4731  ;;  %4745 = vrcp.f32 %v2469_v40  ;;  %v4212_v60 = vpop.f32.mrf.mxu1  ;;  %6817 = vst [vmem:[#allocation65_spill] sm:$0xff] %v5954_v55 }
 0x69e   : > { %6813 = vst [vmem:[#allocation61_spill] sm:$0xff] %v5944_v56  ;;  %v4734_v57 = vpop.eup %4733  ;;  %v3790_v42 = vmul.f32 -1.442695, %v5944_v56  ;;  %v4213_v58 = vadd.f32 %v4212_v60, %v4211_v28  ;;  %2632 = vperm.xlu0 %4475, %v4732_v63  }
 0x69f   : > { %v2470_v18 = vadd.f32 1.0, %v4734_v57  ;;  %v4214_v21 = vpop.f32.mrf.mxu1  ;;  %v5964_v55 = vpop.permute.xlu0 %1750 }
 0x6a0   : > { %4747 = vpow2.f32 %v3790_v42  ;;  %v5952_v41 = vadd.f32 %v4213_v58, %v5835_v52  ;;  %v5962_v60 = vpop.permute.xlu1 %1745  ;;  %6821 = vst [vmem:[#allocation69_spill] sm:$0xff] %v5964_v55 }
 0x6a1   : > { %v4736_v30 = vpop.eup %4735  ;;  %4749 = vrcp.f32 %v2470_v18  ;;  %v4215_v25 = vpop.f32.mrf.mxu1  ;;  %6820 = vst [vmem:[#allocation68_spill] sm:$0xff] %v5962_v60 }
 0x6a2   : > { %6816 = vst [vmem:[#allocation64_spill] sm:$0xff] %v5952_v41  ;;  %v4738_v40 = vpop.eup %4737  ;;  %v3791_v54 = vmul.f32 -1.442695, %v5952_v41  ;;  %v4216_v3 = vadd.f32 %v4215_v25, %v4214_v21  ;;  %2637 = vperm.xlu1 %4476, %v4736_v30  }
 0x6a3   : > { %v2471_v28 = vadd.f32 1.0, %v4738_v40  ;;  %v4217_v63 = vpop.f32.mrf.mxu1  ;;  %v5972_v60 = vpop.permute.xlu0 %1760 }
 0x6a4   : > { %4751 = vpow2.f32 %v3791_v54  ;;  %v5960_v42 = vadd.f32 %v4216_v3, %v5835_v52  ;;  %v5970_v25 = vpop.permute.xlu1 %1755  ;;  %6824 = vst [vmem:[#allocation72_spill] sm:$0xff] %v5972_v60 }
 0x6a5   : > { %v4740_v58 = vpop.eup %4739  ;;  %4753 = vrcp.f32 %v2471_v28  ;;  %v4218_v57 = vpop.f32.mrf.mxu1  ;;  %6823 = vst [vmem:[#allocation71_spill] sm:$0xff] %v5970_v25 }
 0x6a6   : > { %6819 = vst [vmem:[#allocation67_spill] sm:$0xff] %v5960_v42  ;;  %v4742_v18 = vpop.eup %4741  ;;  %v3792_v12 = vmul.f32 -1.442695, %v5960_v42  ;;  %v4219_v17 = vadd.f32 %v4218_v57, %v4217_v63  ;;  %2642 = vperm.xlu0 %4475, %v4740_v58  }
 0x6a7   : > { %v2472_v21 = vadd.f32 1.0, %v4742_v18  ;;  %v4220_v30 = vpop.f32.mrf.mxu1 }
 0x6a8   : > { %4755 = vpow2.f32 %v3792_v12  ;;  %v5968_v54 = vadd.f32 %v4219_v17, %v5835_v52  ;;  %v5978_v58 = vpop.permute.xlu1 %1765 }
 0x6a9   : > { %v4744_v3 = vpop.eup %4743  ;;  %4757 = vrcp.f32 %v2472_v21  ;;  %v4221_v40 = vpop.f32.mrf.mxu1  ;;  %6826 = vst [vmem:[#allocation74_spill] sm:$0xff] %v5978_v58 }
 0x6aa   : > { %6822 = vst [vmem:[#allocation70_spill] sm:$0xff] %v5968_v54  ;;  %v4746_v28 = vpop.eup %4745  ;;  %v2473_v46 = vadd.f32 1.0, %v4744_v3  ;;  %v3793_v55 = vmul.f32 -1.442695, %v5968_v54  ;;  %v4222_v35 = vadd.f32 %v4221_v40, %v4220_v30  ;;  %v5980_v21 = vpop.permute.xlu0 %1770 }
 0x6ab   : > { %2647 = vperm.xlu1 %4476, %v4746_v28   ;;  %v4223_v63 = vpop.f32.mrf.mxu1  ;;  %6827 = vst [vmem:[#allocation75_spill] sm:$0xff] %v5980_v21 }
 0x6ac   : > { %4759 = vrcp.f32 %v2473_v46  ;;  %v5976_v12 = vadd.f32 %v4222_v35, %v5835_v52  ;;  %v5986_v40 = vpop.permute.xlu1 %1775 }
 0x6ad   : > { %v4748_v17 = vpop.eup %4747  ;;  %4761 = vpow2.f32 %v3793_v55  ;;  %v4224_v57 = vpop.f32.mrf.mxu1  ;;  %6829 = vst [vmem:[#allocation77_spill] sm:$0xff] %v5986_v40  ;;  %v5999_v40 = vld [vmem:[#allocation2] ss:$0 sm:$0xff] }
 0x6ae   : > { %6825 = vst [vmem:[#allocation73_spill] sm:$0xff] %v5976_v12  ;;  %v4750_v18 = vpop.eup %4749  ;;  %v2474_v25 = vadd.f32 1.0, %v4748_v17  ;;  %v3794_v3 = vmul.f32 -1.442695, %v5976_v12  ;;  %v4225_v60 = vadd.f32 %v4224_v57, %v4223_v63  ;;  %v5988_v58 = vpop.permute.xlu0 %1780  ;;  %v6722_v63 = vmax.f32 %v5898_v8, 0.0 }
 0x6af   : > { %2652 = vperm.xlu0 %4475, %v4750_v18   ;;  %v4226_v30 = vpop.f32.mrf.mxu1 }
 0x6b0   : > { %4763 = vrcp.f32 %v2474_v25  ;;  %v5984_v46 = vadd.f32 %v4225_v60, %v5835_v52 }
 0x6b1   : > { %v4752_v35 = vpop.eup %4751  ;;  %4765 = vpow2.f32 %v3794_v3  ;;  %v4227_v28 = vpop.f32.mrf.mxu1 }
 0x6b2   : > { %6828 = vst [vmem:[#allocation76_spill] sm:$0xff] %v5984_v46  ;;  %v4754_v55 = vpop.eup %4753  ;;  %v2475_v14 = vadd.f32 1.0, %v4752_v35  ;;  %v3795_v17 = vmul.f32 -1.442695, %v5984_v46  ;;  %v4228_v21 = vadd.f32 %v4227_v28, %v4226_v30  ;;  %v5997_v3 = vpop.permute.xlu1 %1785  ;;  %v6834_v35 = vmax.f32 %v5976_v12, 0.0 }
 0x6b3   : > { %2657 = vperm.xlu1 %4476, %v4754_v55   ;;  %6831 = vst [vmem:[#allocation79_spill] sm:$0xff] %v5997_v3  ;;  %v6002_v28 = vpop.permute.xlu0 %1790  ;;  %v6841_v12 = vmax.f32 %v5886_v32, 0.0 }
 0x6b4   : > { %4767 = vrcp.f32 %v2475_v14  ;;  %v5995_v57 = vadd.f32 %v4228_v21, %v5835_v52  ;;  %6832 = vst [vmem:[#allocation80_spill] sm:$0xff] %v6002_v28  ;;  %v2759_v21 = vmul.f32 %v5999_v40, %v6722_v63  ;;  %v2773_v52 = vmul.f32 %v5999_v40, %v6834_v35 }
 0x6b5   : > { %v4756_v18 = vpop.eup %4755  ;;  %4769 = vpow2.f32 %v3795_v17  ;;  %v6833_v17 = vmax.f32 %v5984_v46, 0.0  ;;  %v6838_v46 = vmax.f32 %v5968_v54, 0.0  ;;  %v6839_v63 = vmax.f32 %v5890_v19, 0.0 }
 0x6b6   : > { %6830 = vst [vmem:[#allocation78_spill] sm:$0xff] %v5995_v57  ;;  %v4758_v30 = vpop.eup %4757  ;;  %v2476_v55 = vadd.f32 1.0, %v4756_v18  ;;  %v6724_v25 = vmax.f32 %v5995_v57, 0.0  ;;  %v3796_v60 = vmul.f32 -1.442695, %v5995_v57  ;;  %v6021_v8 = vpop.permute.xlu1 %1795  ;;  %v6840_v57 = vmax.f32 %v5960_v42, 0.0 }
 0x6b7   : > { %2662 = vperm.xlu0 %4475, %v4758_v30   ;;  %v2774_v18 = vmul.f32 %v5999_v40, %v6833_v17  ;;  %6835 = vst [vmem:[#allocation81_spill] sm:$0xff] %v6021_v8  ;;  %v6836_v30 = vmax.f32 %v5894_v15, 0.0  ;;  %v6027_v17 = vpop.permute.xlu0 %1800  ;;  %v2772_v35 = vmul.f32 %v5999_v40, %v6838_v46  ;;  %v2757_v15 = vmul.f32 %v5999_v40, %v6839_v63 }
 0x6b8   : > { %4771 = vrcp.f32 %v2476_v55  ;;  %v2775_v14 = vmul.f32 %v5999_v40, %v6724_v25  ;;  %6837 = vst [vmem:[#allocation82_spill] sm:$0xff] %v6027_v17  ;;  %v2756_v54 = vmul.f32 %v5999_v40, %v6841_v12 }
 0x6b9   : > { %v4760_v28 = vpop.eup %4759  ;;  %v2758_v55 = vmul.f32 %v5999_v40, %v6836_v30  ;;  %4773 = vpow2.f32 %v3796_v60  ;;  %v6730_v60 = vmax.f32 %v5944_v56, 0.0  ;;  %v2790_v17 = vpack.c.bf16 %v2773_v52, %v2772_v35 }
 0x6ba   : > { %v4762_v3 = vpop.eup %4761  ;;  %2667 = vperm.xlu1 %4476, %v4760_v28   ;;  %v2791_v25 = vpack.c.bf16 %v2775_v14, %v2774_v18  ;;  %v2771_v28 = vmul.f32 %v5999_v40, %v6840_v57  ;;  %v6041_v18 = vpop.permute.xlu1 %1805  ;;  %v6842_v57 = vmax.f32 %v5952_v41, 0.0  ;;  %v6847_v41 = vmax.f32 %v5932_v59, 0.0 }
 0x6bb   : > { %v2477_v8 = vadd.f32 1.0, %v4762_v3  ;;  %v2783_v30 = vpack.c.bf16 %v2759_v21, %v2758_v55  ;;  %v6047_v3 = vpop.permute.xlu0 %1810  ;;  %v6843_v55 = vmax.f32 %v5882_v22, 0.0  ;;  %v6844_v21 = vmax.f32 %v5878_v11, 0.0 }
 0x6bc   : > { %4229 = vmatprep.subr.bf16.mxu0 %v2791_v25  ;;  %v2770_v52 = vmul.f32 %v5999_v40, %v6842_v57 }
 0x6bd   : > { %v4764_v14 = vpop.eup %4763  ;;  %4775 = vrcp.f32 %v2477_v8  ;;  %4230 = vmatpush3.bf16.msra.mxu0 %v2783_v30  ;;  %v2755_v35 = vmul.f32 %v5999_v40, %v6843_v55  ;;  %v2782_v8 = vpack.c.bf16 %v2757_v15, %v2756_v54  ;;  %v2754_v42 = vmul.f32 %v5999_v40, %v6844_v21 }
 0x6be   : > { %v4766_v63 = vpop.eup %4765  ;;  %4231 = vmatprep.subr.bf16.mxu0 %v2790_v17  ;;  %2672 = vperm.xlu0 %4475, %v4764_v14   ;;  %v2789_v46 = vpack.c.bf16 %v2771_v28, %v2770_v52  ;;  %v2769_v17 = vmul.f32 %v5999_v40, %v6730_v60  ;;  %v6061_v25 = vpop.permute.xlu1 %1815  ;;  %v6845_v28 = vmax.f32 %v5938_v49, 0.0  ;;  %v6846_v60 = vmax.f32 %v5874_v6, 0.0 }
 0x6bf   : > { %v2478_v12 = vadd.f32 1.0, %v4766_v63  ;;  %v6067_v15 = vpop.permute.xlu0 %1820  ;;  %v6848_v55 = vmax.f32 %v5870_v5, 0.0  ;;  %v6851_v49 = vmax.f32 %v5922_v2, 0.0 }
 0x6c0   : > { %v2768_v52 = vmul.f32 %v5999_v40, %v6845_v28  ;;  %v2753_v57 = vmul.f32 %v5999_v40, %v6846_v60 }
 0x6c1   : > { %v4768_v14 = vpop.eup %4767  ;;  %4777 = vrcp.f32 %v2478_v12  ;;  %4232 = vmatpush3.bf16.msra.mxu0 %v2782_v8  ;;  %v2781_v12 = vpack.c.bf16 %v2755_v35, %v2754_v42  ;;  %v2752_v56 = vmul.f32 %v5999_v40, %v6848_v55 }
 0x6c2   : > { %v4770_v63 = vpop.eup %4769  ;;  %4233 = vmatprep.subr.bf16.mxu0 %v2789_v46  ;;  %2677 = vperm.xlu1 %4476, %v4768_v14   ;;  %v2788_v30 = vpack.c.bf16 %v2769_v17, %v2768_v52  ;;  %v2767_v46 = vmul.f32 %v5999_v40, %v6847_v41  ;;  %v6081_v54 = vpop.permute.xlu1 %1825  ;;  %v6849_v41 = vmax.f32 %v5926_v37, 0.0  ;;  %v6850_v52 = vmax.f32 %v5866_v43, 0.0 }
 0x6c3   : > { %v2479_v21 = vadd.f32 1.0, %v4770_v63  ;;  %v6087_v42 = vpop.permute.xlu0 %1830 }
 0x6c4   : > { %v2766_v17 = vmul.f32 %v5999_v40, %v6849_v41  ;;  %v2751_v28 = vmul.f32 %v5999_v40, %v6850_v52  ;;  %v6852_v41 = vmax.f32 %v5862_v31, 0.0 }
 0x6c5   : > { %v4772_v14 = vpop.eup %4771  ;;  %4779 = vrcp.f32 %v2479_v21  ;;  %4234 = vmatpush3.bf16.msra.mxu0 %v2781_v12  ;;  %v2780_v21 = vpack.c.bf16 %v2753_v57, %v2752_v56  ;;  %v6736_v12 = vmax.f32 %v5914_v44, 0.0  ;;  %v6853_v57 = vmax.f32 %v5918_v9, 0.0 }
 0x6c6   : > { %v4774_v60 = vpop.eup %4773  ;;  %4235 = vmatprep.subr.bf16.mxu0 %v2788_v30  ;;  %2682 = vperm.xlu0 %4475, %v4772_v14   ;;  %v2787_v8 = vpack.c.bf16 %v2767_v46, %v2766_v17  ;;  %v2765_v30 = vmul.f32 %v5999_v40, %v6851_v49  ;;  %v6101_v14 = vpop.permute.xlu1 %1835  ;;  %v2750_v63 = vmul.f32 %v5999_v40, %v6852_v41  ;;  %v6854_v17 = vmax.f32 %v5858_v48, 0.0 }
 0x6c7   : > { %v2480_v55 = vadd.f32 1.0, %v4774_v60  ;;  %v6107_v60 = vpop.permute.xlu0 %1840  ;;  %v2764_v49 = vmul.f32 %v5999_v40, %v6853_v57  ;;  %v2763_v56 = vmul.f32 %v5999_v40, %v6736_v12  ;;  %v6855_v57 = vmax.f32 %v5854_v4, 0.0 }
 0x6c8   : > { %v2749_v35 = vmul.f32 %v5999_v40, %v6854_v17  ;;  %v2779_v41 = vpack.c.bf16 %v2751_v28, %v2750_v63  ;;  %v6856_v63 = vmax.f32 %v5910_v47, 0.0  ;;  %v6858_v28 = vmax.f32 %v5846_v27, 0.0 }
 0x6c9   : > { %4781 = vrcp.f32 %v2480_v55  ;;  %4236 = vmatpush3.bf16.msra.mxu0 %v2780_v21  ;;  %v6739_v55 = vmax.f32 %v5906_v20, 0.0  ;;  %v2786_v21 = vpack.c.bf16 %v2765_v30, %v2764_v49  ;;  %v2748_v46 = vmul.f32 %v5999_v40, %v6855_v57 }
 0x6ca   : > { %v4776_v52 = vpop.eup %4775  ;;  %4237 = vmatprep.subr.bf16.mxu0 %v2787_v8  ;;  %v6121_v8 = vpop.permute.xlu1 %1845  ;;  %v2762_v30 = vmul.f32 %v5999_v40, %v6856_v63  ;;  %v6857_v49 = vmax.f32 %v5850_v10, 0.0  ;;  %v2746_v63 = vmul.f32 %v5999_v40, %v6858_v28 }
 0x6cb   : > { %2687 = vperm.xlu1 %4476, %v4776_v52   ;;  %v6127_v17 = vpop.permute.xlu0 %1850  ;;  %v2778_v59 = vpack.c.bf16 %v2749_v35, %v2748_v46 }
 0x6cc   : > { %v2747_v12 = vmul.f32 %v5999_v40, %v6857_v49  ;;  %v2785_v57 = vpack.c.bf16 %v2763_v56, %v2762_v30  ;;  %v6861_v56 = vmax.f32 %v5842_v34, 0.0 }
 0x6cd   : > { %4238 = vmatpush3.bf16.msra.mxu0 %v2779_v41  ;;  %v2761_v41 = vmul.f32 %v5999_v40, %v6739_v55 }
 0x6ce   : > { %v4778_v37 = vpop.eup %4777  ;;  %4239 = vmatprep.subr.bf16.mxu0 %v2786_v21  ;;  %v6140_v2 = vpop.permute.xlu1 %1855  ;;  %v2321_v21 = vmax.f32 %v5838_v23, 0.0  ;;  %v2745_v46 = vmul.f32 %v5999_v40, %v6861_v56  ;;  %v2777_v30 = vpack.c.bf16 %v2747_v12, %v2746_v63  ;;  %v6863_v12 = vmax.f32 %v5565_v61, 0.0 }
 0x6cf   : > { %2692 = vperm.xlu0 %4475, %v4778_v37   ;;  %v6146_v9 = vpop.permute.xlu0 %1860  ;;  %v6860_v37 = vmax.f32 %v5902_v1, 0.0 }
 0x6d0   : > { %6859 = vst [vmem:[#allocation83_spill] sm:$0xff] %v6146_v9  ;;  %v6862_v9 = vmax.f32 %v5561_v16, 0.0  ;;  %v6864_v16 = vmax.f32 %v5571_v62, 0.0 }
 0x6d1   : > { %4240 = vmatpush3.bf16.msra.mxu0 %v2778_v59  ;;  %v2760_v35 = vmul.f32 %v5999_v40, %v6860_v37  ;;  %v2744_v59 = vmul.f32 %v5999_v40, %v2321_v21  ;;  %v4943_v40 = vld [vmem:[%s5131_s13] ss:$8 sps:$4 sm:$0xff]  }
 0x6d2   : > { %v4780_v52 = vpop.eup %4779  ;;  %4241 = vmatprep.subr.bf16.mxu0 %v2785_v57  ;;  %v6154_v55 = vpop.permute.xlu1 %1865 }
 0x6d3   : > { %2697 = vperm.xlu1 %4476, %v4780_v52   ;;  %v2784_v49 = vpack.c.bf16 %v2761_v41, %v2760_v35  ;;  %v2776_v37 = vpack.c.bf16 %v2745_v46, %v2744_v59  ;;  %v4944_v35 = vld [vmem:[%s5131_s13 + $0x14] ss:$8 sps:$4 sm:$0xff]   ;;  %v6865_v46 = vmax.f32 %v5580_v26, 0.0  ;;  %v4946_v59 = vld [vmem:[%s5131_s13 + $0x24] ss:$8 sps:$4 sm:$0xff]  }
 0x6d4   : > { %v4947_v26 = vld [vmem:[%s5131_s13 + $0x20] ss:$8 sps:$4 sm:$0xff]  }
 0x6d5   : > { %4242 = vmatpush3.bf16.msra.mxu0 %v2777_v30  ;;  %v2548_v57 = vpop.permute.xlu0 %2547 }
 0x6d6   : > { %v4782_v28 = vpop.eup %4781  ;;  %4243 = vmatprep.subr.bf16.mxu0 %v2784_v49  ;;  %v2705_v56 = vmul.f32 %v2548_v57, %v6862_v9  ;;  %v4945_v49 = vld [vmem:[%s5131_s13 + $0x10] ss:$8 sps:$4 sm:$0xff]   ;;  %v6866_v57 = vmax.f32 %v5590_v29, 0.0 }
 0x6d7   : > { %2702 = vperm.xlu0 %4475, %v4782_v28  }
 0x6d9   : > { %v2553_v52 = vpop.permute.xlu1 %2552  ;;  %4244 = vmatpush3.bf16.msra.mxu0 %v2776_v37 }
 0x6da   : > { %v2706_v41 = vmul.f32 %v2553_v52, %v6863_v12  ;;  %v4948_v12 = vld [vmem:[%s5131_s13 + $0x34] ss:$8 sps:$4 sm:$0xff]  }
 0x6db   : > { %3376 = vrot.lane.b32.xlu0 %v2705_v56, %s4984_s14  ;;  %v6867_v56 = vmax.f32 %v5595_v24, 0.0 }
 0x6dc   : > { %3378 = vrot.lane.b32.xlu1 %v2706_v41, %s4984_s14  ;;  %2832 = vmatmul.mubr.bf16.vlgmr.msra.gmra.mxu0 %v4943_v40  ;;  %v6868_v40 = vmax.f32 %v5601_v45, 0.0 }
 0x6dd   : > { %v2558_v63 = vpop.permute.xlu1 %2557  ;;  %2839 = vmatprep.mubr.bf16.mxu0 %v4944_v35  ;;  %v6869_v35 = vmax.f32 %v5610_v53, 0.0 }
 0x6de   : > { %v2707_v9 = vmul.f32 %v2558_v63, %v6864_v16  ;;  %v4949_v16 = vld [vmem:[%s5131_s13 + $0x30] ss:$8 sps:$4 sm:$0xff]  }
 0x6e0   : > { %3380 = vrot.lane.b32.xlu0 %v2707_v9, %s4984_s14 }
 0x6e1   : > { %v2563_v61 = vpop.permute.xlu0 %2562 }
 0x6e2   : > { %v2708_v30 = vmul.f32 %v2563_v61, %v6865_v46  ;;  %v4950_v61 = vld [vmem:[%s5131_s13 + $0x44] ss:$8 sps:$4 sm:$0xff]   ;;  %v6870_v46 = vmax.f32 %v5616_v7, 0.0 }
 0x6e4   : > { %3382 = vrot.lane.b32.xlu1 %v2708_v30, %s4984_s14  ;;  %2840 = vmatmul.mubr.bf16.gmra.mxu0 %v4945_v49  ;;  %v6871_v49 = vmax.f32 %v5625_v36, 0.0  ;;  %v4953_v36 = vld [vmem:[%s5131_s13 + $0x50] ss:$8 sps:$4 sm:$0xff]  }
 0x6e5   : > { %2847 = vmatprep.mubr.bf16.mxu0 %v4946_v59  ;;  %v4951_v59 = vld [vmem:[%s5131_s13 + $0x40] ss:$8 sps:$4 sm:$0xff]  }
 0x6e6   : > { %v2568_v28 = vpop.permute.xlu1 %2567 }
 0x6e7   : > { %v2709_v37 = vmul.f32 %v2568_v28, %v6866_v57  ;;  %v4952_v57 = vld [vmem:[%s5131_s13 + $0x54] ss:$8 sps:$4 sm:$0xff]  }
 0x6e9   : > { %3384 = vrot.lane.b32.xlu0 %v2709_v37, %s4984_s14  ;;  %v6872_v37 = vmax.f32 %v5635_v0, 0.0 }
 0x6ea   : > { %v2573_v62 = vpop.permute.xlu0 %2572 }
 0x6eb   : > { %v2710_v52 = vmul.f32 %v2573_v62, %v6867_v56  ;;  %v6873_v56 = vmax.f32 %v5640_v38, 0.0  ;;  %v4955_v38 = vld [vmem:[%s5131_s13 + $0x60] ss:$8 sps:$4 sm:$0xff]  }
 0x6ec   : > { %2848 = vmatmul.mubr.bf16.gmra.mxu0 %v4947_v26  ;;  %v4954_v26 = vld [vmem:[%s5131_s13 + $0x64] ss:$8 sps:$4 sm:$0xff]  }
 0x6ed   : > { %3386 = vrot.lane.b32.xlu1 %v2710_v52, %s4984_s14  ;;  %2855 = vmatprep.mubr.bf16.mxu0 %v4948_v12 }
 0x6ee   : > { %v2578_v41 = vpop.permute.xlu1 %2577 }
 0x6ef   : > { %v2711_v63 = vmul.f32 %v2578_v41, %v6868_v40  ;;  %v6874_v41 = vmax.f32 %v5650_v51, 0.0 }
 0x6f1   : > { %3388 = vrot.lane.b32.xlu0 %v2711_v63, %s4984_s14  ;;  %v6875_v63 = vmax.f32 %v5655_v13, 0.0 }
 0x6f2   : > { %v2583_v29 = vpop.permute.xlu0 %2582 }
 0x6f3   : > { %v2712_v24 = vmul.f32 %v2583_v29, %v6869_v35  ;;  %v4956_v35 = vld [vmem:[%s5131_s13 + $0x74] ss:$8 sps:$4 sm:$0xff]  }
 0x6f4   : > { %2856 = vmatmul.mubr.bf16.gmra.mxu0 %v4949_v16  ;;  %v6876_v16 = vmax.f32 %v5665_v39, 0.0 }
 0x6f5   : > { %3390 = vrot.lane.b32.xlu1 %v2712_v24, %s4984_s14  ;;  %v2588_v9 = vpop.permute.xlu1 %2587  ;;  %2863 = vmatprep.mubr.bf16.mxu0 %v4950_v61  ;;  %v6877_v61 = vmax.f32 %v5670_v33, 0.0 }
 0x6f6   : > { %v2713_v45 = vmul.f32 %v2588_v9, %v6870_v46  ;;  %v4957_v46 = vld [vmem:[%s5131_s13 + $0x70] ss:$8 sps:$4 sm:$0xff]  }
 0x6f8   : > { %3392 = vrot.lane.b32.xlu0 %v2713_v45, %s4984_s14 }
 0x6f9   : > { %v2593_v30 = vpop.permute.xlu0 %2592 }
 0x6fa   : > { %v2714_v53 = vmul.f32 %v2593_v30, %v6871_v49  ;;  %v4958_v30 = vld [vmem:[%s5131_s13 + $0x84] ss:$8 sps:$4 sm:$0xff]   ;;  %v6878_v49 = vmax.f32 %v5680_v50, 0.0 }
 0x6fc   : > { %3394 = vrot.lane.b32.xlu1 %v2714_v53, %s4984_s14  ;;  %2864 = vmatmul.mubr.bf16.gmra.mxu0 %v4951_v59  ;;  %v6879_v59 = vld [vmem:[#allocation5_spill] sm:$0xff] }
 0x6fd   : > { %v2598_v28 = vpop.permute.xlu1 %2597  ;;  %2871 = vmatprep.mubr.bf16.mxu0 %v4952_v57  ;;  %v4959_v57 = vld [vmem:[%s5131_s13 + $0x80] ss:$8 sps:$4 sm:$0xff]  }
 0x6fe   : > { %v2715_v7 = vmul.f32 %v2598_v28, %v6872_v37  ;;  %v6880_v28 = vmax.f32 %v6879_v59, 0.0 }
 0x700   : > { %3396 = vrot.lane.b32.xlu0 %v2715_v7, %s4984_s14  ;;  %v4960_v7 = vld [vmem:[%s5131_s13 + $0x94] ss:$8 sps:$4 sm:$0xff]  }
 0x701   : > { %v2603_v62 = vpop.permute.xlu0 %2602 }
 0x702   : > { %v2716_v52 = vmul.f32 %v2603_v62, %v6873_v56  ;;  %v6881_v62 = vld [vmem:[#allocation6_spill] sm:$0xff] }
 0x703   : > { %v6882_v56 = vmax.f32 %v6881_v62, 0.0 }
 0x704   : > { %3398 = vrot.lane.b32.xlu1 %v2716_v52, %s4984_s14  ;;  %2872 = vmatmul.mubr.bf16.gmra.mxu0 %v4953_v36  ;;  %v6883_v36 = vld [vmem:[#allocation7_spill] sm:$0xff] }
 0x705   : > { %2879 = vmatprep.mubr.bf16.mxu0 %v4954_v26  ;;  %v6884_v26 = vmax.f32 %v6883_v36, 0.0 }
 0x706   : > { %v2608_v12 = vpop.permute.xlu1 %2607 }
 0x707   : > { %v2717_v40 = vmul.f32 %v2608_v12, %v6874_v41  ;;  %v4961_v41 = vld [vmem:[%s5131_s13 + $0x90] ss:$8 sps:$4 sm:$0xff]  }
 0x709   : > { %3400 = vrot.lane.b32.xlu0 %v2717_v40, %s4984_s14  ;;  %v4962_v40 = vld [vmem:[%s5131_s13 + $0xa4] ss:$8 sps:$4 sm:$0xff]  }
 0x70a   : > { %v2613_v0 = vpop.permute.xlu0 %2612 }
 0x70b   : > { %v2718_v29 = vmul.f32 %v2613_v0, %v6875_v63  ;;  %v6885_v63 = vld [vmem:[#allocation8_spill] sm:$0xff] }
 0x70c   : > { %2880 = vmatmul.mubr.bf16.gmra.mxu0 %v4955_v38 }
 0x70d   : > { %3402 = vrot.lane.b32.xlu1 %v2718_v29, %s4984_s14  ;;  %2887 = vmatprep.mubr.bf16.mxu0 %v4956_v35  ;;  %v6886_v29 = vmax.f32 %v6885_v63, 0.0 }
 0x70e   : > { %v2618_v24 = vpop.permute.xlu1 %2617 }
 0x70f   : > { %v2719_v9 = vmul.f32 %v2618_v24, %v6876_v16  ;;  %v6887_v24 = vld [vmem:[#allocation9_spill] sm:$0xff] }
 0x710   : > { %v6888_v16 = vmax.f32 %v6887_v24, 0.0 }
 0x711   : > { %3404 = vrot.lane.b32.xlu0 %v2719_v9, %s4984_s14 }
 0x712   : > { %v2623_v51 = vpop.permute.xlu0 %2622 }
 0x713   : > { %v2720_v13 = vmul.f32 %v2623_v51, %v6877_v61  ;;  %v4963_v51 = vld [vmem:[%s5131_s13 + $0xa0] ss:$8 sps:$4 sm:$0xff]   ;;  %v4964_v61 = vld [vmem:[%s5131_s13 + $0xb4] ss:$8 sps:$4 sm:$0xff]  }
 0x714   : > { %2888 = vmatmul.mubr.bf16.gmra.mxu0 %v4957_v46  ;;  %v6889_v46 = vld [vmem:[#allocation10_spill] sm:$0xff] }
 0x715   : > { %3406 = vrot.lane.b32.xlu1 %v2720_v13, %s4984_s14  ;;  %v2628_v45 = vpop.permute.xlu1 %2627  ;;  %2895 = vmatprep.mubr.bf16.mxu0 %v4958_v30 }
 0x716   : > { %v2721_v39 = vmul.f32 %v2628_v45, %v6878_v49  ;;  %v6890_v45 = vmax.f32 %v6889_v46, 0.0 }
 0x718   : > { %3408 = vrot.lane.b32.xlu0 %v2721_v39, %s4984_s14  ;;  %v6891_v39 = vld [vmem:[#allocation11_spill] sm:$0xff] }
 0x719   : > { %v2633_v53 = vpop.permute.xlu0 %2632 }
 0x71a   : > { %v2722_v33 = vmul.f32 %v2633_v53, %v6880_v28  ;;  %v6892_v53 = vmax.f32 %v6891_v39, 0.0  ;;  %v4965_v28 = vld [vmem:[%s5131_s13 + $0xb0] ss:$8 sps:$4 sm:$0xff]  }
 0x71c   : > { %3410 = vrot.lane.b32.xlu1 %v2722_v33, %s4984_s14  ;;  %2896 = vmatmul.mubr.bf16.gmra.mxu0 %v4959_v57  ;;  %v4966_v57 = vld [vmem:[%s5131_s13 + $0xc4] ss:$8 sps:$4 sm:$0xff]  }
 0x71d   : > { %v2638_v37 = vpop.permute.xlu1 %2637  ;;  %2903 = vmatprep.mubr.bf16.mxu0 %v4960_v7 }
 0x71e   : > { %v2723_v50 = vmul.f32 %v2638_v37, %v6882_v56  ;;  %v6893_v37 = vld [vmem:[#allocation4_spill] sm:$0xff] }
 0x71f   : > { %v6894_v7 = vmax.f32 %v6893_v37, 0.0 }
 0x720   : > { %3412 = vrot.lane.b32.xlu0 %v2723_v50, %s4984_s14  ;;  %v6895_v50 = vld [vmem:[#allocation44_spill] sm:$0xff] }
 0x721   : > { %v2643_v52 = vpop.permute.xlu0 %2642 }
 0x722   : > { %v2724_v12 = vmul.f32 %v2643_v52, %v6884_v26  ;;  %v6896_v52 = vmax.f32 %v6895_v50, 0.0  ;;  %v4967_v26 = vld [vmem:[%s5131_s13 + $0xc0] ss:$8 sps:$4 sm:$0xff]  }
 0x724   : > { %3414 = vrot.lane.b32.xlu1 %v2724_v12, %s4984_s14  ;;  %2904 = vmatmul.mubr.bf16.gmra.mxu0 %v4961_v41  ;;  %v4968_v41 = vld [vmem:[%s5131_s13 + $0xd4] ss:$8 sps:$4 sm:$0xff]  }
 0x725   : > { %2911 = vmatprep.mubr.bf16.mxu0 %v4962_v40  ;;  %v6897_v40 = vld [vmem:[#allocation45_spill] sm:$0xff] }
 0x726   : > { %v2648_v0 = vpop.permute.xlu1 %2647 }
 0x727   : > { %v2725_v38 = vmul.f32 %v2648_v0, %v6886_v29  ;;  %v6898_v0 = vmax.f32 %v6897_v40, 0.0 }
 0x729   : > { %3416 = vrot.lane.b32.xlu0 %v2725_v38, %s4984_s14  ;;  %v6899_v38 = vld [vmem:[#allocation46_spill] sm:$0xff] }
 0x72a   : > { %v2653_v35 = vpop.permute.xlu0 %2652 }
 0x72b   : > { %v2726_v9 = vmul.f32 %v2653_v35, %v6888_v16  ;;  %v6900_v35 = vmax.f32 %v6899_v38, 0.0  ;;  %v4969_v16 = vld [vmem:[%s5131_s13 + $0xd0] ss:$8 sps:$4 sm:$0xff]  }
 0x72c   : > { %2912 = vmatmul.mubr.bf16.gmra.mxu0 %v4963_v51  ;;  %v4985_v51 = vmov 0  }
 0x72d   : > { %3418 = vrot.lane.b32.xlu1 %v2726_v9, %s4984_s14  ;;  %2919 = vmatprep.mubr.bf16.mxu0 %v4964_v61  ;;  %v4970_v9 = vld [vmem:[%s5131_s13 + $0xe4] ss:$8 sps:$4 sm:$0xff]  }
 0x72e   : > { %v2658_v13 = vpop.permute.xlu1 %2657  ;;  %4477 = vset.pattern.permute.xlu1 %v4985_v51  ;;  %4478 = vset.pattern.permute.xlu0 %v4985_v51  ;;  %v6914_v51 = vld [vmem:[#allocation14_spill] sm:$0xff] }
 0x72f   : > { %v2727_v30 = vmul.f32 %v2658_v13, %v6890_v45  ;;  %v6901_v13 = vld [vmem:[#allocation47_spill] sm:$0xff] }
 0x730   : > { %v6902_v46 = vmax.f32 %v6901_v13, 0.0  ;;  %v6916_v13 = vld [vmem:[#allocation58_spill] sm:$0xff] }
 0x731   : > { %3420 = vrot.lane.b32.xlu0 %v2727_v30, %s4984_s14 }
 0x732   : > { %v2663_v49 = vpop.permute.xlu0 %2662 }
 0x733   : > { %v2728_v59 = vmul.f32 %v2663_v49, %v6892_v53  ;;  %v6903_v49 = vld [vmem:[#allocation48_spill] sm:$0xff] }
 0x734   : > { %2920 = vmatmul.mubr.bf16.gmra.mxu0 %v4965_v28  ;;  %v6904_v39 = vmax.f32 %v6903_v49, 0.0  ;;  %v4972_v28 = vld [vmem:[%s5131_s13 + $0xf4] ss:$8 sps:$4 sm:$0xff]   ;;  %v6917_v49 = vld [vmem:[#allocation16_spill] sm:$0xff] }
 0x735   : > { %3422 = vrot.lane.b32.xlu1 %v2728_v59, %s4984_s14  ;;  %v2668_v33 = vpop.permute.xlu1 %2667  ;;  %2927 = vmatprep.mubr.bf16.mxu0 %v4966_v57  ;;  %v4971_v59 = vld [vmem:[%s5131_s13 + $0xe0] ss:$8 sps:$4 sm:$0xff]  }
 0x736   : > { %v2729_v62 = vmul.f32 %v2668_v33, %v6894_v7  ;;  %v6905_v57 = vld [vmem:[#allocation13_spill] sm:$0xff]  ;;  %v6907_v7 = vld [vmem:[#allocation60_spill] sm:$0xff] }
 0x737   : > { %v6906_v37 = vmax.f32 %v6905_v57, 0.0 }
 0x738   : > { %3424 = vrot.lane.b32.xlu0 %v2729_v62, %s4984_s14 }
 0x739   : > { %v2673_v56 = vpop.permute.xlu0 %2672  ;;  %v1869_v62 = vmul.f32 %v6907_v7, %v6906_v37  ;;  %v6922_v37 = vld [vmem:[#allocation65_spill] sm:$0xff] }
 0x73a   : > { %v2730_v36 = vmul.f32 %v2673_v56, %v6896_v52 }
 0x73c   : > { %3426 = vrot.lane.b32.xlu1 %v2730_v36, %s4984_s14  ;;  %2928 = vmatmul.mubr.bf16.gmra.mxu0 %v4967_v26  ;;  %v4973_v36 = vld [vmem:[%s5131_s13 + $0xf0] ss:$8 sps:$4 sm:$0xff]   ;;  %v6908_v26 = vld [vmem:[#allocation12_spill] sm:$0xff] }
 0x73d   : > { %v2678_v12 = vpop.permute.xlu1 %2677  ;;  %2935 = vmatprep.mubr.bf16.mxu0 %v4968_v41  ;;  %v6910_v41 = vld [vmem:[#allocation56_spill] sm:$0xff] }
 0x73e   : > { %v2731_v63 = vmul.f32 %v2678_v12, %v6898_v0  ;;  %v6909_v12 = vmax.f32 %v6908_v26, 0.0  ;;  %v6911_v0 = vld [vmem:[#allocation15_spill] sm:$0xff]  ;;  %v6923_v26 = vld [vmem:[#allocation18_spill] sm:$0xff] }
 0x740   : > { %3428 = vrot.lane.b32.xlu0 %v2731_v63, %s4984_s14  ;;  %v1868_v40 = vmul.f32 %v6910_v41, %v6909_v12  ;;  %v6912_v63 = vmax.f32 %v6911_v0, 0.0  ;;  %v6924_v12 = vmax.f32 %v6923_v26, 0.0  ;;  %v6925_v41 = vld [vmem:[#allocation66_spill] sm:$0xff]  ;;  %v6938_v26 = vld [vmem:[#allocation23_spill] sm:$0xff] }
 0x741   : > { %v2683_v29 = vpop.permute.xlu0 %2682 }
 0x742   : > { %v2732_v24 = vmul.f32 %v2683_v29, %v6900_v35  ;;  %v6913_v29 = vld [vmem:[#allocation62_spill] sm:$0xff] }
 0x743   : > { %v1871_v38 = vmul.f32 %v6913_v29, %v6912_v63  ;;  %v6926_v29 = vld [vmem:[#allocation19_spill] sm:$0xff] }
 0x744   : > { %3430 = vrot.lane.b32.xlu1 %v2732_v24, %s4984_s14  ;;  %2936 = vmatmul.mubr.bf16.gmra.mxu0 %v4969_v16 }
 0x745   : > { %2943 = vmatprep.mubr.bf16.mxu0 %v4970_v9 }
 0x746   : > { %v2688_v61 = vpop.permute.xlu1 %2687 }
 0x747   : > { %v2733_v45 = vmul.f32 %v2688_v61, %v6902_v46  ;;  %v6915_v61 = vmax.f32 %v6914_v51, 0.0  ;;  %v6929_v51 = vld [vmem:[#allocation20_spill] sm:$0xff] }
 0x749   : > { %3432 = vrot.lane.b32.xlu0 %v2733_v45, %s4984_s14  ;;  %v1870_v46 = vmul.f32 %v6916_v13, %v6915_v61  ;;  %v6930_v61 = vmax.f32 %v6929_v51, 0.0  ;;  %v6931_v13 = vld [vmem:[#allocation69_spill] sm:$0xff] }
 0x74a   : > { %v2693_v30 = vpop.permute.xlu0 %2692  ;;  %v6944_v51 = vld [vmem:[#allocation25_spill] sm:$0xff] }
 0x74b   : > { %v2734_v53 = vmul.f32 %v2693_v30, %v6904_v39  ;;  %v6918_v39 = vmax.f32 %v6917_v49, 0.0  ;;  %v6932_v49 = vld [vmem:[#allocation21_spill] sm:$0xff] }
 0x74c   : > { %2944 = vmatmul.mubr.bf16.gmra.mxu0 %v4971_v59 }
 0x74d   : > { %3434 = vrot.lane.b32.xlu1 %v2734_v53, %s4984_s14  ;;  %2951 = vmatprep.mubr.bf16.mxu0 %v4972_v28  ;;  %v6919_v53 = vld [vmem:[#allocation63_spill] sm:$0xff]  ;;  %v6920_v28 = vld [vmem:[#allocation17_spill] sm:$0xff] }
 0x74e   : > { %v6279_v33 = vpop.permute.xlu1 %2697  ;;  %v1872_v59 = vmul.f32 %v6919_v53, %v6918_v39  ;;  %v6921_v57 = vmax.f32 %v6920_v28, 0.0  ;;  %v6933_v39 = vmax.f32 %v6932_v49, 0.0  ;;  %v6934_v53 = vld [vmem:[#allocation71_spill] sm:$0xff]  ;;  %v6947_v49 = vld [vmem:[#allocation26_spill] sm:$0xff] }
 0x750   : > { %v1873_v7 = vmul.f32 %v6922_v37, %v6921_v57  ;;  %v6935_v37 = vld [vmem:[#allocation22_spill] sm:$0xff] }
 0x752   : > { %v3379_v56 = vpop.permute.xlu1 %3378  ;;  %v6290_v50 = vpop.permute.xlu0 %2702 }
 0x753   : > { %v3473_v52 = vsel %vm1090_vm1, %v1869_v62, %v3379_v56 }
 0x754   : > { %3506 = vst [vmem:[%s6288_s8 + $0x10] sm:$0xff] %v3473_v52  ;;  %2952 = vmatmul.mubr.bf16.gmra.mxu0 %v4973_v36 }
 0x756   : > { %v3377_v35 = vpop.permute.xlu0 %3376  ;;  %v3383_v24 = vpop.permute.xlu1 %3382 }
 0x757   : > { %v3472_v16 = vsel %vm1090_vm1, %v1868_v40, %v3377_v35  ;;  %v3475_v9 = vsel %vm1090_vm1, %v1871_v38, %v3383_v24  ;;  %v1874_v40 = vmul.f32 %v6925_v41, %v6924_v12  ;;  %v6927_v38 = vmax.f32 %v6926_v29, 0.0  ;;  %v6928_v35 = vld [vmem:[#allocation68_spill] sm:$0xff]  ;;  %v6940_v41 = vld [vmem:[#allocation74_spill] sm:$0xff] }
 0x758   : > { %3504 = vst [vmem:[%s6288_s8] sm:$0xff] %v3472_v16  ;;  %3510 = vst [vmem:[%s6288_s8 + $0x30] sm:$0xff] %v3475_v9  ;;  %v6939_v12 = vmax.f32 %v6938_v26, 0.0  ;;  %v6941_v29 = vld [vmem:[#allocation24_spill] sm:$0xff] }
 0x759   : > { %v1875_v24 = vmul.f32 %v6928_v35, %v6927_v38  ;;  %v6942_v38 = vmax.f32 %v6941_v29, 0.0  ;;  %v6943_v35 = vld [vmem:[#allocation75_spill] sm:$0xff]  ;;  %v6957_v29 = vld [vmem:[#allocation81_spill] sm:$0xff] }
 0x75a   : > { %v3381_v45 = vpop.permute.xlu0 %3380 }
 0x75b   : > { %v3474_v30 = vsel %vm1090_vm1, %v1870_v46, %v3381_v45  ;;  %v1876_v46 = vmul.f32 %v6931_v13, %v6930_v61  ;;  %v6945_v61 = vmax.f32 %v6944_v51, 0.0  ;;  %v6946_v13 = vld [vmem:[#allocation77_spill] sm:$0xff]  ;;  %v6960_v51 = vld [vmem:[#allocation82_spill] sm:$0xff] }
 0x75c   : > { %3508 = vst [vmem:[%s6288_s8 + $0x20] sm:$0xff] %v3474_v30 }
 0x75e   : > { %v3385_v62 = vpop.permute.xlu0 %3384 }
 0x75f   : > { %v3476_v56 = vsel %vm1090_vm1, %v1872_v59, %v3385_v62  ;;  %v3387_v52 = vpop.permute.xlu1 %3386  ;;  %v1877_v59 = vmul.f32 %v6934_v53, %v6933_v39  ;;  %v6937_v62 = vld [vmem:[#allocation72_spill] sm:$0xff]  ;;  %v6948_v39 = vmax.f32 %v6947_v49, 0.0 }
 0x760   : > { %3512 = vst [vmem:[%s6288_s8 + $0x40] sm:$0xff] %v3476_v56  ;;  %v3477_v36 = vsel %vm1090_vm1, %v1873_v7, %v3387_v52  ;;  %v6936_v7 = vmax.f32 %v6935_v37, 0.0 }
 0x761   : > { %3514 = vst [vmem:[%s6288_s8 + $0x50] sm:$0xff] %v3477_v36  ;;  %v1882_v53 = vmul.f32 %v5988_v58, %v6948_v39 }
 0x762   : > { %v1878_v56 = vmul.f32 %v6937_v62, %v6936_v7  ;;  %v6951_v7 = vld [vmem:[#allocation79_spill] sm:$0xff] }
 0x763   : > { %v3389_v0 = vpop.permute.xlu0 %3388 }
 0x764   : > { %v3478_v63 = vsel %vm1090_vm1, %v1874_v40, %v3389_v0  ;;  %v1879_v40 = vmul.f32 %v6940_v41, %v6939_v12  ;;  %v6954_v12 = vld [vmem:[#allocation80_spill] sm:$0xff] }
 0x765   : > { %3516 = vst [vmem:[%s6288_s8 + $0x60] sm:$0xff] %v3478_v63 }
 0x767   : > { %v3391_v16 = vpop.permute.xlu1 %3390 }
 0x768   : > { %v3479_v9 = vsel %vm1090_vm1, %v1875_v24, %v3391_v16  ;;  %v1880_v24 = vmul.f32 %v6943_v35, %v6942_v38 }
 0x769   : > { %3518 = vst [vmem:[%s6288_s8 + $0x70] sm:$0xff] %v3479_v9 }
 0x76a   : > { %v3393_v45 = vpop.permute.xlu0 %3392 }
 0x76b   : > { %v3480_v30 = vsel %vm1090_vm1, %v1876_v46, %v3393_v45  ;;  %v1881_v46 = vmul.f32 %v6946_v13, %v6945_v61 }
 0x76c   : > { %3520 = vst [vmem:[%s6288_s8 + $0x80] sm:$0xff] %v3480_v30 }
 0x76e   : > { %v3395_v28 = vpop.permute.xlu1 %3394 }
 0x76f   : > { %v3481_v57 = vsel %vm1090_vm1, %v1877_v59, %v3395_v28 }
 0x770   : > { %3522 = vst [vmem:[%s6288_s8 + $0x90] sm:$0xff] %v3481_v57  ;;  %v6949_v57 = vld [vmem:[#allocation27_spill] sm:$0xff] }
 0x771   : > { %v6950_v37 = vmax.f32 %v6949_v57, 0.0 }
 0x772   : > { %v3397_v52 = vpop.permute.xlu0 %3396 }
 0x773   : > { %v3482_v36 = vsel %vm1090_vm1, %v1878_v56, %v3397_v52  ;;  %v1883_v62 = vmul.f32 %v6951_v7, %v6950_v37 }
 0x774   : > { %3524 = vst [vmem:[%s6288_s8 + $0xa0] sm:$0xff] %v3482_v36  ;;  %v6952_v36 = vld [vmem:[#allocation28_spill] sm:$0xff] }
 0x775   : > { %v6953_v26 = vmax.f32 %v6952_v36, 0.0 }
 0x776   : > { %v3399_v0 = vpop.permute.xlu1 %3398 }
 0x777   : > { %v3483_v63 = vsel %vm1090_vm1, %v1879_v40, %v3399_v0  ;;  %v1884_v41 = vmul.f32 %v6954_v12, %v6953_v26  ;;  %v6955_v0 = vld [vmem:[#allocation29_spill] sm:$0xff]  ;;  %v6398_v26 = vld [vmem:[#allocation3] ss:$0 sm:$0xff] }
 0x778   : > { %3526 = vst [vmem:[%s6288_s8 + $0xb0] sm:$0xff] %v3483_v63  ;;  %v6956_v63 = vmax.f32 %v6955_v0, 0.0  ;;  %v6967_v0 = vld [vmem:[#allocation34_spill] sm:$0xff] }
 0x77a   : > { %v1885_v38 = vmul.f32 %v6957_v29, %v6956_v63  ;;  %v6968_v63 = vmax.f32 %v6967_v0, 0.0 }
 0x77b   : > { %v3401_v16 = vpop.permute.xlu0 %3400 }
 0x77c   : > { %v3484_v9 = vsel %vm1090_vm1, %v1880_v24, %v3401_v16  ;;  %v6958_v16 = vld [vmem:[#allocation30_spill] sm:$0xff]  ;;  %v1890_v29 = vmul.f32 %v6067_v15, %v6968_v63 }
 0x77d   : > { %3528 = vst [vmem:[%s6288_s8 + $0xc0] sm:$0xff] %v3484_v9  ;;  %v6959_v9 = vmax.f32 %v6958_v16, 0.0 }
 0x77f   : > { %v3403_v45 = vpop.permute.xlu1 %3402  ;;  %v1886_v61 = vmul.f32 %v6960_v51, %v6959_v9 }
 0x780   : > { %v3485_v30 = vsel %vm1090_vm1, %v1881_v46, %v3403_v45  ;;  %v6961_v45 = vld [vmem:[#allocation31_spill] sm:$0xff] }
 0x781   : > { %3530 = vst [vmem:[%s6288_s8 + $0xd0] sm:$0xff] %v3485_v30  ;;  %v6962_v30 = vmax.f32 %v6961_v45, 0.0 }
 0x783   : > { %v3405_v59 = vpop.permute.xlu0 %3404  ;;  %v1887_v49 = vmul.f32 %v6041_v18, %v6962_v30 }
 0x784   : > { %v3486_v28 = vsel %vm1090_vm1, %v1882_v53, %v3405_v59  ;;  %v6963_v59 = vld [vmem:[#allocation32_spill] sm:$0xff] }
 0x785   : > { %3532 = vst [vmem:[%s6288_s8 + $0xe0] sm:$0xff] %v3486_v28  ;;  %v6964_v28 = vmax.f32 %v6963_v59, 0.0  ;;  %v6971_v59 = vld [vmem:[#allocation36_spill] sm:$0xff] }
 0x787   : > { %v3407_v56 = vpop.permute.xlu1 %3406  ;;  %v1888_v57 = vmul.f32 %v6047_v3, %v6964_v28  ;;  %v6972_v28 = vmax.f32 %v6971_v59, 0.0 }
 0x788   : > { %v3487_v52 = vsel %vm1090_vm1, %v1883_v62, %v3407_v56  ;;  %v6965_v56 = vld [vmem:[#allocation33_spill] sm:$0xff] }
 0x789   : > { %3534 = vst [vmem:[%s6288_s8 + $0xf0] sm:$0xff] %v3487_v52  ;;  %v6966_v52 = vmax.f32 %v6965_v56, 0.0 }
 0x78a   : > { %v3409_v40 = vpop.permute.xlu0 %3408 }
 0x78b   : > { %v3488_v58 = vsel %vm1090_vm1, %v1884_v41, %v3409_v40  ;;  %v1889_v36 = vmul.f32 %v6061_v25, %v6966_v52 }
 0x78c   : > { %3536 = vst [vmem:[%s6288_s8 + $0x100] sm:$0xff] %v3488_v58 }
 0x78e   : > { %v3411_v35 = vpop.permute.xlu1 %3410 }
 0x78f   : > { %v3489_v24 = vsel %vm1090_vm1, %v1885_v38, %v3411_v35 }
 0x790   : > { %3538 = vst [vmem:[%s6288_s8 + $0x110] sm:$0xff] %v3489_v24 }
 0x792   : > { %v3413_v13 = vpop.permute.xlu0 %3412 }
 0x793   : > { %v3490_v46 = vsel %vm1090_vm1, %v1886_v61, %v3413_v13  ;;  %v6969_v61 = vld [vmem:[#allocation35_spill] sm:$0xff] }
 0x794   : > { %3540 = vst [vmem:[%s6288_s8 + $0x120] sm:$0xff] %v3490_v46  ;;  %v6970_v13 = vmax.f32 %v6969_v61, 0.0 }
 0x796   : > { %v3415_v39 = vpop.permute.xlu1 %3414  ;;  %v1891_v46 = vmul.f32 %v6081_v54, %v6970_v13 }
 0x797   : > { %v3491_v53 = vsel %vm1090_vm1, %v1887_v49, %v3415_v39 }
 0x798   : > { %3542 = vst [vmem:[%s6288_s8 + $0x130] sm:$0xff] %v3491_v53 }
 0x79b   : > { %v3417_v37 = vpop.permute.xlu0 %3416 }
 0x79c   : > { %v3492_v7 = vsel %vm1090_vm1, %v1888_v57, %v3417_v37  ;;  %v4245_v62 = vpop.f32.mrf.mxu0  ;;  %v1892_v57 = vmul.f32 %v6087_v42, %v6972_v28 }
 0x79d   : > { %3544 = vst [vmem:[%s6288_s8 + $0x140] sm:$0xff] %v3492_v7 }
 0x79e   : > { %v4246_v18 = vpop.f32.mrf.mxu0 }
 0x79f   : > { %v3419_v12 = vpop.permute.xlu1 %3418  ;;  %v4247_v41 = vadd.f32 %v4246_v18, %v4245_v62  ;;  %v6973_v18 = vld [vmem:[#allocation37_spill] sm:$0xff] }
 0x7a0   : > { %v3493_v40 = vsel %vm1090_vm1, %v1889_v36, %v3419_v12  ;;  %v4248_v58 = vpop.f32.mrf.mxu0  ;;  %v6974_v12 = vmax.f32 %v6973_v18, 0.0 }
 0x7a1   : > { %3546 = vst [vmem:[%s6288_s8 + $0x150] sm:$0xff] %v3493_v40  ;;  %v2834_v3 = vadd.f32 %v4247_v41, %v6398_v26 }
 0x7a2   : > { %v4249_v38 = vpop.f32.mrf.mxu0  ;;  %v1893_v41 = vmul.f32 %v6101_v14, %v6974_v12 }
 0x7a3   : > { %v3799_v35 = vmul.f32 -1.442695, %v2834_v3  ;;  %v3421_v24 = vpop.permute.xlu0 %3420  ;;  %v4250_v25 = vadd.f32 %v4249_v38, %v4248_v58  ;;  %v6975_v38 = vld [vmem:[#allocation38_spill] sm:$0xff] }
 0x7a4   : > { %v3494_v16 = vsel %vm1090_vm1, %v1890_v29, %v3421_v24  ;;  %v4251_v9 = vpop.f32.mrf.mxu0 }
 0x7a5   : > { %4783 = vpow2.f32 %v3799_v35  ;;  %3548 = vst [vmem:[%s6288_s8 + $0x160] sm:$0xff] %v3494_v16  ;;  %v2837_v51 = vadd.f32 %v4250_v25, %v6398_v26  ;;  %v6976_v35 = vmax.f32 %v6975_v38, 0.0 }
 0x7a6   : > { %v4252_v45 = vpop.f32.mrf.mxu0 }
 0x7a7   : > { %v3800_v30 = vmul.f32 -1.442695, %v2837_v51  ;;  %v3423_v15 = vpop.permute.xlu1 %3422  ;;  %v4253_v49 = vadd.f32 %v4252_v45, %v4251_v9  ;;  %v1894_v24 = vmul.f32 %v6107_v60, %v6976_v35 }
 0x7a8   : > { %v3495_v39 = vsel %vm1090_vm1, %v1891_v46, %v3423_v15  ;;  %v4254_v53 = vpop.f32.mrf.mxu0 }
 0x7a9   : > { %4785 = vpow2.f32 %v3800_v30  ;;  %3550 = vst [vmem:[%s6288_s8 + $0x170] sm:$0xff] %v3495_v39  ;;  %v2842_v37 = vadd.f32 %v4253_v49, %v6398_v26  ;;  %v6977_v30 = vld [vmem:[#allocation39_spill] sm:$0xff] }
 0x7aa   : > { %v3425_v7 = vpop.permute.xlu0 %3424  ;;  %v4255_v62 = vpop.f32.mrf.mxu0  ;;  %v6978_v15 = vmax.f32 %v6977_v30, 0.0 }
 0x7ab   : > { %v3801_v54 = vmul.f32 -1.442695, %v2842_v37  ;;  %v3496_v56 = vsel %vm1090_vm1, %v1892_v57, %v3425_v7  ;;  %v4256_v52 = vadd.f32 %v4255_v62, %v4254_v53 }
 0x7ac   : > { %3552 = vst [vmem:[%s6288_s8 + $0x180] sm:$0xff] %v3496_v56  ;;  %v4257_v36 = vpop.f32.mrf.mxu0  ;;  %v1895_v49 = vmul.f32 %v6121_v8, %v6978_v15  ;;  %v6979_v8 = vld [vmem:[#allocation40_spill] sm:$0xff] }
 0x7ad   : > { %4787 = vpow2.f32 %v3801_v54  ;;  %v2845_v42 = vadd.f32 %v4256_v52, %v6398_v26  ;;  %v6980_v52 = vmax.f32 %v6979_v8, 0.0 }
 0x7ae   : > { %v3427_v40 = vpop.permute.xlu1 %3426  ;;  %v4258_v58 = vpop.f32.mrf.mxu0 }
 0x7af   : > { %v3802_v3 = vmul.f32 -1.442695, %v2845_v42  ;;  %v3497_v0 = vsel %vm1090_vm1, %v1893_v41, %v3427_v40  ;;  %v4259_v63 = vadd.f32 %v4258_v58, %v4257_v36  ;;  %v1896_v36 = vmul.f32 %v6127_v17, %v6980_v52 }
 0x7b0   : > { %3554 = vst [vmem:[%s6288_s8 + $0x190] sm:$0xff] %v3497_v0  ;;  %v4260_v29 = vpop.f32.mrf.mxu0 }
 0x7b1   : > { %4789 = vpow2.f32 %v3802_v3  ;;  %v2850_v25 = vadd.f32 %v4259_v63, %v6398_v26 }
 0x7b2   : > { %v4784_v14 = vpop.eup %4783  ;;  %v3429_v16 = vpop.permute.xlu0 %3428 }
 0x7b3   : > { %v4261_v9 = vpop.f32.mrf.mxu0  ;;  %v3056_v51 = vadd.f32 1.0, %v4784_v14  ;;  %v3803_v61 = vmul.f32 -1.442695, %v2850_v25  ;;  %v3498_v13 = vsel %vm1090_vm1, %v1894_v24, %v3429_v16 }
 0x7b4   : > { %v4262_v46 = vadd.f32 %v4261_v9, %v4260_v29  ;;  %3556 = vst [vmem:[%s6288_s8 + $0x1a0] sm:$0xff] %v3498_v13  ;;  %v6981_v29 = vld [vmem:[#allocation41_spill] sm:$0xff] }
 0x7b5   : > { %v4263_v45 = vpop.f32.mrf.mxu0  ;;  %4791 = vrcp.f32 %v3056_v51  ;;  %v6982_v38 = vmax.f32 %v6981_v29, 0.0 }
 0x7b6   : > { %v2853_v60 = vadd.f32 %v4262_v46, %v6398_v26  ;;  %v4786_v39 = vpop.eup %4785  ;;  %4793 = vpow2.f32 %v3803_v61  ;;  %v3431_v53 = vpop.permute.xlu1 %3430 }
 0x7b7   : > { %v4264_v59 = vpop.f32.mrf.mxu0  ;;  %v3057_v28 = vadd.f32 1.0, %v4786_v39  ;;  %v3499_v37 = vsel %vm1090_vm1, %v1895_v49, %v3431_v53  ;;  %v1897_v35 = vmul.f32 %v6140_v2, %v6982_v38  ;;  %v6985_v38 = vmax.f32 %v5850_v10, 0.0 }
 0x7b8   : > { %v3804_v57 = vmul.f32 -1.442695, %v2853_v60  ;;  %v4265_v7 = vadd.f32 %v4264_v59, %v4263_v45  ;;  %3558 = vst [vmem:[%s6288_s8 + $0x1b0] sm:$0xff] %v3499_v37 }
 0x7b9   : > { %v4266_v62 = vpop.f32.mrf.mxu0  ;;  %4795 = vrcp.f32 %v3057_v28 }
 0x7ba   : > { %v2858_v54 = vadd.f32 %v4265_v7, %v6398_v26  ;;  %v4788_v56 = vpop.eup %4787  ;;  %4797 = vpow2.f32 %v3804_v57  ;;  %v6983_v7 = vmax.f32 %v5842_v34, 0.0 }
 0x7bb   : > { %v4267_v18 = vpop.f32.mrf.mxu0  ;;  %v3058_v12 = vadd.f32 1.0, %v4788_v56  ;;  %v3433_v42 = vpop.permute.xlu0 %3432 }
 0x7bc   : > { %v3805_v41 = vmul.f32 -1.442695, %v2858_v54  ;;  %v4268_v40 = vadd.f32 %v4267_v18, %v4266_v62  ;;  %v3500_v58 = vsel %vm1090_vm1, %v1896_v36, %v3433_v42 }
 0x7bd   : > { %v4269_v3 = vpop.f32.mrf.mxu0  ;;  %4799 = vrcp.f32 %v3058_v12  ;;  %3560 = vst [vmem:[%s6288_s8 + $0x1c0] sm:$0xff] %v3500_v58  ;;  %v6984_v12 = vmax.f32 %v5846_v27, 0.0 }
 0x7be   : > { %v2861_v0 = vadd.f32 %v4268_v40, %v6398_v26  ;;  %v4790_v63 = vpop.eup %4789  ;;  %4801 = vpow2.f32 %v3805_v41 }
 0x7bf   : > { %v4270_v17 = vpop.f32.mrf.mxu0  ;;  %v3059_v24 = vadd.f32 1.0, %v4790_v63  ;;  %v3435_v14 = vpop.permute.xlu1 %3434 }
 0x7c0   : > { %v3806_v25 = vmul.f32 -1.442695, %v2861_v0  ;;  %v4271_v16 = vadd.f32 %v4270_v17, %v4269_v3  ;;  %v3501_v9 = vsel %vm1090_vm1, %v1897_v35, %v3435_v14 }
 0x7c1   : > { %v4272_v51 = vpop.f32.mrf.mxu0  ;;  %4803 = vrcp.f32 %v3059_v24  ;;  %3562 = vst [vmem:[%s6288_s8 + $0x1d0] sm:$0xff] %v3501_v9 }
 0x7c2   : > { %v2866_v61 = vadd.f32 %v4271_v16, %v6398_v26  ;;  %v4792_v13 = vpop.eup %4791  ;;  %4805 = vpow2.f32 %v3806_v25 }
 0x7c3   : > { %v4273_v46 = vpop.f32.mrf.mxu0  ;;  %v4794_v45 = vpop.eup %4793  ;;  %v3152_v2 = vmul.f32 %v4792_v13, %v2321_v21 }
 0x7c4   : > { %v3807_v30 = vmul.f32 -1.442695, %v2866_v61  ;;  %v4274_v15 = vadd.f32 %v4273_v46, %v4272_v51  ;;  %v3060_v49 = vadd.f32 1.0, %v4794_v45  ;;  %v6986_v46 = vmax.f32 %v5854_v4, 0.0 }
 0x7c5   : > { %v4275_v60 = vpop.f32.mrf.mxu0  ;;  %3186 = vperm.xlu1 %4477, %v3152_v2  }
 0x7c6   : > { %4807 = vpow2.f32 %v3807_v30  ;;  %v2869_v39 = vadd.f32 %v4274_v15, %v6398_v26  ;;  %v4796_v53 = vpop.eup %4795 }
 0x7c7   : > { %4809 = vrcp.f32 %v3060_v49  ;;  %v4276_v59 = vpop.f32.mrf.mxu0  ;;  %v4798_v28 = vpop.eup %4797  ;;  %v3153_v62 = vmul.f32 %v4796_v53, %v6983_v7 }
 0x7c8   : > { %v3808_v57 = vmul.f32 -1.442695, %v2869_v39  ;;  %v4277_v37 = vadd.f32 %v4276_v59, %v4275_v60  ;;  %v3061_v54 = vadd.f32 1.0, %v4798_v28  ;;  %v6987_v59 = vmax.f32 %v5858_v48, 0.0 }
 0x7c9   : > { %v4278_v56 = vpop.f32.mrf.mxu0  ;;  %3191 = vperm.xlu0 %4478, %v3153_v62  }
 0x7ca   : > { %4811 = vpow2.f32 %v3808_v57  ;;  %v2874_v23 = vadd.f32 %v4277_v37, %v6398_v26  ;;  %v4800_v21 = vpop.eup %4799 }
 0x7cb   : > { %4813 = vrcp.f32 %v3061_v54  ;;  %v4279_v8 = vpop.f32.mrf.mxu0  ;;  %v4802_v52 = vpop.eup %4801  ;;  %v3154_v41 = vmul.f32 %v4800_v21, %v6984_v12  ;;  %v6988_v21 = vmax.f32 %v5862_v31, 0.0 }
 0x7cc   : > { %v3809_v36 = vmul.f32 -1.442695, %v2874_v23  ;;  %v4280_v18 = vadd.f32 %v4279_v8, %v4278_v56  ;;  %v3062_v42 = vadd.f32 1.0, %v4802_v52 }
 0x7cd   : > { %v4281_v40 = vpop.f32.mrf.mxu0  ;;  %3196 = vperm.xlu1 %4477, %v3154_v41  }
 0x7ce   : > { %4815 = vpow2.f32 %v3809_v36  ;;  %v2877_v34 = vadd.f32 %v4280_v18, %v6398_v26  ;;  %v4804_v58 = vpop.eup %4803 }
 0x7cf   : > { %4817 = vrcp.f32 %v3062_v42  ;;  %v4282_v3 = vpop.f32.mrf.mxu0  ;;  %v4806_v0 = vpop.eup %4805  ;;  %v3155_v35 = vmul.f32 %v4804_v58, %v6985_v38 }
 0x7d0   : > { %v3810_v63 = vmul.f32 -1.442695, %v2877_v34  ;;  %v4283_v29 = vadd.f32 %v4282_v3, %v4281_v40  ;;  %v3063_v17 = vadd.f32 1.0, %v4806_v0  ;;  %v6989_v34 = vmax.f32 %v5866_v43, 0.0 }
 0x7d1   : > { %v4284_v24 = vpop.f32.mrf.mxu0  ;;  %3201 = vperm.xlu1 %4477, %v3155_v35   ;;  %v6990_v35 = vmax.f32 %v5870_v5, 0.0 }
 0x7d2   : > { %4819 = vpow2.f32 %v3810_v63  ;;  %v2882_v27 = vadd.f32 %v4283_v29, %v6398_v26 }
 0x7d3   : > { %v4808_v25 = vpop.eup %4807  ;;  %4821 = vrcp.f32 %v3063_v17  ;;  %v4285_v14 = vpop.f32.mrf.mxu0 }
 0x7d4   : > { %v4810_v16 = vpop.eup %4809  ;;  %v3064_v9 = vadd.f32 1.0, %v4808_v25  ;;  %v3811_v51 = vmul.f32 -1.442695, %v2882_v27  ;;  %v4286_v61 = vadd.f32 %v4285_v14, %v4284_v24 }
 0x7d5   : > { %v4287_v13 = vpop.f32.mrf.mxu0  ;;  %v3156_v45 = vmul.f32 %v4810_v16, %v6986_v46 }
 0x7d6   : > { %4823 = vrcp.f32 %v3064_v9  ;;  %v2885_v10 = vadd.f32 %v4286_v61, %v6398_v26  ;;  %v6991_v61 = vmax.f32 %v5874_v6, 0.0 }
 0x7d7   : > { %v4812_v30 = vpop.eup %4811  ;;  %4825 = vpow2.f32 %v3811_v51  ;;  %3206 = vperm.xlu0 %4478, %v3156_v45   ;;  %v4288_v15 = vpop.f32.mrf.mxu0 }
 0x7d8   : > { %v4814_v2 = vpop.eup %4813  ;;  %v3065_v49 = vadd.f32 1.0, %v4812_v30  ;;  %v3812_v60 = vmul.f32 -1.442695, %v2885_v10  ;;  %v4289_v39 = vadd.f32 %v4288_v15, %v4287_v13 }
 0x7d9   : > { %v4290_v53 = vpop.f32.mrf.mxu0  ;;  %v3157_v28 = vmul.f32 %v4814_v2, %v6987_v59 }
 0x7da   : > { %4827 = vrcp.f32 %v3065_v49  ;;  %v2890_v57 = vadd.f32 %v4289_v39, %v6398_v26 }
 0x7db   : > { %v4816_v4 = vpop.eup %4815  ;;  %4829 = vpow2.f32 %v3812_v60  ;;  %3211 = vperm.xlu1 %4477, %v3157_v28   ;;  %v4291_v37 = vpop.f32.mrf.mxu0  ;;  %v6992_v60 = vmax.f32 %v5878_v11, 0.0 }
 0x7dc   : > { %v4818_v7 = vpop.eup %4817  ;;  %v3066_v62 = vadd.f32 1.0, %v4816_v4  ;;  %v3813_v54 = vmul.f32 -1.442695, %v2890_v57  ;;  %v4292_v56 = vadd.f32 %v4291_v37, %v4290_v53 }
 0x7dd   : > { %v4293_v23 = vpop.f32.mrf.mxu0  ;;  %v3158_v8 = vmul.f32 %v4818_v7, %v6988_v21 }
 0x7de   : > { %4831 = vrcp.f32 %v3066_v62  ;;  %v2893_v52 = vadd.f32 %v4292_v56, %v6398_v26  ;;  %v6993_v62 = vmax.f32 %v5882_v22, 0.0 }
 0x7df   : > { %v4820_v48 = vpop.eup %4819  ;;  %4833 = vpow2.f32 %v3813_v54  ;;  %3216 = vperm.xlu0 %4478, %v3158_v8   ;;  %v4294_v36 = vpop.f32.mrf.mxu0 }
 0x7e0   : > { %v4822_v18 = vpop.eup %4821  ;;  %v3067_v12 = vadd.f32 1.0, %v4820_v48  ;;  %v3814_v41 = vmul.f32 -1.442695, %v2893_v52  ;;  %v4295_v42 = vadd.f32 %v4294_v36, %v4293_v23 }
 0x7e1   : > { %v4296_v40 = vpop.f32.mrf.mxu0  ;;  %v3159_v58 = vmul.f32 %v4822_v18, %v6989_v34 }
 0x7e2   : > { %4835 = vrcp.f32 %v3067_v12  ;;  %v2898_v3 = vadd.f32 %v4295_v42, %v6398_v26 }
 0x7e3   : > { %v4824_v31 = vpop.eup %4823  ;;  %4837 = vpow2.f32 %v3814_v41  ;;  %3221 = vperm.xlu1 %4477, %v3159_v58   ;;  %v4297_v0 = vpop.f32.mrf.mxu0  ;;  %v6994_v41 = vmax.f32 %v5886_v32, 0.0 }
 0x7e4   : > { %v4826_v63 = vpop.eup %4825  ;;  %v3815_v29 = vmul.f32 -1.442695, %v2898_v3  ;;  %v4298_v38 = vadd.f32 %v4297_v0, %v4296_v40  ;;  %v3160_v17 = vmul.f32 %v4824_v31, %v6990_v35 }
 0x7e5   : > { %v3068_v24 = vadd.f32 1.0, %v4826_v63  ;;  %v4299_v27 = vpop.f32.mrf.mxu0 }
 0x7e6   : > { %4839 = vpow2.f32 %v3815_v29  ;;  %v2901_v25 = vadd.f32 %v4298_v38, %v6398_v26  ;;  %3226 = vperm.xlu0 %4478, %v3160_v17   ;;  %v6995_v29 = vmax.f32 %v5890_v19, 0.0 }
 0x7e7   : > { %v4828_v43 = vpop.eup %4827  ;;  %4841 = vrcp.f32 %v3068_v24  ;;  %v4300_v14 = vpop.f32.mrf.mxu0 }
 0x7e8   : > { %v4830_v16 = vpop.eup %4829  ;;  %v3816_v9 = vmul.f32 -1.442695, %v2901_v25  ;;  %v4301_v51 = vadd.f32 %v4300_v14, %v4299_v27  ;;  %v3161_v13 = vmul.f32 %v4828_v43, %v6991_v61 }
 0x7e9   : > { %v3069_v46 = vadd.f32 1.0, %v4830_v16  ;;  %v4302_v45 = vpop.f32.mrf.mxu0  ;;  %v6996_v16 = vld [vmem:[#allocation51_spill] sm:$0xff] }
 0x7ea   : > { %4843 = vpow2.f32 %v3816_v9  ;;  %v2906_v5 = vadd.f32 %v4301_v51, %v6398_v26  ;;  %3231 = vperm.xlu1 %4477, %v3161_v13   ;;  %v6997_v9 = vmax.f32 %v6996_v16, 0.0 }
 0x7eb   : > { %v4832_v10 = vpop.eup %4831  ;;  %4845 = vrcp.f32 %v3069_v46  ;;  %v4303_v30 = vpop.f32.mrf.mxu0 }
 0x7ec   : > { %v4834_v15 = vpop.eup %4833  ;;  %v3817_v2 = vmul.f32 -1.442695, %v2906_v5  ;;  %v4304_v49 = vadd.f32 %v4303_v30, %v4302_v45  ;;  %v3162_v39 = vmul.f32 %v4832_v10, %v6992_v60 }
 0x7ed   : > { %v3070_v53 = vadd.f32 1.0, %v4834_v15  ;;  %v4305_v59 = vpop.f32.mrf.mxu0  ;;  %v6998_v15 = vld [vmem:[#allocation52_spill] sm:$0xff] }
 0x7ee   : > { %4847 = vpow2.f32 %v3817_v2  ;;  %v2909_v6 = vadd.f32 %v4304_v49, %v6398_v26  ;;  %3236 = vperm.xlu0 %4478, %v3162_v39   ;;  %v6999_v2 = vmax.f32 %v6998_v15, 0.0 }
 0x7ef   : > { %v4836_v28 = vpop.eup %4835  ;;  %4849 = vrcp.f32 %v3070_v53  ;;  %v4306_v57 = vpop.f32.mrf.mxu0 }
 0x7f0   : > { %v4838_v4 = vpop.eup %4837  ;;  %v3818_v37 = vmul.f32 -1.442695, %v2909_v6  ;;  %v4307_v7 = vadd.f32 %v4306_v57, %v4305_v59  ;;  %v3163_v54 = vmul.f32 %v4836_v28, %v6993_v62  ;;  %v7000_v57 = vmax.f32 %v5902_v1, 0.0 }
 0x7f1   : > { %v3071_v56 = vadd.f32 1.0, %v4838_v4  ;;  %v4308_v23 = vpop.f32.mrf.mxu0 }
 0x7f2   : > { %4851 = vpow2.f32 %v3818_v37  ;;  %v2914_v11 = vadd.f32 %v4307_v7, %v6398_v26  ;;  %3241 = vperm.xlu1 %4477, %v3163_v54  }
 0x7f3   : > { %v4840_v21 = vpop.eup %4839  ;;  %4853 = vrcp.f32 %v3071_v56  ;;  %v4309_v8 = vpop.f32.mrf.mxu0 }
 0x7f4   : > { %v4842_v52 = vpop.eup %4841  ;;  %v3072_v48 = vadd.f32 1.0, %v4840_v21  ;;  %v3819_v36 = vmul.f32 -1.442695, %v2914_v11  ;;  %v4310_v18 = vadd.f32 %v4309_v8, %v4308_v23  ;;  %v7001_v8 = vmax.f32 %v5906_v20, 0.0 }
 0x7f5   : > { %v4311_v12 = vpop.f32.mrf.mxu0  ;;  %v3164_v42 = vmul.f32 %v4842_v52, %v6994_v41 }
 0x7f6   : > { %4855 = vrcp.f32 %v3072_v48  ;;  %v2917_v22 = vadd.f32 %v4310_v18, %v6398_v26 }
 0x7f7   : > { %v4844_v40 = vpop.eup %4843  ;;  %4857 = vpow2.f32 %v3819_v36  ;;  %3246 = vperm.xlu0 %4478, %v3164_v42   ;;  %v4312_v34 = vpop.f32.mrf.mxu0 }
 0x7f8   : > { %v4846_v58 = vpop.eup %4845  ;;  %v3073_v3 = vadd.f32 1.0, %v4844_v40  ;;  %v3820_v31 = vmul.f32 -1.442695, %v2917_v22  ;;  %v4313_v0 = vadd.f32 %v4312_v34, %v4311_v12  ;;  %v7002_v40 = vmax.f32 %v5910_v47, 0.0 }
 0x7f9   : > { %v4314_v63 = vpop.f32.mrf.mxu0  ;;  %v3165_v38 = vmul.f32 %v4846_v58, %v6995_v29 }
 0x7fa   : > { %4859 = vrcp.f32 %v3073_v3  ;;  %v2922_v35 = vadd.f32 %v4313_v0, %v6398_v26 }
 0x7fb   : > { %v4848_v32 = vpop.eup %4847  ;;  %4861 = vpow2.f32 %v3820_v31  ;;  %3251 = vperm.xlu1 %4477, %v3165_v38   ;;  %v4315_v17 = vpop.f32.mrf.mxu0 }
 0x7fc   : > { %v4850_v24 = vpop.eup %4849  ;;  %v3074_v27 = vadd.f32 1.0, %v4848_v32  ;;  %v3821_v25 = vmul.f32 -1.442695, %v2922_v35  ;;  %v4316_v43 = vadd.f32 %v4315_v17, %v4314_v63  ;;  %v7003_v35 = vmax.f32 %v5914_v44, 0.0 }
 0x7fd   : > { %v4317_v14 = vpop.f32.mrf.mxu0  ;;  %v3166_v51 = vmul.f32 %v4850_v24, %v6997_v9 }
 0x7fe   : > { %4863 = vrcp.f32 %v3074_v27  ;;  %v2925_v61 = vadd.f32 %v4316_v43, %v6398_v26 }
 0x7ff   : > { %v4852_v19 = vpop.eup %4851  ;;  %4865 = vpow2.f32 %v3821_v25  ;;  %3256 = vperm.xlu0 %4478, %v3166_v51   ;;  %v4318_v13 = vpop.f32.mrf.mxu0 }
 0x800   : > { %v4854_v46 = vpop.eup %4853  ;;  %v3075_v45 = vadd.f32 1.0, %v4852_v19  ;;  %v3822_v5 = vmul.f32 -1.442695, %v2925_v61  ;;  %v4319_v10 = vadd.f32 %v4318_v13, %v4317_v14  ;;  %v7004_v61 = vld [vmem:[#allocation53_spill] sm:$0xff] }
 0x801   : > { %v4320_v30 = vpop.f32.mrf.mxu0  ;;  %v3167_v49 = vmul.f32 %v4854_v46, %v6999_v2  ;;  %v7005_v19 = vmax.f32 %v7004_v61, 0.0  ;;  %v7022_v61 = vld [vmem:[#allocation73_spill] sm:$0xff] }
 0x802   : > { %4867 = vrcp.f32 %v3075_v45  ;;  %v2930_v60 = vadd.f32 %v4319_v10, %v6398_v26 }
 0x803   : > { %v4856_v39 = vpop.eup %4855  ;;  %4869 = vpow2.f32 %v3822_v5  ;;  %3261 = vperm.xlu1 %4477, %v3167_v49   ;;  %v4321_v53 = vpop.f32.mrf.mxu0  ;;  %v7006_v49 = vld [vmem:[#allocation54_spill] sm:$0xff] }
 0x804   : > { %v4858_v59 = vpop.eup %4857  ;;  %v3823_v6 = vmul.f32 -1.442695, %v2930_v60  ;;  %v4322_v28 = vadd.f32 %v4321_v53, %v4320_v30  ;;  %v3168_v4 = vmul.f32 %v4856_v39, %v7000_v57  ;;  %v7007_v60 = vmax.f32 %v7006_v49, 0.0 }
 0x805   : > { %v3076_v37 = vadd.f32 1.0, %v4858_v59  ;;  %v4323_v7 = vpop.f32.mrf.mxu0 }
 0x806   : > { %4871 = vpow2.f32 %v3823_v6  ;;  %v2933_v62 = vadd.f32 %v4322_v28, %v6398_v26  ;;  %3266 = vperm.xlu0 %4478, %v3168_v4  }
 0x807   : > { %v4860_v54 = vpop.eup %4859  ;;  %4873 = vrcp.f32 %v3076_v37  ;;  %v4324_v56 = vpop.f32.mrf.mxu0 }
 0x808   : > { %v4862_v23 = vpop.eup %4861  ;;  %v3824_v11 = vmul.f32 -1.442695, %v2933_v62  ;;  %v4325_v21 = vadd.f32 %v4324_v56, %v4323_v7  ;;  %v3169_v52 = vmul.f32 %v4860_v54, %v7001_v8  ;;  %v7008_v7 = vld [vmem:[#allocation55_spill] sm:$0xff] }
 0x809   : > { %v3077_v48 = vadd.f32 1.0, %v4862_v23  ;;  %v4326_v36 = vpop.f32.mrf.mxu0  ;;  %v7009_v62 = vmax.f32 %v7008_v7, 0.0 }
 0x80a   : > { %4875 = vpow2.f32 %v3824_v11  ;;  %v2938_v1 = vadd.f32 %v4325_v21, %v6398_v26  ;;  %3271 = vperm.xlu1 %4477, %v3169_v52   ;;  %v7010_v52 = vld [vmem:[#allocation57_spill] sm:$0xff] }
 0x80b   : > { %v4864_v18 = vpop.eup %4863  ;;  %4877 = vrcp.f32 %v3077_v48  ;;  %v4327_v12 = vpop.f32.mrf.mxu0  ;;  %v7011_v48 = vmax.f32 %v7010_v52, 0.0 }
 0x80c   : > { %v4866_v41 = vpop.eup %4865  ;;  %v3825_v42 = vmul.f32 -1.442695, %v2938_v1  ;;  %v4328_v22 = vadd.f32 %v4327_v12, %v4326_v36  ;;  %v3170_v34 = vmul.f32 %v4864_v18, %v7002_v40  ;;  %v7012_v12 = vld [vmem:[#allocation59_spill] sm:$0xff] }
 0x80d   : > { %v3078_v58 = vadd.f32 1.0, %v4866_v41  ;;  %v4329_v3 = vpop.f32.mrf.mxu0  ;;  %v7013_v41 = vmax.f32 %v7012_v12, 0.0 }
 0x80e   : > { %4879 = vpow2.f32 %v3825_v42  ;;  %v2941_v20 = vadd.f32 %v4328_v22, %v6398_v26  ;;  %3276 = vperm.xlu0 %4478, %v3170_v34   ;;  %v7014_v34 = vld [vmem:[#allocation61_spill] sm:$0xff] }
 0x80f   : > { %v4868_v31 = vpop.eup %4867  ;;  %4881 = vrcp.f32 %v3078_v58  ;;  %v4330_v0 = vpop.f32.mrf.mxu0  ;;  %v7015_v58 = vmax.f32 %v7014_v34, 0.0 }
 0x810   : > { %v4870_v63 = vpop.eup %4869  ;;  %v3826_v29 = vmul.f32 -1.442695, %v2941_v20  ;;  %v4331_v38 = vadd.f32 %v4330_v0, %v4329_v3  ;;  %v3171_v32 = vmul.f32 %v4868_v31, %v7003_v35 }
 0x811   : > { %v3079_v17 = vadd.f32 1.0, %v4870_v63  ;;  %v4332_v24 = vpop.f32.mrf.mxu0  ;;  %v7016_v63 = vld [vmem:[#allocation64_spill] sm:$0xff] }
 0x812   : > { %4883 = vpow2.f32 %v3826_v29  ;;  %v2946_v47 = vadd.f32 %v4331_v38, %v6398_v26  ;;  %3281 = vperm.xlu1 %4477, %v3171_v32   ;;  %v7017_v29 = vmax.f32 %v7016_v63, 0.0  ;;  %v7032_v63 = vld [vmem:[#allocation42_spill] sm:$0xff] }
 0x813   : > { %v4872_v27 = vpop.eup %4871  ;;  %4885 = vrcp.f32 %v3079_v17  ;;  %v4333_v25 = vpop.f32.mrf.mxu0 }
 0x814   : > { %v4874_v43 = vpop.eup %4873  ;;  %v3080_v14 = vadd.f32 1.0, %v4872_v27  ;;  %v3827_v16 = vmul.f32 -1.442695, %v2946_v47  ;;  %v4334_v9 = vadd.f32 %v4333_v25, %v4332_v24  ;;  %v7018_v24 = vld [vmem:[#allocation67_spill] sm:$0xff] }
 0x815   : > { %v4335_v51 = vpop.f32.mrf.mxu0  ;;  %v3172_v13 = vmul.f32 %v4874_v43, %v7005_v19  ;;  %v7019_v47 = vmax.f32 %v7018_v24, 0.0  ;;  %v7023_v19 = vmax.f32 %v7022_v61, 0.0 }
 0x816   : > { %4887 = vrcp.f32 %v3080_v14  ;;  %v2949_v44 = vadd.f32 %v4334_v9, %v6398_v26  ;;  %v7020_v14 = vld [vmem:[#allocation70_spill] sm:$0xff] }
 0x817   : > { %v4876_v46 = vpop.eup %4875  ;;  %4889 = vpow2.f32 %v3827_v16  ;;  %3286 = vperm.xlu0 %4478, %v3172_v13   ;;  %v4336_v45 = vpop.f32.mrf.mxu0  ;;  %v7021_v16 = vmax.f32 %v7020_v14, 0.0 }
 0x818   : > { %v4878_v5 = vpop.eup %4877  ;;  %v3081_v10 = vadd.f32 1.0, %v4876_v46  ;;  %v3828_v30 = vmul.f32 -1.442695, %v2949_v44  ;;  %v4337_v15 = vadd.f32 %v4336_v45, %v4335_v51  ;;  %v7024_v46 = vld [vmem:[#allocation76_spill] sm:$0xff] }
 0x819   : > { %v4338_v2 = vpop.f32.mrf.mxu0  ;;  %v3173_v39 = vmul.f32 %v4878_v5, %v7007_v60  ;;  %v7025_v45 = vmax.f32 %v7024_v46, 0.0  ;;  %v7028_v60 = vld [vmem:[#allocation78_spill] sm:$0xff] }
 0x81a   : > { %4891 = vrcp.f32 %v3081_v10  ;;  %v2954_v53 = vadd.f32 %v4337_v15, %v6398_v26 }
 0x81b   : > { %v4880_v59 = vpop.eup %4879  ;;  %4893 = vpow2.f32 %v3828_v30  ;;  %3291 = vperm.xlu1 %4477, %v3173_v39   ;;  %v4339_v6 = vpop.f32.mrf.mxu0  ;;  %v7026_v30 = vld [vmem:[#allocation49_spill] sm:$0xff]  ;;  %v7029_v39 = vmax.f32 %v7028_v60, 0.0 }
 0x81c   : > { %v4882_v28 = vpop.eup %4881  ;;  %v3082_v57 = vadd.f32 1.0, %v4880_v59  ;;  %v3829_v4 = vmul.f32 -1.442695, %v2954_v53  ;;  %v4340_v37 = vadd.f32 %v4339_v6, %v4338_v2  ;;  %v7027_v15 = vmax.f32 %v7026_v30, 0.0  ;;  %v7030_v59 = vld [vmem:[#allocation50_spill] sm:$0xff] }
 0x81d   : > { %v3174_v54 = vmul.f32 %v4882_v28, %v7009_v62  ;;  %v7031_v6 = vmax.f32 %v7030_v59, 0.0 }
 0x81e   : > { %4895 = vrcp.f32 %v3082_v57  ;;  %v2957_v56 = vadd.f32 %v4340_v37, %v6398_v26  ;;  %v2735_v2 = vmul.f32 %v6279_v33, %v7027_v15 }
 0x81f   : > { %v4884_v23 = vpop.eup %4883  ;;  %4897 = vpow2.f32 %v3829_v4  ;;  %3296 = vperm.xlu0 %4478, %v3174_v54   ;;  %v2736_v28 = vmul.f32 %v6290_v50, %v7031_v6 }
 0x820   : > { %v4886_v11 = vpop.eup %4885  ;;  %v3083_v21 = vadd.f32 1.0, %v4884_v23  ;;  %v3830_v8 = vmul.f32 -1.442695, %v2957_v56 }
 0x821   : > { %v3175_v36 = vmul.f32 %v4886_v11, %v7011_v48 }
 0x822   : > { %4899 = vrcp.f32 %v3083_v21 }
 0x823   : > { %v4888_v1 = vpop.eup %4887  ;;  %4901 = vpow2.f32 %v3830_v8  ;;  %3301 = vperm.xlu1 %4477, %v3175_v36  }
 0x824   : > { %v4890_v18 = vpop.eup %4889  ;;  %v3176_v42 = vmul.f32 %v4888_v1, %v7013_v41 }
 0x825   : > { %v3084_v22 = vadd.f32 1.0, %v4890_v18 }
 0x826   : > { %3306 = vperm.xlu0 %4478, %v3176_v42  }
 0x827   : > { %v4892_v26 = vpop.eup %4891  ;;  %4903 = vrcp.f32 %v3084_v22 }
 0x828   : > { %v4894_v40 = vpop.eup %4893  ;;  %v3177_v3 = vmul.f32 %v4892_v26, %v7015_v58 }
 0x829   : > { %v3085_v20 = vadd.f32 1.0, %v4894_v40 }
 0x82a   : > { %3311 = vperm.xlu1 %4477, %v3177_v3  }
 0x82b   : > { %v4896_v31 = vpop.eup %4895  ;;  %4905 = vrcp.f32 %v3085_v20 }
 0x82c   : > { %v4898_v0 = vpop.eup %4897  ;;  %v3178_v38 = vmul.f32 %v4896_v31, %v7017_v29  ;;  %v7033_v29 = vmax.f32 %v7032_v63, 0.0 }
 0x82d   : > { %v3086_v35 = vadd.f32 1.0, %v4898_v0 }
 0x82e   : > { %3316 = vperm.xlu0 %4478, %v3178_v38   ;;  %v7034_v38 = vld [vmem:[#allocation83_spill] sm:$0xff] }
 0x82f   : > { %v4900_v32 = vpop.eup %4899  ;;  %4907 = vrcp.f32 %v3086_v35  ;;  %v1898_v35 = vmul.f32 %v7034_v38, %v7033_v29 }
 0x830   : > { %v4902_v17 = vpop.eup %4901  ;;  %v3179_v27 = vmul.f32 %v4900_v32, %v7019_v47  ;;  %v7035_v47 = vld [vmem:[#allocation43_spill] sm:$0xff] }
 0x831   : > { %v3087_v25 = vadd.f32 1.0, %v4902_v17 }
 0x832   : > { %3321 = vperm.xlu1 %4477, %v3179_v27   ;;  %v7036_v27 = vmax.f32 %v7035_v47, 0.0 }
 0x833   : > { %4909 = vrcp.f32 %v3087_v25 }
 0x834   : > { %v4904_v43 = vpop.eup %4903  ;;  %v1899_v25 = vmul.f32 %v6154_v55, %v7036_v27 }
 0x835   : > { %v3180_v9 = vmul.f32 %v4904_v43, %v7021_v16 }
 0x837   : > { %3326 = vperm.xlu0 %4478, %v3180_v9  }
 0x838   : > { %v4906_v51 = vpop.eup %4905 }
 0x839   : > { %v3181_v13 = vmul.f32 %v4906_v51, %v7023_v19 }
 0x83b   : > { %3331 = vperm.xlu1 %4477, %v3181_v13  }
 0x83c   : > { %v4908_v44 = vpop.eup %4907 }
 0x83d   : > { %v3182_v5 = vmul.f32 %v4908_v44, %v7025_v45 }
 0x83f   : > { %3336 = vperm.xlu0 %4478, %v3182_v5  }
 0x840   : > { %v4910_v10 = vpop.eup %4909  ;;  %v3187_v49 = vpop.permute.xlu1 %3186 }
 0x841   : > { %v3183_v53 = vmul.f32 %v4910_v10, %v7029_v39  ;;  %3505 = vst [vmem:[%s6288_s8 + $0x8] sm:$0xff] %v3187_v49 }
 0x843   : > { %3436 = vrot.lane.b32.xlu0 %v2735_v2, %s4984_s14  ;;  %3341 = vperm.xlu1 %4477, %v3183_v53  }
 0x844   : > { %v3192_v57 = vpop.permute.xlu0 %3191 }
 0x845   : > { %3507 = vst [vmem:[%s6288_s8 + $0x18] sm:$0xff] %v3192_v57 }
 0x847   : > { %3438 = vrot.lane.b32.xlu1 %v2736_v28, %s4984_s14 }
 0x848   : > { %v3197_v33 = vpop.permute.xlu1 %3196 }
 0x849   : > { %3509 = vst [vmem:[%s6288_s8 + $0x28] sm:$0xff] %v3197_v33 }
 0x84c   : > { %v3202_v4 = vpop.permute.xlu1 %3201 }
 0x84d   : > { %3511 = vst [vmem:[%s6288_s8 + $0x38] sm:$0xff] %v3202_v4 }
 0x852   : > { %v3207_v37 = vpop.permute.xlu0 %3206 }
 0x853   : > { %3513 = vst [vmem:[%s6288_s8 + $0x48] sm:$0xff] %v3207_v37 }
 0x856   : > { %v3212_v7 = vpop.permute.xlu1 %3211 }
 0x857   : > { %3515 = vst [vmem:[%s6288_s8 + $0x58] sm:$0xff] %v3212_v7 }
 0x85a   : > { %v3217_v62 = vpop.permute.xlu0 %3216 }
 0x85b   : > { %3517 = vst [vmem:[%s6288_s8 + $0x68] sm:$0xff] %v3217_v62 }
 0x85e   : > { %v3222_v50 = vpop.permute.xlu1 %3221 }
 0x85f   : > { %3519 = vst [vmem:[%s6288_s8 + $0x78] sm:$0xff] %v3222_v50 }
 0x861   : > { %v3227_v54 = vpop.permute.xlu0 %3226 }
 0x862   : > { %3521 = vst [vmem:[%s6288_s8 + $0x88] sm:$0xff] %v3227_v54 }
 0x865   : > { %v3232_v56 = vpop.permute.xlu1 %3231 }
 0x866   : > { %3523 = vst [vmem:[%s6288_s8 + $0x98] sm:$0xff] %v3232_v56 }
 0x869   : > { %v3237_v23 = vpop.permute.xlu0 %3236 }
 0x86a   : > { %3525 = vst [vmem:[%s6288_s8 + $0xa8] sm:$0xff] %v3237_v23 }
 0x86d   : > { %v3242_v11 = vpop.permute.xlu1 %3241 }
 0x86e   : > { %3527 = vst [vmem:[%s6288_s8 + $0xb8] sm:$0xff] %v3242_v11 }
 0x872   : > { %v3247_v21 = vpop.permute.xlu0 %3246 }
 0x873   : > { %3529 = vst [vmem:[%s6288_s8 + $0xc8] sm:$0xff] %v3247_v21 }
 0x876   : > { %v3252_v8 = vpop.permute.xlu1 %3251 }
 0x877   : > { %3531 = vst [vmem:[%s6288_s8 + $0xd8] sm:$0xff] %v3252_v8 }
 0x87a   : > { %v3257_v52 = vpop.permute.xlu0 %3256 }
 0x87b   : > { %3533 = vst [vmem:[%s6288_s8 + $0xe8] sm:$0xff] %v3257_v52 }
 0x87e   : > { %v3262_v48 = vpop.permute.xlu1 %3261 }
 0x87f   : > { %3535 = vst [vmem:[%s6288_s8 + $0xf8] sm:$0xff] %v3262_v48 }
 0x881   : > { %v3267_v36 = vpop.permute.xlu0 %3266 }
 0x882   : > { %3537 = vst [vmem:[%s6288_s8 + $0x108] sm:$0xff] %v3267_v36 }
 0x885   : > { %v3272_v1 = vpop.permute.xlu1 %3271 }
 0x886   : > { %3539 = vst [vmem:[%s6288_s8 + $0x118] sm:$0xff] %v3272_v1 }
 0x889   : > { %v3277_v18 = vpop.permute.xlu0 %3276 }
 0x88a   : > { %3541 = vst [vmem:[%s6288_s8 + $0x128] sm:$0xff] %v3277_v18 }
 0x88d   : > { %v3282_v12 = vpop.permute.xlu1 %3281 }
 0x88e   : > { %3543 = vst [vmem:[%s6288_s8 + $0x138] sm:$0xff] %v3282_v12 }
 0x892   : > { %v3287_v41 = vpop.permute.xlu0 %3286 }
 0x893   : > { %3545 = vst [vmem:[%s6288_s8 + $0x148] sm:$0xff] %v3287_v41 }
 0x896   : > { %v3292_v42 = vpop.permute.xlu1 %3291 }
 0x897   : > { %3547 = vst [vmem:[%s6288_s8 + $0x158] sm:$0xff] %v3292_v42 }
 0x89a   : > { %v3297_v22 = vpop.permute.xlu0 %3296 }
 0x89b   : > { %3549 = vst [vmem:[%s6288_s8 + $0x168] sm:$0xff] %v3297_v22 }
 0x89e   : > { %v3302_v26 = vpop.permute.xlu1 %3301 }
 0x89f   : > { %3551 = vst [vmem:[%s6288_s8 + $0x178] sm:$0xff] %v3302_v26 }
 0x8a1   : > { %v3307_v40 = vpop.permute.xlu0 %3306 }
 0x8a2   : > { %3553 = vst [vmem:[%s6288_s8 + $0x188] sm:$0xff] %v3307_v40 }
 0x8a5   : > { %v3312_v34 = vpop.permute.xlu1 %3311 }
 0x8a6   : > { %3555 = vst [vmem:[%s6288_s8 + $0x198] sm:$0xff] %v3312_v34 }
 0x8a9   : > { %v3317_v58 = vpop.permute.xlu0 %3316 }
 0x8aa   : > { %3557 = vst [vmem:[%s6288_s8 + $0x1a8] sm:$0xff] %v3317_v58 }
 0x8ad   : > { %v3322_v3 = vpop.permute.xlu1 %3321 }
 0x8ae   : > { %3559 = vst [vmem:[%s6288_s8 + $0x1b8] sm:$0xff] %v3322_v3 }
 0x8b2   : > { %v3327_v20 = vpop.permute.xlu0 %3326 }
 0x8b3   : > { %3561 = vst [vmem:[%s6288_s8 + $0x1c8] sm:$0xff] %v3327_v20 }
 0x8b6   : > { %v3332_v31 = vpop.permute.xlu1 %3331 }
 0x8b7   : > { %3563 = vst [vmem:[%s6288_s8 + $0x1d8] sm:$0xff] %v3332_v31 }
 0x8ba   : > { %v3337_v0 = vpop.permute.xlu0 %3336 }
 0x8bb   : > { %3565 = vst [vmem:[%s6288_s8 + $0x1e8] sm:$0xff] %v3337_v0 }
 0x8be   : > { %v3437_v32 = vpop.permute.xlu0 %3436  ;;  %v3342_v17 = vpop.permute.xlu1 %3341 }
 0x8bf   : > { %v3502_v24 = vsel %vm1090_vm1, %v1898_v35, %v3437_v32  ;;  %3567 = vst [vmem:[%s6288_s8 + $0x1f8] sm:$0xff] %v3342_v17 }
 0x8c0   : > { %3564 = vst [vmem:[%s6288_s8 + $0x1e0] sm:$0xff] %v3502_v24 }
 0x8c2   : > { %v3439_v43 = vpop.permute.xlu1 %3438 }
 0x8c3   : > { %v3503_v14 = vsel %vm1090_vm1, %v1899_v25, %v3439_v43 }
 0x8c4   : > { %3566 = vst [vmem:[%s6288_s8 + $0x1f0] sm:$0xff] %v3503_v14 }
 0x8c5 PF: > { %s24_s17 = sadd.s32 1, %s4980_s17  }
 0x8c6   : > { %p21_p5 = scmp.ge.s32.totalorder %s24_s17, 4  }
 0x8c8   :  { %23 = sbr.rel (!%p21_p5) target bundleno = 3 (0x3), region = 93 }

// kernel: psgcn_forward.4
= control target key start
LH: loop header
LB: loop body
LE: loop exit
PB: predicated region body
PF: predicated region fallthrough
CT: control target
= control target key end

     0   :  { %s1578_s18 = smov 0   ;;  %s2269_s0 = inlined_call_operand.vmem [shape: f32[480,256], index: 0, kind: input, shape index: {}]   ;;  %s2270_s1 = inlined_call_operand.vmem [shape: f32[256,16], index: 1, kind: input, shape index: {}]   ;;  %s2271_s2 = inlined_call_operand.vmem [shape: f32[1,16], index: 2, kind: input, shape index: {}]   ;;  %s2272_s3 = inlined_call_operand.vmem [shape: f32[80,32], index: 3, kind: input, shape index: {}]   ;;  %s2273_s4 = inlined_call_operand.vmem [shape: f32[1,32], index: 4, kind: input, shape index: {}]   ;;  %s2274_s5 = inlined_call_operand.vmem [shape: f32[240,32], index: 5, kind: output, shape index: {}]  }
   0x1 LB: > { %s1200_s19 = sadd.s32 4294967295, %s1541_s18   ;;  %p1204_p0 = scmp.ge.s32.totalorder %s1541_s18, 1  ;;  %s1541_s18 = sphi %s1578_s18, %s15_s18  }
   0x2   : > { %p189_p1 = scmp.lt.s32.totalorder %s1541_s18, 3 }
   0x4   : > { %p190_p2 = pnand %p1204_p0, %p189_p1 }
   0x5   : > { %s218_s26 = smul.u32 (!%p190_p2), 30, %s1200_s19  ;;  %s1543_s22 = smov (!%p190_p2), 16  }
   0x6   : > { %193 = sbr.rel (%p190_p2) target bundleno = 695 (0x2b7), region = 40  ;;  %s1544_s23 = smov (!%p190_p2), 32  }
   0x7   : > { %p219_p3 = scmp.lt.s32.totalorder (!%p190_p2), %s218_s26, 59  ;;  %s1545_s24 = smov (!%p190_p2), 48  }
   0xb   : > { %v352_v0 = vld [vmem:[%s2270_s1 + $0xf0] sm:$0xff]  ;;  %v353_v1 = vld [vmem:[%s2270_s1 + $0xf8] sm:$0xff]  ;;  %v350_v5 = vld [vmem:[%s2270_s1 + $0xe0] sm:$0xff]  ;;  %s2276_s26 = smov (!%p219_p3, %s218_s26), 59  ;;  %vm591_vm0 = vcmask 1046528   ;;  %vm668_vm1 = vcmask 1045504  }
   0xc   : > { %v336_v2 = vld [vmem:[%s2270_s1 + $0x70] sm:$0xff]  ;;  %v369_v3 = vpack.c.bf16 %v353_v1, %v352_v0  ;;  %v337_v4 = vld [vmem:[%s2270_s1 + $0x78] sm:$0xff]  ;;  %v351_v6 = vld [vmem:[%s2270_s1 + $0xe8] sm:$0xff]  ;;  %s1220_s27 = sshll.u32 %s2276_s26, 4  ;;  %vm745_vm2 = vcmask 1044480   ;;  %vm822_vm3 = vcmask 1043456  }
   0xd   : > { %v361_v7 = vpack.c.bf16 %v337_v4, %v336_v2  ;;  %v368_v8 = vpack.c.bf16 %v351_v6, %v350_v5  ;;  %v334_v9 = vld [vmem:[%s2270_s1 + $0x60] sm:$0xff]  ;;  %v335_v10 = vld [vmem:[%s2270_s1 + $0x68] sm:$0xff]  ;;  %v348_v11 = vld [vmem:[%s2270_s1 + $0xd0] sm:$0xff]  ;;  %s1633_s30 = scalar_lea.vmem %s2269_s0, %s1220_s27  ;;  %s1546_s26 = smov 64   ;;  %vm899_vm4 = vcmask 130048   ;;  %vm915_vm5 = vcmask 261120  }
   0xe   : > { %1221 = vmatprep.subr.bf16.mxu0 %v369_v3  ;;  %v349_v12 = vld [vmem:[%s2270_s1 + $0xd8] sm:$0xff]  ;;  %1366 = vmatprep.subr.bf16.mxu1 %v369_v3  ;;  %v360_v13 = vpack.c.bf16 %v335_v10, %v334_v9  ;;  %v332_v15 = vld [vmem:[%s2270_s1 + $0x50] sm:$0xff]  ;;  %v346_v17 = vld [vmem:[%s2270_s1 + $0xc0] sm:$0xff]  ;;  %vm931_vm6 = vcmask 392192   ;;  %vm947_vm7 = vcmask 523264   ;;  %vm993_vm8 = vcmask 654336  }
   0xf   : > { %1222 = vmatpush3.bf16.msra.mxu0 %v361_v7  ;;  %1374 = vmatpush3.bf16.msra.mxu1 %v361_v7  ;;  %v367_v14 = vpack.c.bf16 %v349_v12, %v348_v11  ;;  %v333_v16 = vld [vmem:[%s2270_s1 + $0x58] sm:$0xff]  ;;  %v347_v18 = vld [vmem:[%s2270_s1 + $0xc8] sm:$0xff]  ;;  %v330_v21 = vld [vmem:[%s2270_s1 + $0x40] sm:$0xff] }
  0x10   : > { %1223 = vmatprep.subr.bf16.mxu0 %v368_v8  ;;  %1367 = vmatprep.subr.bf16.mxu1 %v368_v8  ;;  %v359_v19 = vpack.c.bf16 %v333_v16, %v332_v15  ;;  %v366_v20 = vpack.c.bf16 %v347_v18, %v346_v17  ;;  %v331_v22 = vld [vmem:[%s2270_s1 + $0x48] sm:$0xff]  ;;  %v344_v23 = vld [vmem:[%s2270_s1 + $0xb0] sm:$0xff]  ;;  %v345_v24 = vld [vmem:[%s2270_s1 + $0xb8] sm:$0xff] }
  0x11   : > { %v233_v25 = vld [vmem:[%s1633_s30 + $0x8] sm:$0xff]  ;;  %v235_v26 = vld [vmem:[%s1633_s30 + $0x18] sm:$0xff]  ;;  %v358_v27 = vpack.c.bf16 %v331_v22, %v330_v21  ;;  %v365_v29 = vpack.c.bf16 %v345_v24, %v344_v23  ;;  %v328_v30 = vld [vmem:[%s2270_s1 + $0x30] sm:$0xff] }
  0x12   : > { %v293_v28 = vpack.c.bf16 %v235_v26, %v233_v25  ;;  %v329_v31 = vld [vmem:[%s2270_s1 + $0x38] sm:$0xff]  ;;  %v342_v32 = vld [vmem:[%s2270_s1 + $0xa0] sm:$0xff]  ;;  %v343_v33 = vld [vmem:[%s2270_s1 + $0xa8] sm:$0xff] }
  0x13   : > { %1224 = vmatpush3.bf16.msra.mxu0 %v360_v13  ;;  %1375 = vmatpush3.bf16.msra.mxu1 %v360_v13  ;;  %v273_v34 = vld [vmem:[%s1633_s30 + $0x148] sm:$0xff]  ;;  %v275_v35 = vld [vmem:[%s1633_s30 + $0x158] sm:$0xff]  ;;  %v357_v36 = vpack.c.bf16 %v329_v31, %v328_v30  ;;  %v364_v38 = vpack.c.bf16 %v343_v33, %v342_v32  ;;  %v326_v39 = vld [vmem:[%s2270_s1 + $0x20] sm:$0xff] }
  0x14   : > { %1225 = vmatprep.subr.bf16.mxu0 %v367_v14  ;;  %1368 = vmatprep.subr.bf16.mxu1 %v367_v14  ;;  %v313_v37 = vpack.c.bf16 %v275_v35, %v273_v34  ;;  %v327_v40 = vld [vmem:[%s2270_s1 + $0x28] sm:$0xff]  ;;  %v340_v41 = vld [vmem:[%s2270_s1 + $0x90] sm:$0xff]  ;;  %v341_v42 = vld [vmem:[%s2270_s1 + $0x98] sm:$0xff] }
  0x15   : > { %409 = vmatprep.mubr.bf16.mxu0 %v293_v28  ;;  %v356_v43 = vpack.c.bf16 %v327_v40, %v326_v39  ;;  %v363_v44 = vpack.c.bf16 %v341_v42, %v340_v41  ;;  %v324_v45 = vld [vmem:[%s2270_s1 + $0x10] sm:$0xff]  ;;  %v325_v46 = vld [vmem:[%s2270_s1 + $0x18] sm:$0xff]  ;;  %v338_v47 = vld [vmem:[%s2270_s1 + $0x80] sm:$0xff] }
  0x16   : > { %489 = vmatprep.mubr.bf16.mxu1 %v313_v37  ;;  %v339_v48 = vld [vmem:[%s2270_s1 + $0x88] sm:$0xff]  ;;  %v355_v49 = vpack.c.bf16 %v325_v46, %v324_v45  ;;  %v322_v51 = vld [vmem:[%s2270_s1] sm:$0xff]  ;;  %v234_v54 = vld [vmem:[%s1633_s30 + $0x10] sm:$0xff] }
  0x17   : > { %1226 = vmatpush3.bf16.msra.mxu0 %v359_v19  ;;  %1376 = vmatpush3.bf16.msra.mxu1 %v359_v19  ;;  %v362_v50 = vpack.c.bf16 %v339_v48, %v338_v47  ;;  %v323_v52 = vld [vmem:[%s2270_s1 + $0x8] sm:$0xff]  ;;  %v232_v53 = vld [vmem:[%s1633_s30] sm:$0xff]  ;;  %v274_v58 = vld [vmem:[%s1633_s30 + $0x150] sm:$0xff] }
  0x18   : > { %1227 = vmatprep.subr.bf16.mxu0 %v366_v20  ;;  %1369 = vmatprep.subr.bf16.mxu1 %v366_v20  ;;  %v354_v55 = vpack.c.bf16 %v323_v52, %v322_v51  ;;  %v237_v56 = vld [vmem:[%s1633_s30 + $0x28] sm:$0xff]  ;;  %v272_v57 = vld [vmem:[%s1633_s30 + $0x140] sm:$0xff]  ;;  %v239_v59 = vld [vmem:[%s1633_s30 + $0x38] sm:$0xff]  ;;  %v292_v62 = vpack.c.bf16 %v234_v54, %v232_v53 }
  0x19   : > { %v277_v60 = vld [vmem:[%s1633_s30 + $0x168] sm:$0xff]  ;;  %v279_v61 = vld [vmem:[%s1633_s30 + $0x178] sm:$0xff]  ;;  %v312_v63 = vpack.c.bf16 %v274_v58, %v272_v57  ;;  %v295_v0 = vpack.c.bf16 %v239_v59, %v237_v56  ;;  %v236_v2 = vld [vmem:[%s1633_s30 + $0x20] sm:$0xff] }
  0x1a   : > { %v315_v1 = vpack.c.bf16 %v279_v61, %v277_v60  ;;  %v238_v3 = vld [vmem:[%s1633_s30 + $0x30] sm:$0xff]  ;;  %v241_v4 = vld [vmem:[%s1633_s30 + $0x48] sm:$0xff]  ;;  %v276_v5 = vld [vmem:[%s1633_s30 + $0x160] sm:$0xff] }
  0x1b   : > { %1228 = vmatpush3.bf16.msra.mxu0 %v358_v27  ;;  %1377 = vmatpush3.bf16.msra.mxu1 %v358_v27  ;;  %v278_v6 = vld [vmem:[%s1633_s30 + $0x170] sm:$0xff]  ;;  %v243_v7 = vld [vmem:[%s1633_s30 + $0x58] sm:$0xff]  ;;  %v281_v8 = vld [vmem:[%s1633_s30 + $0x188] sm:$0xff]  ;;  %v294_v10 = vpack.c.bf16 %v238_v3, %v236_v2 }
  0x1c   : > { %1229 = vmatprep.subr.bf16.mxu0 %v365_v29  ;;  %1370 = vmatprep.subr.bf16.mxu1 %v365_v29  ;;  %v283_v9 = vld [vmem:[%s1633_s30 + $0x198] sm:$0xff]  ;;  %v314_v11 = vpack.c.bf16 %v278_v6, %v276_v5  ;;  %v297_v12 = vpack.c.bf16 %v243_v7, %v241_v4  ;;  %v240_v14 = vld [vmem:[%s1633_s30 + $0x40] sm:$0xff]  ;;  %v242_v15 = vld [vmem:[%s1633_s30 + $0x50] sm:$0xff] }
  0x1d   : > { %v317_v13 = vpack.c.bf16 %v283_v9, %v281_v8  ;;  %v245_v16 = vld [vmem:[%s1633_s30 + $0x68] sm:$0xff]  ;;  %v280_v17 = vld [vmem:[%s1633_s30 + $0x180] sm:$0xff]  ;;  %v282_v18 = vld [vmem:[%s1633_s30 + $0x190] sm:$0xff]  ;;  %v296_v22 = vpack.c.bf16 %v242_v15, %v240_v14 }
  0x1e   : > { %v247_v19 = vld [vmem:[%s1633_s30 + $0x78] sm:$0xff]  ;;  %v285_v20 = vld [vmem:[%s1633_s30 + $0x1a8] sm:$0xff]  ;;  %v316_v23 = vpack.c.bf16 %v282_v18, %v280_v17  ;;  %v244_v26 = vld [vmem:[%s1633_s30 + $0x60] sm:$0xff] }
  0x1f   : > { %1230 = vmatpush3.bf16.msra.mxu0 %v357_v36  ;;  %1378 = vmatpush3.bf16.msra.mxu1 %v357_v36  ;;  %v287_v21 = vld [vmem:[%s1633_s30 + $0x1b8] sm:$0xff]  ;;  %v299_v24 = vpack.c.bf16 %v247_v19, %v245_v16  ;;  %v246_v27 = vld [vmem:[%s1633_s30 + $0x70] sm:$0xff]  ;;  %v249_v28 = vld [vmem:[%s1633_s30 + $0x88] sm:$0xff] }
  0x20   : > { %1231 = vmatprep.subr.bf16.mxu0 %v364_v38  ;;  %1371 = vmatprep.subr.bf16.mxu1 %v364_v38  ;;  %v319_v25 = vpack.c.bf16 %v287_v21, %v285_v20  ;;  %v284_v29 = vld [vmem:[%s1633_s30 + $0x1a0] sm:$0xff]  ;;  %v286_v30 = vld [vmem:[%s1633_s30 + $0x1b0] sm:$0xff]  ;;  %v251_v31 = vld [vmem:[%s1633_s30 + $0x98] sm:$0xff]  ;;  %v298_v34 = vpack.c.bf16 %v246_v27, %v244_v26 }
  0x21   : > { %v289_v32 = vld [vmem:[%s1633_s30 + $0x1c8] sm:$0xff]  ;;  %v291_v33 = vld [vmem:[%s1633_s30 + $0x1d8] sm:$0xff]  ;;  %v318_v35 = vpack.c.bf16 %v286_v30, %v284_v29  ;;  %v301_v36 = vpack.c.bf16 %v251_v31, %v249_v28  ;;  %v248_v38 = vld [vmem:[%s1633_s30 + $0x80] sm:$0xff] }
  0x22   : > { %v321_v37 = vpack.c.bf16 %v291_v33, %v289_v32  ;;  %v250_v39 = vld [vmem:[%s1633_s30 + $0x90] sm:$0xff]  ;;  %v288_v40 = vld [vmem:[%s1633_s30 + $0x1c0] sm:$0xff]  ;;  %v253_v42 = vld [vmem:[%s1633_s30 + $0xa8] sm:$0xff] }
  0x23   : > { %1232 = vmatpush3.bf16.msra.mxu0 %v356_v43  ;;  %1379 = vmatpush3.bf16.msra.mxu1 %v356_v43  ;;  %v290_v41 = vld [vmem:[%s1633_s30 + $0x1d0] sm:$0xff]  ;;  %v255_v43 = vld [vmem:[%s1633_s30 + $0xb8] sm:$0xff]  ;;  %v252_v47 = vld [vmem:[%s1633_s30 + $0xa0] sm:$0xff] }
  0x24   : > { %1233 = vmatprep.subr.bf16.mxu0 %v363_v44  ;;  %1372 = vmatprep.subr.bf16.mxu1 %v363_v44  ;;  %v300_v44 = vpack.c.bf16 %v250_v39, %v248_v38  ;;  %v320_v45 = vpack.c.bf16 %v290_v41, %v288_v40  ;;  %v303_v46 = vpack.c.bf16 %v255_v43, %v253_v42  ;;  %v254_v48 = vld [vmem:[%s1633_s30 + $0xb0] sm:$0xff]  ;;  %v256_v53 = vld [vmem:[%s1633_s30 + $0xc0] sm:$0xff]  ;;  %v263_v56 = vld [vmem:[%s1633_s30 + $0xf8] sm:$0xff] }
  0x25   : > { %v302_v51 = vpack.c.bf16 %v254_v48, %v252_v47  ;;  %v258_v54 = vld [vmem:[%s1633_s30 + $0xd0] sm:$0xff]  ;;  %v260_v59 = vld [vmem:[%s1633_s30 + $0xe0] sm:$0xff]  ;;  %v265_v61 = vld [vmem:[%s1633_s30 + $0x108] sm:$0xff] }
  0x26   : > { %v304_v57 = vpack.c.bf16 %v258_v54, %v256_v53  ;;  %v262_v60 = vld [vmem:[%s1633_s30 + $0xf0] sm:$0xff]  ;;  %v269_v3 = vld [vmem:[%s1633_s30 + $0x128] sm:$0xff]  ;;  %v271_v4 = vld [vmem:[%s1633_s30 + $0x138] sm:$0xff] }
  0x27   : > { %1234 = vmatpush3.bf16.msra.mxu0 %v355_v49  ;;  %1380 = vmatpush3.bf16.msra.mxu1 %v355_v49  ;;  %v257_v49 = vld [vmem:[%s1633_s30 + $0xc8] sm:$0xff]  ;;  %v266_v2 = vld [vmem:[%s1633_s30 + $0x110] sm:$0xff]  ;;  %v311_v6 = vpack.c.bf16 %v271_v4, %v269_v3  ;;  %v268_v7 = vld [vmem:[%s1633_s30 + $0x120] sm:$0xff] }
  0x28   : > { %1235 = vmatprep.subr.bf16.mxu0 %v362_v50  ;;  %1373 = vmatprep.subr.bf16.mxu1 %v362_v50  ;;  %v259_v50 = vld [vmem:[%s1633_s30 + $0xd8] sm:$0xff]  ;;  %v270_v8 = vld [vmem:[%s1633_s30 + $0x130] sm:$0xff] }
  0x29   : > { %v305_v52 = vpack.c.bf16 %v259_v50, %v257_v49  ;;  %v310_v9 = vpack.c.bf16 %v270_v8, %v268_v7 }
  0x2b   : > { %1236 = vmatpush3.bf16.msra.mxu0 %v354_v55  ;;  %1381 = vmatpush3.bf16.msra.mxu1 %v354_v55  ;;  %v261_v55 = vld [vmem:[%s1633_s30 + $0xe8] sm:$0xff] }
  0x2c   : > { %v307_v58 = vpack.c.bf16 %v263_v56, %v261_v55 }
  0x2e   : > { %410 = vmatmul.mubr.bf16.vlgmr.msra.gmra.mxu0 %v292_v62  ;;  %490 = vmatmul.mubr.bf16.vlgmr.msra.gmra.mxu1 %v312_v63  ;;  %v267_v62 = vld [vmem:[%s1633_s30 + $0x118] sm:$0xff]  ;;  %v306_v63 = vpack.c.bf16 %v262_v60, %v260_v59 }
  0x2f   : > { %417 = vmatprep.mubr.bf16.mxu0 %v295_v0  ;;  %497 = vmatprep.mubr.bf16.mxu1 %v315_v1  ;;  %v309_v0 = vpack.c.bf16 %v267_v62, %v265_v61  ;;  %v264_v1 = vld [vmem:[%s1633_s30 + $0x100] sm:$0xff] }
  0x30   : > { %v308_v5 = vpack.c.bf16 %v266_v2, %v264_v1 }
  0x36   : > { %418 = vmatmul.mubr.bf16.gmra.mxu0 %v294_v10  ;;  %498 = vmatmul.mubr.bf16.gmra.mxu1 %v314_v11 }
  0x37   : > { %425 = vmatprep.mubr.bf16.mxu0 %v297_v12  ;;  %505 = vmatprep.mubr.bf16.mxu1 %v317_v13 }
  0x3e   : > { %426 = vmatmul.mubr.bf16.gmra.mxu0 %v296_v22  ;;  %506 = vmatmul.mubr.bf16.gmra.mxu1 %v316_v23 }
  0x3f   : > { %433 = vmatprep.mubr.bf16.mxu0 %v299_v24  ;;  %513 = vmatprep.mubr.bf16.mxu1 %v319_v25 }
  0x46   : > { %434 = vmatmul.mubr.bf16.gmra.mxu0 %v298_v34  ;;  %514 = vmatmul.mubr.bf16.gmra.mxu1 %v318_v35  ;;  %v1766_v34 = vld [vmem:[%s2271_s2] ss:$0 sm:$0xff] }
  0x47   : > { %441 = vmatprep.mubr.bf16.mxu0 %v301_v36  ;;  %521 = vmatprep.mubr.bf16.mxu1 %v321_v37 }
  0x4e   : > { %442 = vmatmul.mubr.bf16.gmra.mxu0 %v300_v44  ;;  %522 = vmatmul.mubr.bf16.gmra.mxu1 %v320_v45 }
  0x4f   : > { %449 = vmatprep.mubr.bf16.mxu0 %v303_v46 }
  0x56   : > { %450 = vmatmul.mubr.bf16.gmra.mxu0 %v302_v51 }
  0x57   : > { %457 = vmatprep.mubr.bf16.mxu0 %v305_v52 }
  0x5e   : > { %458 = vmatmul.mubr.bf16.gmra.mxu0 %v304_v57 }
  0x5f   : > { %465 = vmatprep.mubr.bf16.mxu0 %v307_v58 }
  0x66   : > { %466 = vmatmul.mubr.bf16.gmra.mxu0 %v306_v63 }
  0x67   : > { %473 = vmatprep.mubr.bf16.mxu0 %v309_v0 }
  0x6e   : > { %474 = vmatmul.mubr.bf16.gmra.mxu0 %v308_v5 }
  0x6f   : > { %481 = vmatprep.mubr.bf16.mxu0 %v311_v6 }
  0x76   : > { %482 = vmatmul.mubr.bf16.gmra.mxu0 %v310_v9 }
  0xee   : > { %v1237_v10 = vpop.f32.mrf.mxu0  ;;  %v1297_v11 = vpop.f32.mrf.mxu1 }
  0xf0   : > { %v1238_v12 = vpop.f32.mrf.mxu0  ;;  %v1298_v13 = vpop.f32.mrf.mxu1 }
  0xf1   : > { %v1749_v14 = vadd.f32 %v1238_v12, %v1237_v10  ;;  %v1299_v15 = vadd.f32 %v1298_v13, %v1297_v11 }
  0xf2   : > { %v1240_v16 = vpop.f32.mrf.mxu0  ;;  %v1300_v17 = vpop.f32.mrf.mxu1 }
  0xf3   : > { %v492_v36 = vadd.f32 %v1299_v15, %v1766_v34 }
  0xf4   : > { %v1241_v18 = vpop.f32.mrf.mxu0  ;;  %v1301_v19 = vpop.f32.mrf.mxu1 }
  0xf5   : > { %v1751_v20 = vadd.f32 %v1241_v18, %v1240_v16  ;;  %v550_v42 = vmax.f32 %v492_v36, 0.0  ;;  %v1302_v46 = vadd.f32 %v1301_v19, %v1300_v17 }
  0xf6   : > { %v1753_v21 = vpop.f32.mrf.mxu0  ;;  %v1303_v22 = vpop.f32.mrf.mxu1 }
  0xf7   : > { %v495_v55 = vadd.f32 %v1302_v46, %v1766_v34 }
  0xf8   : > { %v1755_v23 = vpop.f32.mrf.mxu0  ;;  %v1304_v24 = vpop.f32.mrf.mxu1 }
  0xf9   : > { %v1305_v43 = vadd.f32 %v1304_v24, %v1303_v22  ;;  %v551_v1 = vmax.f32 %v495_v55, 0.0 }
  0xfa   : > { %v1246_v25 = vpop.f32.mrf.mxu0  ;;  %v1306_v26 = vpop.f32.mrf.mxu1 }
  0xfb   : > { %v500_v51 = vadd.f32 %v1305_v43, %v1766_v34 }
  0xfc   : > { %v1247_v27 = vpop.f32.mrf.mxu0  ;;  %v1307_v28 = vpop.f32.mrf.mxu1 }
  0xfd   : > { %v1757_v29 = vadd.f32 %v1247_v27, %v1246_v25  ;;  %v1308_v52 = vadd.f32 %v1307_v28, %v1306_v26  ;;  %v552_v60 = vmax.f32 %v500_v51, 0.0 }
  0xfe   : > { %v1759_v30 = vpop.f32.mrf.mxu0  ;;  %v1309_v31 = vpop.f32.mrf.mxu1 }
  0xff   : > { %v503_v61 = vadd.f32 %v1308_v52, %v1766_v34 }
 0x100   : > { %v1761_v32 = vpop.f32.mrf.mxu0  ;;  %v1310_v33 = vpop.f32.mrf.mxu1 }
 0x101   : > { %v1311_v62 = vadd.f32 %v1310_v33, %v1309_v31  ;;  %v553_v9 = vmax.f32 %v503_v61, 0.0 }
 0x102   : > { %v1252_v35 = vpop.f32.mrf.mxu0  ;;  %v1312_v37 = vpop.f32.mrf.mxu1 }
 0x103   : > { %v508_v10 = vadd.f32 %v1311_v62, %v1766_v34 }
 0x104   : > { %v1253_v38 = vpop.f32.mrf.mxu0  ;;  %v1313_v44 = vpop.f32.mrf.mxu1 }
 0x105   : > { %v1254_v39 = vadd.f32 %v1253_v38, %v1252_v35  ;;  %v1314_v6 = vadd.f32 %v1313_v44, %v1312_v37  ;;  %v554_v25 = vmax.f32 %v508_v10, 0.0 }
 0x106   : > { %v1255_v40 = vpop.f32.mrf.mxu0  ;;  %v1315_v53 = vpop.f32.mrf.mxu1 }
 0x107   : > { %v431_v41 = vadd.f32 %v1254_v39, %v1766_v34  ;;  %v511_v18 = vadd.f32 %v1314_v6, %v1766_v34 }
 0x108   : > { %v1256_v45 = vpop.f32.mrf.mxu0  ;;  %v1316_v63 = vpop.f32.mrf.mxu1 }
 0x109   : > { %v535_v47 = vmax.f32 %v431_v41, 0.0  ;;  %v1257_v48 = vadd.f32 %v1256_v45, %v1255_v40  ;;  %v1317_v19 = vadd.f32 %v1316_v63, %v1315_v53  ;;  %v555_v38 = vmax.f32 %v511_v18, 0.0 }
 0x10a   : > { %v1258_v49 = vpop.f32.mrf.mxu0  ;;  %v1318_v11 = vpop.f32.mrf.mxu1 }
 0x10b   : > { %v1770_v50 = vmax.f32 %v535_v47, %v550_v42  ;;  %v436_v54 = vadd.f32 %v1257_v48, %v1766_v34  ;;  %v516_v40 = vadd.f32 %v1317_v19, %v1766_v34 }
 0x10c   : > { %v1259_v56 = vpop.f32.mrf.mxu0  ;;  %v1319_v27 = vpop.f32.mrf.mxu1 }
 0x10d   : > { %v1260_v57 = vadd.f32 %v1259_v56, %v1258_v49  ;;  %v536_v0 = vmax.f32 %v436_v54, 0.0  ;;  %v1320_v41 = vadd.f32 %v1319_v27, %v1318_v11  ;;  %v556_v55 = vmax.f32 %v516_v40, 0.0 }
 0x10e   : > { %v1261_v58 = vpop.f32.mrf.mxu0 }
 0x10f   : > { %v439_v59 = vadd.f32 %v1260_v57, %v1766_v34  ;;  %v1781_v12 = vmax.f32 %v536_v0, %v551_v1  ;;  %v519_v57 = vadd.f32 %v1320_v41, %v1766_v34 }
 0x110   : > { %v1262_v2 = vpop.f32.mrf.mxu0 }
 0x111   : > { %v537_v3 = vmax.f32 %v439_v59, 0.0  ;;  %v1263_v4 = vadd.f32 %v1262_v2, %v1261_v58  ;;  %v603_v31 = vrot.slane %v1781_v12, 1  ;;  %v680_v53 = vrot.slane %v1781_v12, 2 }
 0x112   : > { %v1264_v5 = vpop.f32.mrf.mxu0  ;;  %v757_v1 = vrot.slane %v1781_v12, 3  ;;  %v834_v27 = vrot.slane %v1781_v12, 4 }
 0x113   : > { %v1777_v7 = vmax.f32 %v537_v3, %v552_v60  ;;  %v444_v8 = vadd.f32 %v1263_v4, %v1766_v34 }
 0x114   : > { %v1265_v13 = vpop.f32.mrf.mxu0 }
 0x115   : > { %v538_v15 = vmax.f32 %v444_v8, 0.0  ;;  %v1266_v16 = vadd.f32 %v1265_v13, %v1264_v5  ;;  %v605_v26 = vrot.slane %v1777_v7, 1  ;;  %v682_v42 = vrot.slane %v1777_v7, 2 }
 0x116   : > { %v1267_v17 = vpop.f32.mrf.mxu0  ;;  %v759_v58 = vrot.slane %v1777_v7, 3 }
 0x117   : > { %v1784_v22 = vmax.f32 %v538_v15, %v553_v9  ;;  %v447_v24 = vadd.f32 %v1266_v16, %v1766_v34  ;;  %v606_v45 = vsel %vm591_vm0, %v603_v31, %v605_v26  ;;  %v683_v61 = vsel %vm668_vm1, %v680_v53, %v682_v42 }
 0x118   : > { %v1268_v28 = vpop.f32.mrf.mxu0  ;;  %v557_v9 = vmax.f32 %v519_v57, 0.0  ;;  %v760_v11 = vsel %vm745_vm2, %v757_v1, %v759_v58  ;;  %v836_v15 = vrot.slane %v1777_v7, 4 }
 0x119   : > { %v539_v33 = vmax.f32 %v447_v24, 0.0  ;;  %v1269_v35 = vadd.f32 %v1268_v28, %v1267_v17  ;;  %v607_v36 = vrot.slane %v1784_v22, 1  ;;  %v684_v37 = vrot.slane %v1784_v22, 2 }
 0x11a   : > { %v1270_v39 = vpop.f32.mrf.mxu0  ;;  %v761_v49 = vrot.slane %v1784_v22, 3  ;;  %v838_v3 = vrot.slane %v1784_v22, 4 }
 0x11b   : > { %v1793_v43 = vmax.f32 %v539_v33, %v554_v25  ;;  %v452_v44 = vadd.f32 %v1269_v35, %v1766_v34  ;;  %v608_v46 = vsel %vm591_vm0, %v605_v26, %v607_v36  ;;  %v685_v54 = vsel %vm668_vm1, %v682_v42, %v684_v37 }
 0x11c   : > { %v1271_v47 = vpop.f32.mrf.mxu0  ;;  %v1395_v48 = vpack.i.bf16 %v608_v46, %v606_v45  ;;  %v1400_v0 = vpack.i.bf16 %v685_v54, %v683_v61  ;;  %v762_v2 = vsel %vm745_vm2, %v759_v58, %v761_v49  ;;  %v839_v35 = vsel %vm822_vm3, %v836_v15, %v838_v3  ;;  %v979_v45 = vld [vmem:[%s2272_s3 + $0x40] sm:$0xff]  ;;  %v980_v46 = vld [vmem:[%s2272_s3 + $0x48] sm:$0xff]  ;;  %v978_v54 = vld [vmem:[%s2272_s3 + $0x38] sm:$0xff] }
 0x11d   : > { %v540_v51 = vmax.f32 %v452_v44, 0.0  ;;  %v1272_v52 = vadd.f32 %v1271_v47, %v1270_v39  ;;  %v609_v62 = vrot.slane %v1793_v43, 1  ;;  %v686_v13 = vrot.slane %v1793_v43, 2  ;;  %v977_v47 = vld [vmem:[%s2272_s3 + $0x30] sm:$0xff] }
 0x11e   : > { %v1273_v56 = vpop.f32.mrf.mxu0  ;;  %1396 = vrot.lane.b32.xlu1 %v1395_v48, %s1543_s22  ;;  %v1405_v26 = vpack.i.bf16 %v762_v2, %v760_v11  ;;  %v763_v42 = vrot.slane %v1793_v43, 3 }
 0x11f   : > { %v1808_v59 = vmax.f32 %v540_v51, %v555_v38  ;;  %v455_v60 = vadd.f32 %v1272_v52, %v1766_v34  ;;  %v610_v18 = vsel %vm591_vm0, %v607_v36, %v609_v62  ;;  %v837_v36 = vsel %vm822_vm3, %v834_v27, %v836_v15 }
 0x120   : > { %v1274_v63 = vpop.f32.mrf.mxu0  ;;  %v687_v41 = vsel %vm668_vm1, %v684_v37, %v686_v13  ;;  %v1410_v37 = vpack.i.bf16 %v839_v35, %v837_v36  ;;  %v985_v52 = vpack.c.bf16 %v980_v46, %v979_v45  ;;  %v764_v61 = vsel %vm745_vm2, %v761_v49, %v763_v42 }
 0x121   : > { %v541_v4 = vmax.f32 %v455_v60, 0.0  ;;  %v1275_v5 = vadd.f32 %v1274_v63, %v1273_v56  ;;  %v611_v6 = vrot.slane %v1808_v59, 1  ;;  %v688_v8 = vrot.slane %v1808_v59, 2 }
 0x122   : > { %v1822_v10 = vpop.f32.mrf.mxu0  ;;  %1401 = vrot.lane.b32.xlu1 %v1400_v0, %s1544_s23  ;;  %v765_v38 = vrot.slane %v1808_v59, 3  ;;  %v984_v60 = vpack.c.bf16 %v978_v54, %v977_v47  ;;  %1340 = vmatprep.subr.bf16.mxu1 %v985_v52  ;;  %v1251_v46 = vadd.f32 %v1761_v32, %v1759_v30  ;;  %v975_v30 = vld [vmem:[%s2272_s3 + $0x20] sm:$0xff]  ;;  %v976_v32 = vld [vmem:[%s2272_s3 + $0x28] sm:$0xff] }
 0x123   : > { %v1830_v16 = vmax.f32 %v541_v4, %v556_v55  ;;  %v460_v17 = vadd.f32 %v1275_v5, %v1766_v34  ;;  %v612_v19 = vsel %vm591_vm0, %v609_v62, %v611_v6  ;;  %v689_v33 = vsel %vm668_vm1, %v686_v13, %v688_v8  ;;  %1341 = vmatpush3.bf16.msra.mxu1 %v985_v52  ;;  %v1911_v52 = vpop.f32.mrf.mxu1 }
 0x124   : > { %v1835_v24 = vpop.f32.mrf.mxu0  ;;  %v1415_v25 = vpack.i.bf16 %v612_v19, %v610_v18  ;;  %v1420_v51 = vpack.i.bf16 %v689_v33, %v687_v41  ;;  %v766_v55 = vsel %vm745_vm2, %v763_v42, %v765_v38  ;;  %1342 = vmatprep.subr.bf16.mxu1 %v984_v60  ;;  %v415_v18 = vadd.f32 %v1751_v20, %v1766_v34 }
 0x125   : > { %v542_v28 = vmax.f32 %v460_v17, 0.0  ;;  %v613_v44 = vrot.slane %v1830_v16, 1  ;;  %v690_v0 = vrot.slane %v1830_v16, 2  ;;  %v1425_v4 = vpack.i.bf16 %v766_v55, %v764_v61 }
 0x126   : > { %v1843_v39 = vpop.f32.mrf.mxu0  ;;  %1416 = vrot.lane.b32.xlu0 %v1415_v25, %s1543_s22  ;;  %1406 = vrot.lane.b32.xlu1 %v1405_v26, %s1545_s24  ;;  %v1245_v19 = vadd.f32 %v1755_v23, %v1753_v21  ;;  %v412_v26 = vadd.f32 %v1749_v14, %v1766_v34  ;;  %v531_v36 = vmax.f32 %v415_v18, 0.0  ;;  %v423_v21 = vadd.f32 %v1757_v29, %v1766_v34 }
 0x127   : > { %v1850_v40 = vmax.f32 %v542_v28, %v557_v9  ;;  %v614_v62 = vsel %vm591_vm0, %v611_v6, %v613_v44  ;;  %v691_v6 = vsel %vm668_vm1, %v688_v8, %v690_v0  ;;  %1343 = vmatpush3.bf16.msra.mxu1 %v984_v60 }
 0x128   : > { %v1866_v48 = vpop.f32.mrf.mxu0  ;;  %v420_v41 = vadd.f32 %v1245_v19, %v1766_v34  ;;  %v530_v20 = vmax.f32 %v412_v26, 0.0  ;;  %v533_v61 = vmax.f32 %v423_v21, 0.0 }
 0x129   : > { %v615_v56 = vrot.slane %v1850_v40, 1  ;;  %v692_v57 = vrot.slane %v1850_v40, 2 }
 0x12a   : > { %v1282_v58 = vpop.f32.mrf.mxu0  ;;  %1421 = vrot.lane.b32.xlu0 %v1420_v51, %s1544_s23  ;;  %1411 = vrot.lane.b32.xlu1 %v1410_v37, %s1546_s26  ;;  %v532_v37 = vmax.f32 %v420_v41, 0.0 }
 0x12b   : > { %v616_v63 = vsel %vm591_vm0, %v613_v44, %v615_v56  ;;  %v693_v11 = vsel %vm668_vm1, %v690_v0, %v692_v57  ;;  %v428_v0 = vadd.f32 %v1251_v46, %v1766_v34 }
 0x12c   : > { %v1283_v2 = vpop.f32.mrf.mxu0  ;;  %v1430_v5 = vpack.i.bf16 %v616_v63, %v614_v62  ;;  %v1435_v17 = vpack.i.bf16 %v693_v11, %v691_v6  ;;  %v1927_v11 = vpop.f32.mrf.mxu1 }
 0x12d   : > { %v1284_v9 = vadd.f32 %v1283_v2, %v1282_v58 }
 0x12e   : > { %v1285_v49 = vpop.f32.mrf.mxu0  ;;  %1426 = vrot.lane.b32.xlu0 %v1425_v4, %s1545_s24  ;;  %1431 = vrot.lane.b32.xlu1 %v1430_v5, %s1543_s22 }
 0x12f   : > { %v471_v13 = vadd.f32 %v1284_v9, %v1766_v34  ;;  %v983_v9 = vpack.c.bf16 %v976_v32, %v975_v30 }
 0x130   : > { %v1286_v15 = vpop.f32.mrf.mxu0 }
 0x131   : > { %v1287_v25 = vadd.f32 %v1286_v15, %v1285_v49  ;;  %v545_v33 = vmax.f32 %v471_v13, 0.0  ;;  %1344 = vmatprep.subr.bf16.mxu1 %v983_v9 }
 0x132   : > { %v1288_v28 = vpop.f32.mrf.mxu0  ;;  %1436 = vrot.lane.b32.xlu1 %v1435_v17, %s1544_s23  ;;  %1345 = vmatpush3.bf16.msra.mxu1 %v983_v9 }
 0x133   : > { %v476_v8 = vadd.f32 %v1287_v25, %v1766_v34  ;;  %v1909_v47 = vmax.f32 %v530_v20, %v545_v33 }
 0x134   : > { %v1289_v35 = vpop.f32.mrf.mxu0 }
 0x135   : > { %v546_v42 = vmax.f32 %v476_v8, 0.0  ;;  %v1290_v44 = vadd.f32 %v1289_v35, %v1288_v28  ;;  %v669_v4 = vrot.slane %v1909_v47, 2  ;;  %v592_v5 = vrot.slane %v1909_v47, 1 }
 0x136   : > { %v1291_v45 = vpop.f32.mrf.mxu0  ;;  %v534_v35 = vmax.f32 %v428_v0, 0.0  ;;  %v746_v20 = vrot.slane %v1909_v47, 3 }
 0x137   : > { %v1904_v23 = vmax.f32 %v531_v36, %v546_v42  ;;  %v479_v14 = vadd.f32 %v1290_v44, %v1766_v34  ;;  %v1324_v42 = vpop.f32.mrf.mxu1 }
 0x138   : > { %v1292_v51 = vpop.f32.mrf.mxu0 }
 0x139   : > { %v547_v54 = vmax.f32 %v479_v14, 0.0  ;;  %v1293_v55 = vadd.f32 %v1292_v51, %v1291_v45  ;;  %v670_v60 = vrot.slane %v1904_v23, 2  ;;  %v593_v29 = vrot.slane %v1904_v23, 1 }
 0x13a   : > { %v1294_v58 = vpop.f32.mrf.mxu0  ;;  %v747_v19 = vrot.slane %v1904_v23, 3  ;;  %v824_v14 = vrot.slane %v1904_v23, 4 }
 0x13b   : > { %v1915_v62 = vmax.f32 %v532_v37, %v547_v54  ;;  %v484_v63 = vadd.f32 %v1293_v55, %v1766_v34  ;;  %v671_v17 = vsel %vm668_vm1, %v669_v4, %v670_v60  ;;  %v594_v18 = vsel %vm591_vm0, %v592_v5, %v593_v29  ;;  %v973_v54 = vld [vmem:[%s2272_s3 + $0x10] sm:$0xff]  ;;  %v974_v55 = vld [vmem:[%s2272_s3 + $0x18] sm:$0xff] }
 0x13c   : > { %v1295_v2 = vpop.f32.mrf.mxu0  ;;  %v748_v51 = vsel %vm745_vm2, %v746_v20, %v747_v19 }
 0x13d   : > { %v548_v49 = vmax.f32 %v484_v63, 0.0  ;;  %v1296_v6 = vadd.f32 %v1295_v2, %v1294_v58  ;;  %v672_v13 = vrot.slane %v1915_v62, 2  ;;  %v595_v15 = vrot.slane %v1915_v62, 1 }
 0x13e   : > { %v749_v25 = vrot.slane %v1915_v62, 3  ;;  %v826_v21 = vrot.slane %v1915_v62, 4 }
 0x13f   : > { %v1935_v26 = vmax.f32 %v533_v61, %v548_v49  ;;  %v487_v28 = vadd.f32 %v1296_v6, %v1766_v34  ;;  %v673_v8 = vsel %vm668_vm1, %v670_v60, %v672_v13  ;;  %v596_v33 = vsel %vm591_vm0, %v593_v29, %v595_v15  ;;  %v1325_v61 = vpop.f32.mrf.mxu1 }
 0x140   : > { %v1445_v36 = vpack.i.bf16 %v673_v8, %v671_v17  ;;  %v1440_v41 = vpack.i.bf16 %v596_v33, %v594_v18  ;;  %v750_v45 = vsel %vm745_vm2, %v747_v19, %v749_v25  ;;  %v823_v60 = vrot.slane %v1909_v47, 4 }
 0x141   : > { %v549_v44 = vmax.f32 %v487_v28, 0.0  ;;  %v674_v37 = vrot.slane %v1935_v26, 2  ;;  %v1450_v58 = vpack.i.bf16 %v750_v45, %v748_v51  ;;  %v982_v29 = vpack.c.bf16 %v974_v55, %v973_v54  ;;  %v971_v28 = vld [vmem:[%s2272_s3] sm:$0xff] }
 0x142   : > { %1446 = vrot.lane.b32.xlu1 %v1445_v36, %s1544_s23  ;;  %1441 = vrot.lane.b32.xlu0 %v1440_v41, %s1543_s22  ;;  %v827_v30 = vsel %vm822_vm3, %v824_v14, %v826_v21  ;;  %v825_v2 = vsel %vm822_vm3, %v823_v60, %v824_v14  ;;  %v751_v9 = vrot.slane %v1935_v26, 3  ;;  %v597_v49 = vrot.slane %v1935_v26, 1 }
 0x143   : > { %v1946_v46 = vmax.f32 %v534_v35, %v549_v44  ;;  %1346 = vmatprep.subr.bf16.mxu1 %v982_v29  ;;  %v675_v4 = vsel %vm668_vm1, %v672_v13, %v674_v37  ;;  %v1326_v6 = vadd.f32 %v1325_v61, %v1324_v42  ;;  %v1455_v18 = vpack.i.bf16 %v827_v30, %v825_v2  ;;  %v972_v13 = vld [vmem:[%s2272_s3 + $0x8] sm:$0xff] }
 0x144   : > { %1347 = vmatpush3.bf16.msra.mxu1 %v982_v29  ;;  %v842_v19 = vrot.slane %v1808_v59, 4  ;;  %v1281_v8 = vadd.f32 %v1866_v48, %v1843_v39  ;;  %v840_v41 = vrot.slane %v1793_v43, 4  ;;  %v752_v42 = vsel %vm745_vm2, %v749_v25, %v751_v9 }
 0x145   : > { %v676_v63 = vrot.slane %v1946_v46, 2  ;;  %v753_v32 = vrot.slane %v1946_v46, 3  ;;  %v599_v0 = vrot.slane %v1946_v46, 1  ;;  %v830_v36 = vrot.slane %v1946_v46, 4 }
 0x146   : > { %1451 = vrot.lane.b32.xlu0 %v1450_v58, %s1545_s24  ;;  %v598_v44 = vsel %vm591_vm0, %v595_v15, %v597_v49  ;;  %v828_v39 = vrot.slane %v1935_v26, 4  ;;  %v981_v48 = vpack.c.bf16 %v972_v13, %v971_v28  ;;  %v527_v20 = vadd.f32 %v1326_v6, %v1766_v34 }
 0x147   : > { %v677_v5 = vsel %vm668_vm1, %v674_v37, %v676_v63  ;;  %v754_v33 = vsel %vm745_vm2, %v751_v9, %v753_v32  ;;  %v600_v35 = vsel %vm591_vm0, %v597_v49, %v599_v0  ;;  %v468_v51 = vadd.f32 %v1281_v8, %v1766_v34 }
 0x148   : > { %v1465_v17 = vpack.i.bf16 %v677_v5, %v675_v4  ;;  %v1470_v45 = vpack.i.bf16 %v754_v33, %v752_v42  ;;  %v1460_v14 = vpack.i.bf16 %v600_v35, %v598_v44  ;;  %v831_v37 = vsel %vm822_vm3, %v828_v39, %v830_v36  ;;  %1348 = vmatprep.subr.bf16.mxu1 %v981_v48 }
 0x149   : > { %v843_v54 = vsel %vm822_vm3, %v840_v41, %v842_v19  ;;  %v769_v55 = vrot.slane %v1850_v40, 3  ;;  %v1323_v15 = vadd.f32 %v1927_v11, %v1911_v52  ;;  %v601_v25 = vrot.slane %v1770_v50, 1  ;;  %1349 = vmatpush3.bf16.msra.mxu1 %v981_v48 }
 0x14a   : > { %1466 = vrot.lane.b32.xlu1 %v1465_v17, %s1544_s23  ;;  %1456 = vrot.lane.b32.xlu0 %v1455_v18, %s1546_s26  ;;  %v1278_v58 = vadd.f32 %v1835_v24, %v1822_v10  ;;  %v829_v60 = vsel %vm822_vm3, %v826_v21, %v828_v39  ;;  %v841_v29 = vsel %vm822_vm3, %v838_v3, %v840_v41  ;;  %v767_v61 = vrot.slane %v1830_v16, 3 }
 0x14b   : > { %v559_v30 = vmax.f32 %v527_v20, 0.0  ;;  %v1475_v52 = vpack.i.bf16 %v831_v37, %v829_v60  ;;  %v1485_v11 = vpack.i.bf16 %v843_v54, %v841_v29  ;;  %v544_v2 = vmax.f32 %v468_v51, 0.0 }
 0x14c   : > { %v770_v4 = vsel %vm745_vm2, %v767_v61, %v769_v55  ;;  %v602_v5 = vsel %vm591_vm0, %v599_v0, %v601_v25  ;;  %v846_v10 = vrot.slane %v1850_v40, 4  ;;  %v604_v3 = vsel %vm591_vm0, %v601_v25, %v603_v31 }
 0x14d   : > { %v678_v24 = vrot.slane %v1770_v50, 2  ;;  %v463_v21 = vadd.f32 %v1278_v58, %v1766_v34  ;;  %v524_v9 = vadd.f32 %v1323_v15, %v1766_v34  ;;  %v768_v0 = vsel %vm745_vm2, %v765_v38, %v767_v61 }
 0x14e   : > { %1471 = vrot.lane.b32.xlu1 %v1470_v45, %s1545_s24  ;;  %1461 = vrot.lane.b32.xlu0 %v1460_v14, %s1543_s22  ;;  %v844_v49 = vrot.slane %v1830_v16, 4  ;;  %v1480_v6 = vpack.i.bf16 %v770_v4, %v768_v0  ;;  %v1495_v17 = vpack.i.bf16 %v604_v3, %v602_v5  ;;  %v2025_v18 = vmax.f32 %v544_v2, %v559_v30 }
 0x14f   : > { %v679_v28 = vsel %vm668_vm1, %v676_v63, %v678_v24  ;;  %v755_v34 = vrot.slane %v1770_v50, 3  ;;  %v543_v38 = vmax.f32 %v463_v21, 0.0  ;;  %v558_v13 = vmax.f32 %v524_v9, 0.0 }
 0x150   : > { %v847_v31 = vsel %vm822_vm3, %v844_v49, %v846_v10  ;;  %v845_v8 = vsel %vm822_vm3, %v842_v19, %v844_v49  ;;  %v681_v33 = vsel %vm668_vm1, %v678_v24, %v680_v53  ;;  %v619_v42 = vrot.slane %v2025_v18, 1 }
 0x151   : > { %v1490_v35 = vpack.i.bf16 %v847_v31, %v845_v8  ;;  %v1500_v41 = vpack.i.bf16 %v681_v33, %v679_v28  ;;  %v1547_v44 = vmov 0.0   ;;  %v756_v39 = vsel %vm745_vm2, %v753_v32, %v755_v34 }
 0x152   : > { %1476 = vrot.lane.b32.xlu1 %v1475_v52, %s1546_s26  ;;  %1486 = vrot.lane.b32.xlu0 %v1485_v11, %s1546_s26  ;;  %v621_v63 = vrot.slane %v1547_v44, 1  ;;  %v2046_v48 = vmax.f32 %v543_v38, %v558_v13  ;;  %v758_v53 = vsel %vm745_vm2, %v755_v34, %v757_v1  ;;  %v832_v19 = vrot.slane %v1770_v50, 4 }
 0x153   : > { %v1505_v20 = vpack.i.bf16 %v758_v53, %v756_v39  ;;  %v696_v14 = vrot.slane %v2025_v18, 2  ;;  %v698_v51 = vrot.slane %v1547_v44, 2  ;;  %v773_v25 = vrot.slane %v2025_v18, 3 }
 0x154   : > { %v622_v45 = vsel %vm591_vm0, %v619_v42, %v621_v63  ;;  %v833_v32 = vsel %vm822_vm3, %v830_v36, %v832_v19  ;;  %v835_v1 = vsel %vm822_vm3, %v832_v19, %v834_v27  ;;  %v617_v37 = vrot.slane %v2046_v48, 1 }
 0x155   : > { %v1510_v54 = vpack.i.bf16 %v835_v1, %v833_v32  ;;  %v699_v15 = vsel %vm668_vm1, %v696_v14, %v698_v51  ;;  %v775_v58 = vrot.slane %v1547_v44, 3  ;;  %v694_v27 = vrot.slane %v2046_v48, 2 }
 0x156   : > { %1481 = vrot.lane.b32.xlu1 %v1480_v6, %s1545_s24  ;;  %1496 = vrot.lane.b32.xlu0 %v1495_v17, %s1543_s22  ;;  %v620_v60 = vsel %vm591_vm0, %v617_v37, %v619_v42  ;;  %v618_v36 = vsel %vm591_vm0, %v615_v56, %v617_v37  ;;  %v850_v30 = vrot.slane %v2025_v18, 4  ;;  %v852_v52 = vrot.slane %v1547_v44, 4 }
 0x157   : > { %v1515_v29 = vpack.i.bf16 %v620_v60, %v618_v36  ;;  %v776_v61 = vsel %vm745_vm2, %v773_v25, %v775_v58  ;;  %v697_v11 = vsel %vm668_vm1, %v694_v27, %v696_v14  ;;  %v695_v2 = vsel %vm668_vm1, %v692_v57, %v694_v27 }
 0x158   : > { %v771_v56 = vrot.slane %v2046_v48, 3  ;;  %v1520_v4 = vpack.i.bf16 %v697_v11, %v695_v2  ;;  %v853_v5 = vsel %vm822_vm3, %v850_v30, %v852_v52  ;;  %v848_v21 = vrot.slane %v2046_v48, 4 }
 0x15a   : > { %1491 = vrot.lane.b32.xlu1 %v1490_v35, %s1546_s26  ;;  %1501 = vrot.lane.b32.xlu0 %v1500_v41, %s1544_s23  ;;  %v774_v3 = vsel %vm745_vm2, %v771_v56, %v773_v25  ;;  %v772_v24 = vsel %vm745_vm2, %v769_v55, %v771_v56  ;;  %v851_v57 = vsel %vm822_vm3, %v848_v21, %v850_v30 }
 0x15b   : > { %v1525_v9 = vpack.i.bf16 %v774_v3, %v772_v24  ;;  %v849_v0 = vsel %vm822_vm3, %v846_v10, %v848_v21 }
 0x15c   : > { %v1530_v49 = vpack.i.bf16 %v851_v57, %v849_v0 }
 0x15e   : > { %651 = vrot.lane.b32.xlu1 %v622_v45, %s1543_s22  ;;  %1506 = vrot.lane.b32.xlu0 %v1505_v20, %s1545_s24 }
 0x162   : > { %728 = vrot.lane.b32.xlu1 %v699_v15, %s1544_s23  ;;  %1511 = vrot.lane.b32.xlu0 %v1510_v54, %s1546_s26 }
 0x166   : > { %805 = vrot.lane.b32.xlu1 %v776_v61, %s1545_s24  ;;  %1516 = vrot.lane.b32.xlu0 %v1515_v29, %s1543_s22  ;;  %s225_s22 = smul.u32 15, %s1200_s19 }
 0x168   : > { %p226_p4 = scmp.lt.s32.totalorder %s225_s22, 29 }
 0x16a   : > { %882 = vrot.lane.b32.xlu1 %v853_v5, %s1546_s26  ;;  %1521 = vrot.lane.b32.xlu0 %v1520_v4, %s1544_s23  ;;  %s2278_s22 = smov (!%p226_p4, %s225_s22), 29 }
 0x16b   : > { %s1207_s27 = sshll.u32 %s2278_s22, 3 }
 0x16c   : > { %s2234_s6 = scalar_lea.vmem %s2274_s5, %s1207_s27 }
 0x16e   : > { %1526 = vrot.lane.b32.xlu0 %v1525_v9, %s1545_s24 }
 0x172   : > { %1531 = vrot.lane.b32.xlu0 %v1530_v49, %s1546_s26 }
 0x190   : > { %v2095_v6 = vpop.permute.xlu1 %1396 }
 0x194   : > { %v2097_v17 = vpop.permute.xlu1 %1401 }
 0x198   : > { %v2099_v31 = vpop.permute.xlu1 %1406  ;;  %v2101_v55 = vpop.permute.xlu0 %1416 }
 0x19c   : > { %v2103_v28 = vpop.permute.xlu1 %1411  ;;  %v2105_v34 = vpop.permute.xlu0 %1421 }
 0x1a0   : > { %v2107_v38 = vpop.permute.xlu1 %1431  ;;  %v2109_v13 = vpop.permute.xlu0 %1426 }
 0x1a4   : > { %v2111_v10 = vpop.permute.xlu1 %1436 }
 0x1b4   : > { %v1442_v8 = vpop.permute.xlu0 %1441  ;;  %v1447_v33 = vpop.permute.xlu1 %1446 }
 0x1b5   : > { %v1444_v35 = vunpack.i.h.bf16 %v1442_v8  ;;  %v1443_v41 = vunpack.i.l.bf16 %v1442_v8  ;;  %v1449_v44 = vunpack.i.h.bf16 %v1447_v33  ;;  %v1448_v63 = vunpack.i.l.bf16 %v1447_v33 }
 0x1b6   : > { %v1399_v33 = vunpack.i.h.bf16 %v2095_v6 }
 0x1b7   : > { %v901_v39 = vsel %vm899_vm4, %v1904_v23, %v1444_v35  ;;  %v900_v53 = vsel %vm899_vm4, %v1909_v47, %v1443_v41  ;;  %v1398_v35 = vunpack.i.l.bf16 %v2095_v6  ;;  %v1404_v41 = vunpack.i.h.bf16 %v2097_v17 }
 0x1b8   : > { %v1452_v42 = vpop.permute.xlu0 %1451  ;;  %v916_v51 = vsel %vm915_vm5, %v900_v53, %v1448_v63  ;;  %v917_v32 = vsel %vm915_vm5, %v901_v39, %v1449_v44  ;;  %v1419_v44 = vunpack.i.h.bf16 %v2101_v55  ;;  %v1418_v63 = vunpack.i.l.bf16 %v2101_v55 }
 0x1b9   : > { %v1454_v19 = vunpack.i.h.bf16 %v1452_v42  ;;  %v1453_v20 = vunpack.i.l.bf16 %v1452_v42  ;;  %v1403_v42 = vunpack.i.l.bf16 %v2097_v17  ;;  %v1409_v39 = vunpack.i.h.bf16 %v2099_v31 }
 0x1ba   : > { %v1408_v53 = vunpack.i.l.bf16 %v2099_v31  ;;  %v907_v6 = vsel %vm899_vm4, %v1777_v7, %v1399_v33  ;;  %v1424_v17 = vunpack.i.h.bf16 %v2105_v34  ;;  %v909_v31 = vsel %vm899_vm4, %v1793_v43, %v1419_v44 }
 0x1bb   : > { %v932_v54 = vsel %vm931_vm6, %v916_v51, %v1453_v20  ;;  %v933_v23 = vsel %vm931_vm6, %v917_v32, %v1454_v19  ;;  %v923_v55 = vsel %vm915_vm5, %v907_v6, %v1404_v41  ;;  %v908_v32 = vsel %vm899_vm4, %v1784_v22, %v1418_v63 }
 0x1bc   : > { %v1467_v45 = vpop.permute.xlu1 %1466  ;;  %v1457_v14 = vpop.permute.xlu0 %1456  ;;  %v1413_v7 = vunpack.i.l.bf16 %v2103_v28  ;;  %v1429_v22 = vunpack.i.h.bf16 %v2109_v13  ;;  %v1438_v33 = vunpack.i.l.bf16 %v2111_v10 }
 0x1bd   : > { %v1459_v1 = vunpack.i.h.bf16 %v1457_v14  ;;  %v1458_v37 = vunpack.i.l.bf16 %v1457_v14  ;;  %v1469_v29 = vunpack.i.h.bf16 %v1467_v45  ;;  %v1468_v61 = vunpack.i.l.bf16 %v1467_v45 }
 0x1be   : > { %v906_v45 = vsel %vm899_vm4, %v1781_v12, %v1398_v35  ;;  %v1423_v14 = vunpack.i.l.bf16 %v2105_v34 }
 0x1bf   : > { %v948_v15 = vsel %vm947_vm7, %v932_v54, %v1458_v37  ;;  %v949_v47 = vsel %vm947_vm7, %v933_v23, %v1459_v1  ;;  %v922_v51 = vsel %vm915_vm5, %v906_v45, %v1403_v42  ;;  %v1414_v1 = vunpack.i.h.bf16 %v2103_v28 }
 0x1c0   : > { %v963_v25 = vpack.c.bf16 %v949_v47, %v948_v15  ;;  %v1472_v58 = vpop.permute.xlu1 %1471  ;;  %v1462_v60 = vpop.permute.xlu0 %1461  ;;  %v938_v12 = vsel %vm931_vm6, %v922_v51, %v1408_v53  ;;  %v939_v37 = vsel %vm931_vm6, %v923_v55, %v1409_v39  ;;  %v924_v15 = vsel %vm915_vm5, %v908_v32, %v1423_v14 }
 0x1c1   : > { %v1464_v36 = vunpack.i.h.bf16 %v1462_v60  ;;  %v1463_v27 = vunpack.i.l.bf16 %v1462_v60  ;;  %v1474_v30 = vunpack.i.h.bf16 %v1472_v58  ;;  %v1473_v52 = vunpack.i.l.bf16 %v1472_v58 }
 0x1c2   : > { %1350 = vmatprep.mubr.msk.bf16.mxu1 %vm993_vm8, %v963_v25  ;;  %v925_v47 = vsel %vm915_vm5, %v909_v31, %v1424_v17  ;;  %v1428_v60 = vunpack.i.l.bf16 %v2109_v13 }
 0x1c3   : > { %v903_v11 = vsel %vm899_vm4, %v1935_v26, %v1464_v36  ;;  %v902_v2 = vsel %vm899_vm4, %v1915_v62, %v1463_v27  ;;  %v954_v27 = vsel %vm947_vm7, %v938_v12, %v1413_v7 }
 0x1c4   : > { %v919_v56 = vsel %vm915_vm5, %v903_v11, %v1469_v29  ;;  %v918_v4 = vsel %vm915_vm5, %v902_v2, %v1468_v61  ;;  %v1477_v5 = vpop.permute.xlu1 %1476  ;;  %v2130_v3 = vpop.permute.xlu0 %1486  ;;  %v955_v29 = vsel %vm947_vm7, %v939_v37, %v1414_v1  ;;  %v1433_v11 = vunpack.i.l.bf16 %v2107_v38 }
 0x1c5   : > { %v1479_v24 = vunpack.i.h.bf16 %v1477_v5  ;;  %v1478_v21 = vunpack.i.l.bf16 %v1477_v5  ;;  %v934_v9 = vsel %vm931_vm6, %v918_v4, %v1473_v52  ;;  %v935_v57 = vsel %vm931_vm6, %v919_v56, %v1474_v30 }
 0x1c6   : > { %v1489_v61 = vunpack.i.h.bf16 %v2130_v3  ;;  %v1488_v30 = vunpack.i.l.bf16 %v2130_v3  ;;  %v1434_v52 = vunpack.i.h.bf16 %v2107_v38  ;;  %v941_v3 = vsel %vm931_vm6, %v925_v47, %v1429_v22 }
 0x1c7   : > { %v950_v0 = vsel %vm947_vm7, %v934_v9, %v1478_v21  ;;  %v951_v26 = vsel %vm947_vm7, %v935_v57, %v1479_v24  ;;  %v940_v9 = vsel %vm931_vm6, %v924_v15, %v1428_v60  ;;  %v966_v42 = vpack.c.bf16 %v955_v29, %v954_v27 }
 0x1c8   : > { %v964_v49 = vpack.c.bf16 %v951_v26, %v950_v0  ;;  %v2136_v8 = vpop.permute.xlu1 %1481  ;;  %v1497_v62 = vpop.permute.xlu0 %1496  ;;  %v956_v0 = vsel %vm947_vm7, %v940_v9, %v1488_v30  ;;  %v911_v6 = vsel %vm899_vm4, %v1830_v16, %v1434_v52 }
 0x1c9   : > { %v1499_v54 = vunpack.i.h.bf16 %v1497_v62  ;;  %v1498_v34 = vunpack.i.l.bf16 %v1497_v62  ;;  %v1439_v62 = vunpack.i.h.bf16 %v2111_v10  ;;  %v1484_v44 = vunpack.i.h.bf16 %v2136_v8 }
 0x1ca   : > { %1351 = vmatmul.mubr.msk.bf16.vlgmr.msra.gmra.mxu1 %vm993_vm8, %v964_v49  ;;  %v1483_v63 = vunpack.i.l.bf16 %v2136_v8  ;;  %v910_v10 = vsel %vm899_vm4, %v1808_v59, %v1433_v11 }
 0x1cb   : > { %v905_v2 = vsel %vm899_vm4, %v1770_v50, %v1499_v54  ;;  %v904_v13 = vsel %vm899_vm4, %v1946_v46, %v1498_v34  ;;  %v957_v50 = vsel %vm947_vm7, %v941_v3, %v1489_v61  ;;  %v926_v45 = vsel %vm915_vm5, %v910_v10, %v1438_v33 }
 0x1cc   : > { %v2147_v19 = vpop.permute.xlu1 %1491  ;;  %v1502_v20 = vpop.permute.xlu0 %1501  ;;  %v967_v39 = vpack.c.bf16 %v957_v50, %v956_v0  ;;  %v927_v17 = vsel %vm915_vm5, %v911_v6, %v1439_v62 }
 0x1cd   : > { %v1504_v25 = vunpack.i.h.bf16 %v1502_v20  ;;  %v1503_v43 = vunpack.i.l.bf16 %v1502_v20  ;;  %v1494_v53 = vunpack.i.h.bf16 %v2147_v19  ;;  %v1493_v20 = vunpack.i.l.bf16 %v2147_v19 }
 0x1ce   : > { %v943_v14 = vsel %vm931_vm6, %v927_v17, %v1484_v44  ;;  %v942_v19 = vsel %vm931_vm6, %v926_v45, %v1483_v63 }
 0x1cf   : > { %v920_v4 = vsel %vm915_vm5, %v904_v13, %v1503_v43  ;;  %v921_v5 = vsel %vm915_vm5, %v905_v2, %v1504_v25  ;;  %v958_v55 = vsel %vm947_vm7, %v942_v19, %v1493_v20  ;;  %v959_v16 = vsel %vm947_vm7, %v943_v14, %v1494_v53 }
 0x1d0   : > { %v1507_v23 = vpop.permute.xlu0 %1506  ;;  %v652_v58 = vpop.permute.xlu1 %651  ;;  %v968_v1 = vpack.c.bf16 %v959_v16, %v958_v55 }
 0x1d1   : > { %v1509_v36 = vunpack.i.h.bf16 %v1507_v23  ;;  %v1508_v28 = vunpack.i.l.bf16 %v1507_v23  ;;  %v914_v37 = vsel %vm899_vm4, %v2025_v18, %v652_v58 }
 0x1d3   : > { %v936_v57 = vsel %vm931_vm6, %v920_v4, %v1508_v28  ;;  %v937_v38 = vsel %vm931_vm6, %v921_v5, %v1509_v36 }
 0x1d4   : > { %v1512_v56 = vpop.permute.xlu0 %1511  ;;  %v729_v46 = vpop.permute.xlu1 %728 }
 0x1d5   : > { %v1514_v24 = vunpack.i.h.bf16 %v1512_v56  ;;  %v1513_v21 = vunpack.i.l.bf16 %v1512_v56  ;;  %v930_v23 = vsel %vm915_vm5, %v914_v37, %v729_v46 }
 0x1d7   : > { %v952_v26 = vsel %vm947_vm7, %v936_v57, %v1513_v21  ;;  %v953_v49 = vsel %vm947_vm7, %v937_v38, %v1514_v24 }
 0x1d8   : > { %v965_v35 = vpack.c.bf16 %v953_v49, %v952_v26  ;;  %v1517_v41 = vpop.permute.xlu0 %1516  ;;  %v806_v51 = vpop.permute.xlu1 %805 }
 0x1d9   : > { %v1519_v31 = vunpack.i.h.bf16 %v1517_v41  ;;  %v1518_v59 = vunpack.i.l.bf16 %v1517_v41  ;;  %v946_v47 = vsel %vm931_vm6, %v930_v23, %v806_v51 }
 0x1da   : > { %1354 = vmatprep.mubr.msk.bf16.mxu1 %vm993_vm8, %v965_v35 }
 0x1db   : > { %1355 = vmatmul.mubr.msk.bf16.gmra.mxu1 %vm993_vm8, %v966_v42  ;;  %v913_v25 = vsel %vm899_vm4, %v2046_v48, %v1519_v31  ;;  %v912_v43 = vsel %vm899_vm4, %v1850_v40, %v1518_v59  ;;  %v1209_v40 = vld [vmem:[%s2273_s4] ss:$0 sm:$0xff] }
 0x1dc   : > { %v1522_v8 = vpop.permute.xlu0 %1521  ;;  %1358 = vmatprep.mubr.msk.bf16.mxu1 %vm993_vm8, %v967_v39  ;;  %v883_v15 = vpop.permute.xlu1 %882 }
 0x1dd   : > { %v1524_v7 = vunpack.i.h.bf16 %v1522_v8  ;;  %v1523_v12 = vunpack.i.l.bf16 %v1522_v8  ;;  %v962_v28 = vsel %vm947_vm7, %v946_v47, %v883_v15 }
 0x1de   : > { %v970_v52 = vpack.c.bf16 %v962_v28, %v962_v28 }
 0x1df   : > { %v928_v60 = vsel %vm915_vm5, %v912_v43, %v1523_v12  ;;  %v929_v18 = vsel %vm915_vm5, %v913_v25, %v1524_v7 }
 0x1e0   : > { %v1527_v32 = vpop.permute.xlu0 %1526 }
 0x1e1   : > { %v1529_v54 = vunpack.i.h.bf16 %v1527_v32  ;;  %v1528_v34 = vunpack.i.l.bf16 %v1527_v32 }
 0x1e3   : > { %1359 = vmatmul.mubr.msk.bf16.gmra.mxu1 %vm993_vm8, %v968_v1  ;;  %v944_v27 = vsel %vm931_vm6, %v928_v60, %v1528_v34  ;;  %v945_v29 = vsel %vm931_vm6, %v929_v18, %v1529_v54 }
 0x1e4   : > { %v1532_v22 = vpop.permute.xlu0 %1531 }
 0x1e5   : > { %v1534_v58 = vunpack.i.h.bf16 %v1532_v22  ;;  %v1533_v36 = vunpack.i.l.bf16 %v1532_v22 }
 0x1e7   : > { %v960_v61 = vsel %vm947_vm7, %v944_v27, %v1533_v36  ;;  %v961_v48 = vsel %vm947_vm7, %v945_v29, %v1534_v58 }
 0x1e8   : > { %v969_v30 = vpack.c.bf16 %v961_v48, %v960_v61 }
 0x1ea   : > { %1362 = vmatprep.mubr.msk.bf16.mxu1 %vm993_vm8, %v969_v30 }
 0x1eb   : > { %1363 = vmatmul.mubr.msk.bf16.gmra.mxu1 %vm993_vm8, %v970_v52 }
 0x28a   : > { %v1352_v11 = vpop.f32.mrf.mxu1 }
 0x28b   : > { %v1061_v2 = vadd.f32 %v1352_v11, %v1209_v40 }
 0x28c   : > { %v1052_v13 = vpop.f32.mrf.mxu1 }
 0x28d   : > { %v1116_v56 = vmax.f32 %v1061_v2, 0.0  ;;  %v1053_v4 = vadd.f32 %v1209_v40, %v1052_v13 }
 0x28e   : > { %v1353_v5 = vpop.f32.mrf.mxu1 }
 0x28f   : > { %1131 = vst.msk [vmem:[%s2234_s6 + $0x10] sm:$0xff] %vm915_vm5, %v1116_v56  ;;  %v1114_v24 = vmax.f32 %v1053_v4, 0.0  ;;  %v1064_v21 = vadd.f32 %v1353_v5, %v1209_v40 }
 0x290   : > { %v1055_v9 = vpop.f32.mrf.mxu1 }
 0x291   : > { %1129 = vst.msk [vmem:[%s2234_s6] sm:$0xff] %vm915_vm5, %v1114_v24  ;;  %v1117_v3 = vmax.f32 %v1064_v21, 0.0  ;;  %v1056_v57 = vadd.f32 %v1209_v40, %v1055_v9 }
 0x293   : > { %1132 = vst.msk [vmem:[%s2234_s6 + $0x18] sm:$0xff] %vm915_vm5, %v1117_v3  ;;  %v1115_v38 = vmax.f32 %v1056_v57, 0.0 }
 0x295   : > { %1130 = vst.msk [vmem:[%s2234_s6 + $0x8] sm:$0xff] %vm915_vm5, %v1115_v38 }
 0x29b   : > { %v1356_v50 = vpop.f32.mrf.mxu1 }
 0x29c   : > { %v1077_v0 = vadd.f32 %v1356_v50, %v1209_v40 }
 0x29d   : > { %v1068_v46 = vpop.f32.mrf.mxu1 }
 0x29e   : > { %v1120_v26 = vmax.f32 %v1077_v0, 0.0  ;;  %v1069_v49 = vadd.f32 %v1209_v40, %v1068_v46 }
 0x29f   : > { %v1357_v62 = vpop.f32.mrf.mxu1 }
 0x2a0   : > { %1135 = vst.msk [vmem:[%s2234_s6 + $0x30] sm:$0xff] %vm915_vm5, %v1120_v26  ;;  %v1118_v33 = vmax.f32 %v1069_v49, 0.0  ;;  %v1080_v35 = vadd.f32 %v1357_v62, %v1209_v40 }
 0x2a1   : > { %v1071_v41 = vpop.f32.mrf.mxu1 }
 0x2a2   : > { %1133 = vst.msk [vmem:[%s2234_s6 + $0x20] sm:$0xff] %vm915_vm5, %v1118_v33  ;;  %v1121_v42 = vmax.f32 %v1080_v35, 0.0  ;;  %v1072_v44 = vadd.f32 %v1209_v40, %v1071_v41 }
 0x2a3   : > { %v1360_v63 = vpop.f32.mrf.mxu1 }
 0x2a4   : > { %1136 = vst.msk [vmem:[%s2234_s6 + $0x38] sm:$0xff] %vm915_vm5, %v1121_v42  ;;  %v1119_v39 = vmax.f32 %v1072_v44, 0.0  ;;  %v1093_v53 = vadd.f32 %v1360_v63, %v1209_v40 }
 0x2a5   : > { %v1084_v20 = vpop.f32.mrf.mxu1 }
 0x2a6   : > { %1134 = vst.msk [vmem:[%s2234_s6 + $0x28] sm:$0xff] %vm915_vm5, %v1119_v39  ;;  %v1124_v6 = vmax.f32 %v1093_v53, 0.0  ;;  %v1085_v10 = vadd.f32 %v1209_v40, %v1084_v20 }
 0x2a7   : > { %v1361_v45 = vpop.f32.mrf.mxu1 }
 0x2a8   : > { %1139 = vst.msk [vmem:[%s2234_s6 + $0x50] sm:$0xff] %vm915_vm5, %v1124_v6  ;;  %v1122_v17 = vmax.f32 %v1085_v10, 0.0  ;;  %v1096_v8 = vadd.f32 %v1361_v45, %v1209_v40 }
 0x2a9   : > { %v1087_v14 = vpop.f32.mrf.mxu1 }
 0x2aa   : > { %1137 = vst.msk [vmem:[%s2234_s6 + $0x40] sm:$0xff] %vm915_vm5, %v1122_v17  ;;  %v1125_v19 = vmax.f32 %v1096_v8, 0.0  ;;  %v1088_v51 = vadd.f32 %v1209_v40, %v1087_v14 }
 0x2ab   : > { %v1364_v55 = vpop.f32.mrf.mxu1 }
 0x2ac   : > { %1140 = vst.msk [vmem:[%s2234_s6 + $0x58] sm:$0xff] %vm915_vm5, %v1125_v19  ;;  %v1123_v16 = vmax.f32 %v1088_v51, 0.0  ;;  %v1109_v31 = vadd.f32 %v1364_v55, %v1209_v40 }
 0x2ad   : > { %v1100_v59 = vpop.f32.mrf.mxu1 }
 0x2ae   : > { %1138 = vst.msk [vmem:[%s2234_s6 + $0x48] sm:$0xff] %vm915_vm5, %v1123_v16  ;;  %v1128_v32 = vmax.f32 %v1109_v31, 0.0  ;;  %v1101_v1 = vadd.f32 %v1209_v40, %v1100_v59 }
 0x2af   : > { %v1365_v7 = vpop.f32.mrf.mxu1 }
 0x2b0   : > { %1143 = vst.msk [vmem:[%s2234_s6 + $0x70] sm:$0xff] %vm915_vm5, %v1128_v32  ;;  %v1126_v12 = vmax.f32 %v1101_v1, 0.0 }
 0x2b1   : > { %v1103_v37 = vpop.f32.mrf.mxu1 }
 0x2b2   : > { %1141 = vst.msk [vmem:[%s2234_s6 + $0x60] sm:$0xff] %vm915_vm5, %v1126_v12  ;;  %v1104_v54 = vadd.f32 %v1209_v40, %v1103_v37 }
 0x2b4   : > { %v1127_v34 = vmax.f32 %v1104_v54, 0.0 }
 0x2b6   : > { %1142 = vst.msk [vmem:[%s2234_s6 + $0x68] sm:$0xff] %vm915_vm5, %v1127_v34 }
 0x2b7 PF: > { %s15_s18 = sadd.s32 1, %s1541_s18  }
 0x2b8   : > { %p12_p5 = scmp.ge.s32.totalorder %s15_s18, 4  }
 0x2ba   :  { %14 = sbr.rel (!%p12_p5) target bundleno = 1 (0x1), region = 70 }

// kernel: psgcn_forward.5
= control target key start
LH: loop header
LB: loop body
LE: loop exit
PB: predicated region body
PF: predicated region fallthrough
CT: control target
= control target key end

     0   :  { %v276_v0 = vmov 0   ;;  %vm132_vm0 = vcmask 785408   ;;  %vm242_vm1 = vcmask 7168   ;;  %s540_s1 = inlined_call_operand.vmem [shape: f32[480,128], index: 1, kind: input, shape index: {}]   ;;  %s541_s0 = inlined_call_operand.vmem [shape: f32[16,480], index: 0, kind: input, shape index: {}]   ;;  %s542_s4 = inlined_call_operand.<no memory space> [shape: f32[1,1], index: 4, kind: input, shape index: {}]   ;;  %s543_s2 = inlined_call_operand.vmem [shape: f32[1,128], index: 2, kind: input, shape index: {}]   ;;  %s544_s3 = inlined_call_operand.vmem [shape: f32[1,128], index: 3, kind: input, shape index: {}]   ;;  %s545_s5 = inlined_call_operand.vmem [shape: f32[16,1], index: 5, kind: output, shape index: {}]  }
   0x1   :  { %177 = vmatprep.subr.bf16.mxu1 %v276_v0  ;;  %v81_v1 = vld [vmem:[%s540_s1 + $0x170] sm:$0xff]  ;;  %v82_v2 = vld [vmem:[%s540_s1 + $0x178] sm:$0xff]  ;;  %v79_v3 = vld [vmem:[%s540_s1 + $0x160] sm:$0xff] }
   0x2   :  { %v118_v4 = vpack.c.bf16 %v82_v2, %v81_v1  ;;  %v80_v5 = vld [vmem:[%s540_s1 + $0x168] sm:$0xff]  ;;  %v65_v6 = vld [vmem:[%s540_s1 + $0xf0] sm:$0xff]  ;;  %v66_v7 = vld [vmem:[%s540_s1 + $0xf8] sm:$0xff] }
   0x3   :  { %v49_v8 = vld [vmem:[%s540_s1 + $0x70] sm:$0xff]  ;;  %v117_v9 = vpack.c.bf16 %v80_v5, %v79_v3  ;;  %v78_v11 = vld [vmem:[%s540_s1 + $0x158] sm:$0xff]  ;;  %v110_v12 = vpack.c.bf16 %v66_v7, %v65_v6  ;;  %v63_v15 = vld [vmem:[%s540_s1 + $0xe0] sm:$0xff] }
   0x4   :  { %178 = vmatpush1.bf16.msra.mxu1 %v118_v4  ;;  %v77_v10 = vld [vmem:[%s540_s1 + $0x150] sm:$0xff]  ;;  %v50_v13 = vld [vmem:[%s540_s1 + $0x78] sm:$0xff]  ;;  %v64_v16 = vld [vmem:[%s540_s1 + $0xe8] sm:$0xff] }
   0x5   :  { %179 = vmatprep.subr.bf16.mxu1 %v276_v0  ;;  %v102_v14 = vpack.c.bf16 %v50_v13, %v49_v8  ;;  %v47_v17 = vld [vmem:[%s540_s1 + $0x60] sm:$0xff]  ;;  %253 = vmatprep.subr.bf16.mxu0 %v110_v12  ;;  %v109_v18 = vpack.c.bf16 %v64_v16, %v63_v15  ;;  %v48_v19 = vld [vmem:[%s540_s1 + $0x68] sm:$0xff]  ;;  %v61_v21 = vld [vmem:[%s540_s1 + $0xd0] sm:$0xff]  ;;  %v116_v23 = vpack.c.bf16 %v78_v11, %v77_v10 }
   0x6   :  { %v101_v20 = vpack.c.bf16 %v48_v19, %v47_v17  ;;  %v62_v22 = vld [vmem:[%s540_s1 + $0xd8] sm:$0xff]  ;;  %v75_v24 = vld [vmem:[%s540_s1 + $0x140] sm:$0xff]  ;;  %v45_v26 = vld [vmem:[%s540_s1 + $0x50] sm:$0xff] }
   0x7   :  { %254 = vmatpush3.bf16.msra.mxu0 %v102_v14  ;;  %v108_v25 = vpack.c.bf16 %v62_v22, %v61_v21  ;;  %v46_v27 = vld [vmem:[%s540_s1 + $0x58] sm:$0xff]  ;;  %v76_v28 = vld [vmem:[%s540_s1 + $0x148] sm:$0xff]  ;;  %v59_v29 = vld [vmem:[%s540_s1 + $0xc0] sm:$0xff] }
   0x8   :  { %180 = vmatpush1.bf16.msra.mxu1 %v117_v9  ;;  %255 = vmatprep.subr.bf16.mxu0 %v109_v18  ;;  %v60_v30 = vld [vmem:[%s540_s1 + $0xc8] sm:$0xff]  ;;  %v100_v31 = vpack.c.bf16 %v46_v27, %v45_v26  ;;  %v115_v32 = vpack.c.bf16 %v76_v28, %v75_v24  ;;  %v73_v33 = vld [vmem:[%s540_s1 + $0x130] sm:$0xff]  ;;  %v43_v35 = vld [vmem:[%s540_s1 + $0x40] sm:$0xff] }
   0x9   :  { %181 = vmatprep.subr.bf16.mxu1 %v276_v0  ;;  %v107_v34 = vpack.c.bf16 %v60_v30, %v59_v29  ;;  %v44_v36 = vld [vmem:[%s540_s1 + $0x48] sm:$0xff]  ;;  %v74_v37 = vld [vmem:[%s540_s1 + $0x138] sm:$0xff]  ;;  %v57_v38 = vld [vmem:[%s540_s1 + $0xb0] sm:$0xff] }
   0xa   :  { %v58_v39 = vld [vmem:[%s540_s1 + $0xb8] sm:$0xff]  ;;  %v99_v40 = vpack.c.bf16 %v44_v36, %v43_v35  ;;  %v114_v41 = vpack.c.bf16 %v74_v37, %v73_v33  ;;  %v71_v42 = vld [vmem:[%s540_s1 + $0x120] sm:$0xff]  ;;  %v41_v44 = vld [vmem:[%s540_s1 + $0x30] sm:$0xff] }
   0xb   :  { %256 = vmatpush3.bf16.msra.mxu0 %v101_v20  ;;  %v106_v43 = vpack.c.bf16 %v58_v39, %v57_v38  ;;  %v42_v45 = vld [vmem:[%s540_s1 + $0x38] sm:$0xff]  ;;  %v72_v46 = vld [vmem:[%s540_s1 + $0x128] sm:$0xff]  ;;  %v55_v47 = vld [vmem:[%s540_s1 + $0xa0] sm:$0xff] }
   0xc   :  { %182 = vmatpush1.bf16.msra.mxu1 %v116_v23  ;;  %257 = vmatprep.subr.bf16.mxu0 %v108_v25  ;;  %v56_v48 = vld [vmem:[%s540_s1 + $0xa8] sm:$0xff]  ;;  %v98_v49 = vpack.c.bf16 %v42_v45, %v41_v44  ;;  %v113_v52 = vpack.c.bf16 %v72_v46, %v71_v42  ;;  %v69_v53 = vld [vmem:[%s540_s1 + $0x110] sm:$0xff]  ;;  %v39_v55 = vld [vmem:[%s540_s1 + $0x20] sm:$0xff] }
   0xd   :  { %183 = vmatprep.subr.bf16.mxu1 %v276_v0  ;;  %v24_v50 = vld [vmem:[%s541_s0 + $0x8] sm:$0xff]  ;;  %v105_v54 = vpack.c.bf16 %v56_v48, %v55_v47  ;;  %v70_v58 = vld [vmem:[%s540_s1 + $0x118] sm:$0xff]  ;;  %v53_v59 = vld [vmem:[%s540_s1 + $0x90] sm:$0xff] }
   0xe   :  { %v28_v51 = vld [vmem:[%s541_s0 + $0x28] sm:$0xff]  ;;  %v54_v60 = vld [vmem:[%s540_s1 + $0x98] sm:$0xff]  ;;  %v112_v2 = vpack.c.bf16 %v70_v58, %v69_v53  ;;  %v67_v3 = vld [vmem:[%s540_s1 + $0x100] sm:$0xff] }
   0xf   :  { %258 = vmatpush3.bf16.msra.mxu0 %v100_v31  ;;  %v40_v56 = vld [vmem:[%s540_s1 + $0x28] sm:$0xff]  ;;  %v32_v57 = vpack.c.bf16 %v28_v51, %v24_v50  ;;  %v26_v61 = vld [vmem:[%s541_s0 + $0x18] sm:$0xff]  ;;  %v104_v4 = vpack.c.bf16 %v54_v60, %v53_v59  ;;  %v37_v5 = vld [vmem:[%s540_s1 + $0x10] sm:$0xff] }
  0x10   :  { %184 = vmatpush1.bf16.msra.mxu1 %v115_v32  ;;  %259 = vmatprep.subr.bf16.mxu0 %v107_v34  ;;  %v30_v62 = vld [vmem:[%s541_s0 + $0x38] sm:$0xff]  ;;  %v97_v63 = vpack.c.bf16 %v40_v56, %v39_v55  ;;  %v68_v7 = vld [vmem:[%s540_s1 + $0x108] sm:$0xff]  ;;  %v51_v8 = vld [vmem:[%s540_s1 + $0x80] sm:$0xff] }
  0x11   :  { %185 = vmatprep.subr.bf16.mxu1 %v276_v0  ;;  %168 = vmatprep.mubr.bf16.mxu0 %v32_v57  ;;  %v34_v1 = vpack.c.bf16 %v30_v62, %v26_v61  ;;  %v38_v6 = vld [vmem:[%s540_s1 + $0x18] sm:$0xff]  ;;  %v52_v9 = vld [vmem:[%s540_s1 + $0x88] sm:$0xff]  ;;  %v111_v11 = vpack.c.bf16 %v68_v7, %v67_v3  ;;  %v35_v13 = vld [vmem:[%s540_s1] sm:$0xff] }
  0x12   :  { %v96_v10 = vpack.c.bf16 %v38_v6, %v37_v5  ;;  %v103_v12 = vpack.c.bf16 %v52_v9, %v51_v8  ;;  %v36_v14 = vld [vmem:[%s540_s1 + $0x8] sm:$0xff]  ;;  %v93_v15 = vld [vmem:[%s540_s1 + $0x1d0] sm:$0xff]  ;;  %v94_v16 = vld [vmem:[%s540_s1 + $0x1d8] sm:$0xff] }
  0x13   :  { %260 = vmatpush3.bf16.msra.mxu0 %v99_v40  ;;  %250 = vmatprep.mubr.msk.bf16.mxu1 %vm132_vm0, %v34_v1  ;;  %v95_v17 = vpack.c.bf16 %v36_v14, %v35_v13  ;;  %v23_v18 = vld [vmem:[%s541_s0] sm:$0xff]  ;;  %v124_v20 = vpack.c.bf16 %v94_v16, %v93_v15  ;;  %v92_v22 = vld [vmem:[%s540_s1 + $0x1c8] sm:$0xff]  ;;  %v89_v25 = vld [vmem:[%s540_s1 + $0x1b0] sm:$0xff]  ;;  %v10_v40 = vstv %s542_s4 }
  0x14   :  { %186 = vmatpush1.bf16.msra.mxu1 %v114_v41  ;;  %261 = vmatprep.subr.bf16.mxu0 %v106_v43  ;;  %v27_v19 = vld [vmem:[%s541_s0 + $0x20] sm:$0xff]  ;;  %v90_v26 = vld [vmem:[%s540_s1 + $0x1b8] sm:$0xff]  ;;  %v88_v29 = vld [vmem:[%s540_s1 + $0x1a8] sm:$0xff]  ;;  %11 = vst [vmem:[#allocation2] sm:$0x1] %v10_v40 }
  0x15   :  { %187 = vmatprep.subr.bf16.mxu1 %v276_v0  ;;  %v91_v21 = vld [vmem:[%s540_s1 + $0x1c0] sm:$0xff]  ;;  %v31_v23 = vpack.c.bf16 %v27_v19, %v23_v18  ;;  %v122_v27 = vpack.c.bf16 %v90_v26, %v89_v25  ;;  %v85_v31 = vld [vmem:[%s540_s1 + $0x190] sm:$0xff]  ;;  %v86_v32 = vld [vmem:[%s540_s1 + $0x198] sm:$0xff] }
  0x16   :  { %v123_v24 = vpack.c.bf16 %v92_v22, %v91_v21  ;;  %v87_v28 = vld [vmem:[%s540_s1 + $0x1a0] sm:$0xff]  ;;  %v120_v33 = vpack.c.bf16 %v86_v32, %v85_v31  ;;  %v84_v35 = vld [vmem:[%s540_s1 + $0x188] sm:$0xff]  ;;  %v25_v37 = vld [vmem:[%s541_s0 + $0x10] sm:$0xff] }
  0x17   :  { %262 = vmatpush3.bf16.msra.mxu0 %v98_v49  ;;  %v121_v30 = vpack.c.bf16 %v88_v29, %v87_v28  ;;  %v83_v34 = vld [vmem:[%s540_s1 + $0x180] sm:$0xff]  ;;  %v29_v38 = vld [vmem:[%s541_s0 + $0x30] sm:$0xff] }
  0x18   :  { %188 = vmatpush1.bf16.msra.mxu1 %v113_v52  ;;  %263 = vmatprep.subr.bf16.mxu0 %v105_v54  ;;  %v119_v36 = vpack.c.bf16 %v84_v35, %v83_v34  ;;  %v33_v39 = vpack.c.bf16 %v29_v38, %v25_v37  ;;  %v249_v46 = vld [vmem:[%s543_s2] ss:$0 sm:$0xff] }
  0x19   :  { %189 = vmatprep.subr.bf16.mxu1 %v276_v0  ;;  %v251_v51 = vld [vmem:[%s544_s3] ss:$0 sm:$0xff] }
  0x1b   :  { %264 = vmatpush3.bf16.msra.mxu0 %v97_v63  ;;  %v252_v60 = vld [vmem:[#allocation2] ss:$0 sm:$0xff] }
  0x1c   :  { %190 = vmatpush1.bf16.msra.mxu1 %v112_v2  ;;  %265 = vmatprep.subr.bf16.mxu0 %v104_v4 }
  0x1d   :  { %191 = vmatprep.subr.bf16.mxu1 %v276_v0 }
  0x1f   :  { %266 = vmatpush3.bf16.msra.mxu0 %v96_v10 }
  0x20   :  { %192 = vmatpush1.bf16.msra.mxu1 %v111_v11  ;;  %267 = vmatprep.subr.bf16.mxu0 %v103_v12 }
  0x21   :  { %197 = vmatprep.subr.bf16.mxu1 %v276_v0 }
  0x23   :  { %268 = vmatpush3.bf16.msra.mxu0 %v95_v17 }
  0x24   :  { %198 = vmatpush2.bf16.msra.mxu1 %v124_v20 }
  0x25   :  { %199 = vmatprep.subr.bf16.mxu1 %v276_v0 }
  0x26   :  { %169 = vmatmul.mubr.bf16.vlgmr.msra.gmra.mxu0 %v31_v23 }
  0x28   :  { %200 = vmatpush2.bf16.msra.mxu1 %v123_v24 }
  0x29   :  { %201 = vmatprep.subr.bf16.mxu1 %v276_v0 }
  0x2c   :  { %202 = vmatpush2.bf16.msra.mxu1 %v122_v27 }
  0x2d   :  { %203 = vmatprep.subr.bf16.mxu1 %v276_v0 }
  0x30   :  { %204 = vmatpush2.bf16.msra.mxu1 %v121_v30 }
  0x31   :  { %205 = vmatprep.subr.bf16.mxu1 %v276_v0 }
  0x34   :  { %206 = vmatpush2.bf16.msra.mxu1 %v120_v33 }
  0x35   :  { %207 = vmatprep.subr.bf16.mxu1 %v276_v0 }
  0x38   :  { %208 = vmatpush2.bf16.msra.mxu1 %v119_v36 }
  0x3b   :  { %210 = vmatmul.mubr.bf16.vlgmr.msra.gmra.mxu1 %v33_v39 }
  0xe6   :  { %v269_v41 = vpop.f32.mrf.mxu0 }
  0xe8   :  { %v270_v42 = vpop.f32.mrf.mxu0 }
  0xe9   :  { %v271_v44 = vadd.f32 %v270_v42, %v269_v41 }
  0xea   :  { %v272_v43 = vpop.f32.mrf.mxu0 }
  0xeb   :  { %v171_v48 = vadd.f32 %v271_v44, %v249_v46 }
  0xec   :  { %v273_v45 = vpop.f32.mrf.mxu0 }
  0xed   :  { %v274_v47 = vadd.f32 %v273_v45, %v272_v43 }
  0xef   :  { %v174_v53 = vadd.f32 %v274_v47, %v249_v46 }
  0xfb   :  { %v211_v0 = vpop.f32.mrf.mxu1 }
  0xfc   :  { %v212_v49 = vadd.f32 %v211_v0, %v171_v48 }
  0xfd   :  { %v213_v50 = vpop.f32.mrf.mxu1 }
  0xfe   :  { %v218_v52 = vmax.f32 %v212_v49, 0.0 }
  0xff   :  { %v214_v54 = vpop.f32.mrf.mxu1 }
 0x100   :  { %v215_v55 = vadd.f32 %v214_v54, %v174_v53  ;;  %v227_v56 = vmul.f32 %v251_v51, %v218_v52 }
 0x101   :  { %v216_v57 = vpop.f32.mrf.mxu1 }
 0x102   :  { %v219_v58 = vmax.f32 %v215_v55, 0.0  ;;  %229 = vadd.xlane.f32.xlu0 %v227_v56 }
 0x104   :  { %v228_v59 = vmul.f32 %v251_v51, %v219_v58 }
 0x106   :  { %231 = vadd.xlane.f32.xlu0 %v228_v59 }
 0x18b   :  { %v230_v61 = vpop.xlane.xlu0 %229 }
 0x18c   :  { %v240_v62 = vadd.f32 %v252_v60, %v230_v61 }
 0x18e   :  { %243 = vst.msk [vmem:[%s545_s5] sm:$0xff] %vm242_vm1, %v240_v62 }
 0x18f   :  { %v232_v63 = vpop.xlane.xlu0 %231 }
 0x190   :  { %v241_v1 = vadd.f32 %v252_v60, %v232_v63 }
 0x192   :  { %244 = vst.msk [vmem:[%s545_s5 + $0x8] sm:$0xff] %vm242_vm1, %v241_v1 }

</bundles_post_ra>
